<compile_context>
chip_gen: v5e
topology: v5e:2x2
jax: 0.10.0
libtpu: 0.0.40
codegen_flags: <defaults>
</compile_context>

<pallas_src>
import functools
import math

import jax
import jax.numpy as jnp
from jax import lax
from jax.experimental import pallas as pl
from jax.experimental.pallas import tpu as pltpu


# ----------------------------- BlockSpec helpers -----------------------------

def _rep_spec(arr):
    """Whole-array block, same block for every grid step (weights)."""
    nd = arr.ndim
    return pl.BlockSpec(tuple(arr.shape), lambda *args: (0,) * nd)


def _batch_spec(arr):
    """Per-grid-step block along the leading (batch) axis."""
    nd = arr.ndim
    return pl.BlockSpec((1,) + tuple(arr.shape[1:]),
                        lambda b: (b,) + (0,) * (nd - 1))


# ------------------------------- fused kernel --------------------------------

def _ns_transformer_kernel(*refs, n_enc, n_dec, n_proj_hidden, H, scale, activation):
    it = iter(refs)
    x_ref = next(it)           # (1, L, C)
    pos_ref = next(it)         # (L, D)
    embw_ref = next(it)        # (2, 3, C, D)   [enc, dec] x kernel-tap
    pconv_ref = next(it)       # (3, 2, L)      tap x [tau, delta]
    pw1a_ref = next(it)        # (2, C, hd0)
    pw1b_ref = next(it)        # (2, C, hd0)
    pb1_ref = next(it)         # (2, 1, hd0)
    p_hidden = [(next(it), next(it)) for _ in range(n_proj_hidden)]
    tau_out_ref = next(it)     # (1, hd_last)
    delta_out_ref = next(it)   # (hd_last, L)
    e_wqkv = next(it); e_bqkv = next(it); e_wo = next(it); e_bo = next(it)
    e_w1 = next(it); e_b1 = next(it); e_w2 = next(it); e_b2 = next(it)
    e_ln = next(it); e_fn = next(it)
    d_swqkv = next(it); d_sbqkv = next(it); d_swo = next(it); d_sbo = next(it)
    d_cwqkv = next(it); d_cbqkv = next(it); d_cwo = next(it); d_cbo = next(it)
    d_w1 = next(it); d_b1 = next(it); d_w2 = next(it); d_b2 = next(it)
    d_ln = next(it); d_fn = next(it)
    projw_ref = next(it); projb_ref = next(it)
    out_ref = next(it)

    f32 = jnp.float32
    L, C = x_ref.shape[1], x_ref.shape[2]

    def act(z):
        return jnp.maximum(z, 0.0) if activation == "relu" else jax.nn.gelu(z)

    def ln(z, g, b):
        mu = jnp.mean(z, axis=-1, keepdims=True)
        zc = z - mu
        var = jnp.mean(zc * zc, axis=-1, keepdims=True)
        return zc * lax.rsqrt(var + 1e-5) * g + b

    # ------------- instance statistics + non-stationary normalization --------
    x_raw = x_ref[0]                                             # (L, C)
    mean = jnp.mean(x_raw, axis=0, keepdims=True)                # (1, C)
    xc = x_raw - mean
    var = jnp.mean(xc * xc, axis=0, keepdims=True)               # unbiased=False
    std = jnp.sqrt(var + 1e-5)                                   # (1, C)
    x_norm = xc / std                                            # (L, C)

    # ------------- tau / delta Projectors (series_conv via circulant matmuls) -
    cc = lax.broadcasted_iota(jnp.int32, (C, C), 0)              # c'
    c2 = lax.broadcasted_iota(jnp.int32, (C, C), 1)              # c
    r_m = (cc == (c2 + (C - 1)) % C).astype(f32)                 # x[:, (c-1)%C]
    r_p = (cc == (c2 + 1) % C).astype(f32)                       # x[:, (c+1)%C]
    x_cm = jnp.dot(x_raw, r_m, preferred_element_type=f32)
    x_cp = jnp.dot(x_raw, r_p, preferred_element_type=f32)
    # conv row 0 = tau's series_conv output, row 1 = delta's.   (2, C)
    conv = (jnp.dot(pconv_ref[0], x_cm, preferred_element_type=f32)
            + jnp.dot(pconv_ref[1], x_raw, preferred_element_type=f32)
            + jnp.dot(pconv_ref[2], x_cp, preferred_element_type=f32))

    def backbone(i, conv_row, stats_row):
        # cat([conv, stats], -1) @ W1 == conv @ W1a + stats @ W1b (no concat)
        h = (jnp.dot(conv_row, pw1a_ref[i], preferred_element_type=f32)
             + jnp.dot(stats_row, pw1b_ref[i], preferred_element_type=f32)
             + pb1_ref[i])
        h = jnp.maximum(h, 0.0)
        for wh_ref, bh_ref in p_hidden:
            h = jnp.maximum(jnp.dot(h, wh_ref[i], preferred_element_type=f32)
                            + bh_ref[i], 0.0)
        return h

    h_tau = backbone(0, conv[0:1, :], std)
    h_del = backbone(1, conv[1:2, :], mean)
    tau = jnp.exp(jnp.sum(h_tau * tau_out_ref[...], axis=-1, keepdims=True))  # (1,1)
    delta = jnp.dot(h_del, delta_out_ref[...], preferred_element_type=f32)    # (1,L)
    st = tau * scale          # scale * tau, folded into the score pass
    sd = delta * scale        # scale * delta

    # ------------- DataEmbedding (circular token conv + positional) ----------
    tt = lax.broadcasted_iota(jnp.int32, (L, L), 0)
    t2 = lax.broadcasted_iota(jnp.int32, (L, L), 1)
    s_m = (t2 == (tt + (L - 1)) % L).astype(f32)                 # x[(t-1)%L]
    s_p = (t2 == (tt + 1) % L).astype(f32)                       # x[(t+1)%L]
    x_m1 = jnp.dot(s_m, x_norm, preferred_element_type=f32)
    x_p1 = jnp.dot(s_p, x_norm, preferred_element_type=f32)
    pos = pos_ref[...]

    def token_embed(which):
        return (jnp.dot(x_m1, embw_ref[which, 0], preferred_element_type=f32)
                + jnp.dot(x_norm, embw_ref[which, 1], preferred_element_type=f32)
                + jnp.dot(x_p1, embw_ref[which, 2], preferred_element_type=f32)
                + pos)

    enc_h = token_embed(0)                                       # (L, D)
    dec_h = token_embed(1)                                       # (L, D)

    # ------------- de-stationary multi-head attention (head-batched) ---------
    def mha(xq, xkv, wq, bq, wk, bk, wv, bv, wo, bo, sd_term, causal):
        Lq, S = xq.shape[0], xkv.shape[0]
        E = wq.shape[1] // H
        q = jnp.dot(xq, wq, preferred_element_type=f32) + bq     # (Lq, D)
        k = jnp.dot(xkv, wk, preferred_element_type=f32) + bk    # (S, D)
        v = jnp.dot(xkv, wv, preferred_element_type=f32) + bv    # (S, D)
        qh = jnp.stack([q[:, h * E:(h + 1) * E] for h in range(H)], axis=0)
        kh = jnp.stack([k[:, h * E:(h + 1) * E] for h in range(H)], axis=0)
        vh = jnp.stack([v[:, h * E:(h + 1) * E] for h in range(H)], axis=0)
        # scores (H, Lq, S) = per-head Q @ K^T, all heads in one batched dot
        s = lax.dot_general(qh, kh, (((2,), (2,)), ((0,), (0,))),
                            preferred_element_type=f32)
        s = s * st
        if sd_term is not None:
            s = s + sd_term
        if causal:
            row = lax.broadcasted_iota(jnp.int32, (Lq, S), 0)
            col = lax.broadcasted_iota(jnp.int32, (Lq, S), 1)
            s = jnp.where(col > row, -1e30, s)
        m = jnp.max(s, axis=-1, keepdims=True)
        p = jnp.exp(s - m)
        a = p * pl.reciprocal(jnp.sum(p, axis=-1, keepdims=True), approx=True)
        o = lax.dot_general(a, vh, (((2,), (1,)), ((0,), (0,))),
                            preferred_element_type=f32)          # (H, Lq, E)
        c = lax.dot_general(o, wo, (((2,), (1,)), ((0,), (0,))),
                            preferred_element_type=f32)          # (H, Lq, D)
        return jnp.sum(c, axis=0) + bo

    # ------------------------------- encoder ---------------------------------
    for l in range(n_enc):
        attn = mha(enc_h, enc_h,
                   e_wqkv[l, 0], e_bqkv[l, 0], e_wqkv[l, 1], e_bqkv[l, 1],
                   e_wqkv[l, 2], e_bqkv[l, 2], e_wo[l], e_bo[l], sd, False)
        h1 = ln(enc_h + attn, e_ln[l, 0], e_ln[l, 1])
        y = act(jnp.dot(h1, e_w1[l], preferred_element_type=f32) + e_b1[l])
        y = jnp.dot(y, e_w2[l], preferred_element_type=f32) + e_b2[l]
        enc_h = ln(h1 + y, e_ln[l, 2], e_ln[l, 3])
    enc_out = ln(enc_h, e_fn[0], e_fn[1])                        # encoder final norm

    # ------------------------------- decoder ---------------------------------
    for l in range(n_dec):
        sa = mha(dec_h, dec_h,
                 d_swqkv[l, 0], d_sbqkv[l, 0], d_swqkv[l, 1], d_sbqkv[l, 1],
                 d_swqkv[l, 2], d_sbqkv[l, 2], d_swo[l], d_sbo[l],
                 None, True)                                     # masked, delta=None
        x1 = ln(dec_h + sa, d_ln[l, 0], d_ln[l, 1])
        ca = mha(x1, enc_out,
                 d_cwqkv[l, 0], d_cbqkv[l, 0], d_cwqkv[l, 1], d_cbqkv[l, 1],
                 d_cwqkv[l, 2], d_cbqkv[l, 2], d_cwo[l], d_cbo[l],
                 sd, False)
        x2 = ln(x1 + ca, d_ln[l, 2], d_ln[l, 3])
        y = act(jnp.dot(x2, d_w1[l], preferred_element_type=f32) + d_b1[l])
        y = jnp.dot(y, d_w2[l], preferred_element_type=f32) + d_b2[l]
        dec_h = ln(x2 + y, d_ln[l, 4], d_ln[l, 5])
    dec_h = ln(dec_h, d_fn[0], d_fn[1])                          # decoder final norm
    y = jnp.dot(dec_h, projw_ref[...], preferred_element_type=f32) + projb_ref[...]
    out_ref[0] = y * std + mean                                  # de-normalize


# ----------------------------------- model -----------------------------------

def model_forward(params, x_enc, cfg):
    B, L, C = x_enc.shape
    D, H, c_out = cfg["d_model"], cfg["n_heads"], cfg["c_out"]
    scale = 1.0 / math.sqrt(D // H)

    inputs = [x_enc, params["pos_emb"], params["emb_w"],
              params["p_conv"], params["p_w1a"], params["p_w1b"], params["p_b1"]]
    for w, b in params["p_hidden"]:
        inputs += [w, b]
    inputs += [params["tau_out"], params["delta_out"]]
    e = params["enc"]
    inputs += [e["wqkv"], e["bqkv"], e["wo"], e["bo"],
               e["w1"], e["b1"], e["w2"], e["b2"], e["ln"], e["final_ln"]]
    d = params["dec"]
    inputs += [d["self_wqkv"], d["self_bqkv"], d["self_wo"], d["self_bo"],
               d["cross_wqkv"], d["cross_bqkv"], d["cross_wo"], d["cross_bo"],
               d["w1"], d["b1"], d["w2"], d["b2"], d["ln"], d["final_ln"],
               d["proj_w"], d["proj_b"]]

    in_specs = [_batch_spec(x_enc)] + [_rep_spec(a) for a in inputs[1:]]

    kernel = functools.partial(
        _ns_transformer_kernel,
        n_enc=cfg["e_layers"], n_dec=cfg["d_layers"],
        n_proj_hidden=len(params["p_hidden"]),
        H=H, scale=scale, activation=cfg["activation"])

    return pl.pallas_call(
        kernel,
        out_shape=jax.ShapeDtypeStruct((B, L, c_out), jnp.float32),
        grid=(B,),
        in_specs=in_specs,
        out_specs=pl.BlockSpec((1, L, c_out), lambda b: (b, 0, 0)),
        compiler_params=pltpu.CompilerParams(dimension_semantics=("parallel",)),
    )(*inputs)


# ------------------------------ initialization --------------------------------

def positional_embedding(d_model, max_len):
    position = jnp.arange(max_len, dtype=jnp.float32)[:, None]
    div_term = jnp.exp(jnp.arange(0, d_model, 2, dtype=jnp.float32)
                       * -(math.log(10000.0) / d_model))
    pe = jnp.zeros((max_len, d_model), jnp.float32)
    pe = pe.at[:, 0::2].set(jnp.sin(position * div_term))
    pe = pe.at[:, 1::2].set(jnp.cos(position * div_term))
    return pe


def init_params(key, cfg):
    D, H, dff = cfg["d_model"], cfg["n_heads"], cfg["d_ff"]
    C, L, c_out = cfg["enc_in"], cfg["seq_len"], cfg["c_out"]
    E = D // H
    n_e, n_d = cfg["e_layers"], cfg["d_layers"]
    hd = list(cfg["p_hidden_dims"])
    keys = iter(jax.random.split(key, 1024))

    def unif(shape, fan_in):
        s = 1.0 / math.sqrt(fan_in)
        return jax.random.uniform(next(keys), shape, jnp.float32, -s, s)

    def attn_block():
        wqkv = jnp.stack([unif((D, D), D) for _ in range(3)])        # (3, D, D)
        bqkv = jnp.stack([unif((1, D), D) for _ in range(3)])        # (3, 1, D)
        wo = unif((D, D), D).reshape(H, E, D)                        # (H, E, D)
        bo = unif((1, D), D)
        return wqkv, bqkv, wo, bo

    ones, zeros = jnp.ones((1, D), jnp.float32), jnp.zeros((1, D), jnp.float32)

    def ln_params(n):
        return jnp.stack([ones, zeros] * n)                          # (2n, 1, D)

    def stack(xs):
        return jnp.stack(xs, axis=0)

    enc_attn = [attn_block() for _ in range(n_e)]
    enc = dict(
        wqkv=stack([a[0] for a in enc_attn]), bqkv=stack([a[1] for a in enc_attn]),
        wo=stack([a[2] for a in enc_attn]), bo=stack([a[3] for a in enc_attn]),
        w1=stack([unif((D, dff), D) for _ in range(n_e)]),
        b1=stack([unif((1, dff), D) for _ in range(n_e)]),
        w2=stack([unif((dff, D), dff) for _ in range(n_e)]),
        b2=stack([unif((1, D), dff) for _ in range(n_e)]),
        ln=stack([ln_params(2) for _ in range(n_e)]),
        final_ln=ln_params(1))

    dec_self = [attn_block() for _ in range(n_d)]
    dec_cross = [attn_block() for _ in range(n_d)]
    dec = dict(
        self_wqkv=stack([a[0] for a in dec_self]), self_bqkv=stack([a[1] for a in dec_self]),
        self_wo=stack([a[2] for a in dec_self]), self_bo=stack([a[3] for a in dec_self]),
        cross_wqkv=stack([a[0] for a in dec_cross]), cross_bqkv=stack([a[1] for a in dec_cross]),
        cross_wo=stack([a[2] for a in dec_cross]), cross_bo=stack([a[3] for a in dec_cross]),
        w1=stack([unif((D, dff), D) for _ in range(n_d)]),
        b1=stack([unif((1, dff), D) for _ in range(n_d)]),
        w2=stack([unif((dff, D), dff) for _ in range(n_d)]),
        b2=stack([unif((1, D), dff) for _ in range(n_d)]),
        ln=stack([ln_params(3) for _ in range(n_d)]),
        final_ln=ln_params(1),
        proj_w=unif((D, c_out), D), proj_b=unif((1, c_out), D))

    def projector(out_dim):
        conv_w = unif((L, 3), 3 * L)      # Conv1d(win_size -> 1, k=3, circular, no bias)
        w1 = unif((2 * C, hd[0]), 2 * C)
        b1 = unif((1, hd[0]), 2 * C)
        hidden = [(unif((hd[i], hd[i + 1]), hd[i]), unif((1, hd[i + 1]), hd[i]))
                  for i in range(cfg["p_hidden_layers"] - 1)]
        out_w = unif((hd[-1], out_dim), hd[-1])   # final layer has no bias
        return conv_w, w1, b1, hidden, out_w

    t_conv, t_w1, t_b1, t_hid, t_out = projector(1)        # tau_learner
    g_conv, g_w1, g_b1, g_hid, g_out = projector(L)        # delta_learner
    p_conv = jnp.stack([jnp.stack([t_conv[:, k], g_conv[:, k]]) for k in range(3)])
    p_hidden = [(jnp.stack([tw, gw]), jnp.stack([tb, gb]))
                for (tw, tb), (gw, gb) in zip(t_hid, g_hid)]

    return dict(
        pos_emb=positional_embedding(D, L),
        # TokenEmbedding Conv1d(C -> D, k=3, circular, no bias); tap-split (3, C, D)
        emb_w=jnp.stack([unif((3, C, D), 3 * C), unif((3, C, D), 3 * C)]),
        p_conv=p_conv,
        p_w1a=jnp.stack([t_w1[:C], g_w1[:C]]),
        p_w1b=jnp.stack([t_w1[C:], g_w1[C:]]),
        p_b1=jnp.stack([t_b1, g_b1]),
        p_hidden=p_hidden,
        tau_out=jnp.transpose(t_out),       # (1, hd[-1])
        delta_out=g_out,                     # (hd[-1], L)
        enc=enc, dec=dec)


# ----------------------------------- main -------------------------------------

if __name__ == "__main__":
    cfg = dict(
        seq_len=8,            # also win_size for the Projectors
        enc_in=4, dec_in=4, c_out=4,
        d_model=32, n_heads=4, d_ff=64,
        e_layers=2, d_layers=1,
        p_hidden_dims=(16, 16), p_hidden_layers=2,
        activation="relu", dropout=0.0, output_attention=False,
        factor=1, win_size=8,
    )
    key = jax.random.PRNGKey(0)
    k_params, k_x = jax.random.split(key)
    params = init_params(k_params, cfg)
    x_enc = jax.random.normal(k_x, (2, cfg["seq_len"], cfg["enc_in"]), jnp.float32)

    fwd = jax.jit(lambda p, x: model_forward(p, x, cfg))
    out = jax.block_until_ready(fwd(params, x_enc))
    assert out.shape == (2, cfg["seq_len"], cfg["c_out"])
    assert bool(jnp.all(jnp.isfinite(out)))
    print("KERNEL_OK")
</pallas_src>

<mosaic_0001>
module attributes {stable_mosaic.version = 11 : i64} {
  func.func @_ns_transformer_kernel(%arg0: i32, %arg1: memref<1x8x4xf32, #tpu.memory_space<vmem>>, %arg2: memref<8x32xf32, #tpu.memory_space<vmem>>, %arg3: memref<2x3x4x32xf32, #tpu.memory_space<vmem>>, %arg4: memref<3x2x8xf32, #tpu.memory_space<vmem>>, %arg5: memref<2x4x16xf32, #tpu.memory_space<vmem>>, %arg6: memref<2x4x16xf32, #tpu.memory_space<vmem>>, %arg7: memref<2x1x16xf32, #tpu.memory_space<vmem>>, %arg8: memref<2x16x16xf32, #tpu.memory_space<vmem>>, %arg9: memref<2x1x16xf32, #tpu.memory_space<vmem>>, %arg10: memref<1x16xf32, #tpu.memory_space<vmem>>, %arg11: memref<16x8xf32, #tpu.memory_space<vmem>>, %arg12: memref<2x3x32x32xf32, #tpu.memory_space<vmem>>, %arg13: memref<2x3x1x32xf32, #tpu.memory_space<vmem>>, %arg14: memref<2x4x8x32xf32, #tpu.memory_space<vmem>>, %arg15: memref<2x1x32xf32, #tpu.memory_space<vmem>>, %arg16: memref<2x32x64xf32, #tpu.memory_space<vmem>>, %arg17: memref<2x1x64xf32, #tpu.memory_space<vmem>>, %arg18: memref<2x64x32xf32, #tpu.memory_space<vmem>>, %arg19: memref<2x1x32xf32, #tpu.memory_space<vmem>>, %arg20: memref<2x4x1x32xf32, #tpu.memory_space<vmem>>, %arg21: memref<2x1x32xf32, #tpu.memory_space<vmem>>, %arg22: memref<1x3x32x32xf32, #tpu.memory_space<vmem>>, %arg23: memref<1x3x1x32xf32, #tpu.memory_space<vmem>>, %arg24: memref<1x4x8x32xf32, #tpu.memory_space<vmem>>, %arg25: memref<1x1x32xf32, #tpu.memory_space<vmem>>, %arg26: memref<1x3x32x32xf32, #tpu.memory_space<vmem>>, %arg27: memref<1x3x1x32xf32, #tpu.memory_space<vmem>>, %arg28: memref<1x4x8x32xf32, #tpu.memory_space<vmem>>, %arg29: memref<1x1x32xf32, #tpu.memory_space<vmem>>, %arg30: memref<1x32x64xf32, #tpu.memory_space<vmem>>, %arg31: memref<1x1x64xf32, #tpu.memory_space<vmem>>, %arg32: memref<1x64x32xf32, #tpu.memory_space<vmem>>, %arg33: memref<1x1x32xf32, #tpu.memory_space<vmem>>, %arg34: memref<1x6x1x32xf32, #tpu.memory_space<vmem>>, %arg35: memref<2x1x32xf32, #tpu.memory_space<vmem>>, %arg36: memref<32x4xf32, #tpu.memory_space<vmem>>, %arg37: memref<1x4xf32, #tpu.memory_space<vmem>>, %arg38: memref<1x8x4xf32, #tpu.memory_space<vmem>>) attributes {dimension_semantics = [#tpu.dimension_semantics<parallel>], iteration_bounds = array<i64: 2>, scalar_prefetch = 0 : i64, scratch_operands = 0 : i64, tpu.core_type = #tpu.core_type<tc>, window_params = [{transform_indices = @transform_0, window_bounds = array<i64: 1, 8, 4>}, {pipeline_mode = #tpu.pipeline_mode<synchronous>, transform_indices = @transform_1, window_bounds = array<i64: 8, 32>}, {pipeline_mode = #tpu.pipeline_mode<synchronous>, transform_indices = @transform_2, window_bounds = array<i64: 2, 3, 4, 32>}, {pipeline_mode = #tpu.pipeline_mode<synchronous>, transform_indices = @transform_3, window_bounds = array<i64: 3, 2, 8>}, {pipeline_mode = #tpu.pipeline_mode<synchronous>, transform_indices = @transform_4, window_bounds = array<i64: 2, 4, 16>}, {pipeline_mode = #tpu.pipeline_mode<synchronous>, transform_indices = @transform_5, window_bounds = array<i64: 2, 4, 16>}, {pipeline_mode = #tpu.pipeline_mode<synchronous>, transform_indices = @transform_6, window_bounds = array<i64: 2, 1, 16>}, {pipeline_mode = #tpu.pipeline_mode<synchronous>, transform_indices = @transform_7, window_bounds = array<i64: 2, 16, 16>}, {pipeline_mode = #tpu.pipeline_mode<synchronous>, transform_indices = @transform_8, window_bounds = array<i64: 2, 1, 16>}, {pipeline_mode = #tpu.pipeline_mode<synchronous>, transform_indices = @transform_9, window_bounds = array<i64: 1, 16>}, {pipeline_mode = #tpu.pipeline_mode<synchronous>, transform_indices = @transform_10, window_bounds = array<i64: 16, 8>}, {pipeline_mode = #tpu.pipeline_mode<synchronous>, transform_indices = @transform_11, window_bounds = array<i64: 2, 3, 32, 32>}, {pipeline_mode = #tpu.pipeline_mode<synchronous>, transform_indices = @transform_12, window_bounds = array<i64: 2, 3, 1, 32>}, {pipeline_mode = #tpu.pipeline_mode<synchronous>, transform_indices = @transform_13, window_bounds = array<i64: 2, 4, 8, 32>}, {pipeline_mode = #tpu.pipeline_mode<synchronous>, transform_indices = @transform_14, window_bounds = array<i64: 2, 1, 32>}, {pipeline_mode = #tpu.pipeline_mode<synchronous>, transform_indices = @transform_15, window_bounds = array<i64: 2, 32, 64>}, {pipeline_mode = #tpu.pipeline_mode<synchronous>, transform_indices = @transform_16, window_bounds = array<i64: 2, 1, 64>}, {pipeline_mode = #tpu.pipeline_mode<synchronous>, transform_indices = @transform_17, window_bounds = array<i64: 2, 64, 32>}, {pipeline_mode = #tpu.pipeline_mode<synchronous>, transform_indices = @transform_18, window_bounds = array<i64: 2, 1, 32>}, {pipeline_mode = #tpu.pipeline_mode<synchronous>, transform_indices = @transform_19, window_bounds = array<i64: 2, 4, 1, 32>}, {pipeline_mode = #tpu.pipeline_mode<synchronous>, transform_indices = @transform_20, window_bounds = array<i64: 2, 1, 32>}, {pipeline_mode = #tpu.pipeline_mode<synchronous>, transform_indices = @transform_21, window_bounds = array<i64: 1, 3, 32, 32>}, {pipeline_mode = #tpu.pipeline_mode<synchronous>, transform_indices = @transform_22, window_bounds = array<i64: 1, 3, 1, 32>}, {pipeline_mode = #tpu.pipeline_mode<synchronous>, transform_indices = @transform_23, window_bounds = array<i64: 1, 4, 8, 32>}, {pipeline_mode = #tpu.pipeline_mode<synchronous>, transform_indices = @transform_24, window_bounds = array<i64: 1, 1, 32>}, {pipeline_mode = #tpu.pipeline_mode<synchronous>, transform_indices = @transform_25, window_bounds = array<i64: 1, 3, 32, 32>}, {pipeline_mode = #tpu.pipeline_mode<synchronous>, transform_indices = @transform_26, window_bounds = array<i64: 1, 3, 1, 32>}, {pipeline_mode = #tpu.pipeline_mode<synchronous>, transform_indices = @transform_27, window_bounds = array<i64: 1, 4, 8, 32>}, {pipeline_mode = #tpu.pipeline_mode<synchronous>, transform_indices = @transform_28, window_bounds = array<i64: 1, 1, 32>}, {pipeline_mode = #tpu.pipeline_mode<synchronous>, transform_indices = @transform_29, window_bounds = array<i64: 1, 32, 64>}, {pipeline_mode = #tpu.pipeline_mode<synchronous>, transform_indices = @transform_30, window_bounds = array<i64: 1, 1, 64>}, {pipeline_mode = #tpu.pipeline_mode<synchronous>, transform_indices = @transform_31, window_bounds = array<i64: 1, 64, 32>}, {pipeline_mode = #tpu.pipeline_mode<synchronous>, transform_indices = @transform_32, window_bounds = array<i64: 1, 1, 32>}, {pipeline_mode = #tpu.pipeline_mode<synchronous>, transform_indices = @transform_33, window_bounds = array<i64: 1, 6, 1, 32>}, {pipeline_mode = #tpu.pipeline_mode<synchronous>, transform_indices = @transform_34, window_bounds = array<i64: 2, 1, 32>}, {pipeline_mode = #tpu.pipeline_mode<synchronous>, transform_indices = @transform_35, window_bounds = array<i64: 32, 4>}, {pipeline_mode = #tpu.pipeline_mode<synchronous>, transform_indices = @transform_36, window_bounds = array<i64: 1, 4>}, {transform_indices = @transform_37, window_bounds = array<i64: 1, 8, 4>}]} {
    %c0 = arith.constant 0 : index
    %c0_0 = arith.constant 0 : index
    %c0_1 = arith.constant 0 : index
    %0 = vector.load %arg1[%c0, %c0_0, %c0_1] : memref<1x8x4xf32, #tpu.memory_space<vmem>>, vector<1x8x4xf32>
    %1 = vector.shape_cast %0 : vector<1x8x4xf32> to vector<8x4xf32>
    %cst = arith.constant dense<0.000000e+00> : vector<4xf32>
    %2 = vector.multi_reduction <add>, %1, %cst [0] : vector<8x4xf32> to vector<4xf32>
    %3 = vector.shape_cast %2 : vector<4xf32> to vector<1x4xf32>
    %cst_2 = arith.constant 8.000000e+00 : f32
    %4 = vector.broadcast %cst_2 : f32 to vector<1x4xf32>
    %5 = arith.divf %3, %4 : vector<1x4xf32>
    %6 = vector.broadcast %5 : vector<1x4xf32> to vector<8x4xf32>
    %7 = arith.subf %1, %6 : vector<8x4xf32>
    %8 = arith.mulf %7, %7 : vector<8x4xf32>
    %cst_3 = arith.constant dense<0.000000e+00> : vector<4xf32>
    %9 = vector.multi_reduction <add>, %8, %cst_3 [0] : vector<8x4xf32> to vector<4xf32>
    %10 = vector.shape_cast %9 : vector<4xf32> to vector<1x4xf32>
    %cst_4 = arith.constant 8.000000e+00 : f32
    %11 = vector.broadcast %cst_4 : f32 to vector<1x4xf32>
    %12 = arith.divf %10, %11 : vector<1x4xf32>
    %cst_5 = arith.constant 9.99999974E-6 : f32
    %13 = vector.broadcast %cst_5 : f32 to vector<1x4xf32>
    %14 = arith.addf %12, %13 : vector<1x4xf32>
    %15 = math.sqrt %14 : vector<1x4xf32>
    %16 = vector.broadcast %15 : vector<1x4xf32> to vector<8x4xf32>
    %17 = arith.divf %7, %16 : vector<8x4xf32>
    %18 = tpu.iota {dimensions = array<i32: 0>} : vector<4x4xi32>
    %19 = tpu.iota {dimensions = array<i32: 1>} : vector<4x4xi32>
    %c3_i32 = arith.constant 3 : i32
    %20 = vector.broadcast %c3_i32 : i32 to vector<4x4xi32>
    %21 = arith.addi %19, %20 : vector<4x4xi32>
    %c4_i32 = arith.constant 4 : i32
    %c0_i32 = arith.constant 0 : i32
    %22 = arith.cmpi eq, %c4_i32, %c0_i32 : i32
    %c1_i32 = arith.constant 1 : i32
    %23 = arith.select %22, %c1_i32, %c4_i32 : i32
    %24 = vector.broadcast %23 : i32 to vector<4x4xi32>
    %25 = arith.remsi %21, %24 : vector<4x4xi32>
    %c0_i32_6 = arith.constant 0 : i32
    %26 = vector.broadcast %c0_i32_6 : i32 to vector<4x4xi32>
    %27 = arith.cmpi ne, %25, %26 : vector<4x4xi32>
    %c0_i32_7 = arith.constant 0 : i32
    %28 = vector.broadcast %c0_i32_7 : i32 to vector<4x4xi32>
    %29 = arith.cmpi slt, %25, %28 : vector<4x4xi32>
    %c0_i32_8 = arith.constant 0 : i32
    %30 = arith.cmpi slt, %23, %c0_i32_8 : i32
    %31 = vector.broadcast %30 : i1 to vector<4x4xi1>
    %32 = vector.broadcast %31 : vector<4x4xi1> to vector<4x4xi1>
    %33 = arith.xori %29, %32 : vector<4x4xi1>
    %34 = arith.andi %33, %27 : vector<4x4xi1>
    %35 = vector.broadcast %23 : i32 to vector<4x4xi32>
    %36 = arith.addi %25, %35 : vector<4x4xi32>
    %37 = arith.select %34, %36, %25 : vector<4x4xi1>, vector<4x4xi32>
    %38 = arith.cmpi eq, %18, %37 : vector<4x4xi32>
    %39 = arith.extui %38 : vector<4x4xi1> to vector<4x4xi32>
    %40 = arith.sitofp %39 : vector<4x4xi32> to vector<4x4xf32>
    %c1_i32_9 = arith.constant 1 : i32
    %41 = vector.broadcast %c1_i32_9 : i32 to vector<4x4xi32>
    %42 = arith.addi %19, %41 : vector<4x4xi32>
    %c4_i32_10 = arith.constant 4 : i32
    %c0_i32_11 = arith.constant 0 : i32
    %43 = arith.cmpi eq, %c4_i32_10, %c0_i32_11 : i32
    %c1_i32_12 = arith.constant 1 : i32
    %44 = arith.select %43, %c1_i32_12, %c4_i32_10 : i32
    %45 = vector.broadcast %44 : i32 to vector<4x4xi32>
    %46 = arith.remsi %42, %45 : vector<4x4xi32>
    %c0_i32_13 = arith.constant 0 : i32
    %47 = vector.broadcast %c0_i32_13 : i32 to vector<4x4xi32>
    %48 = arith.cmpi ne, %46, %47 : vector<4x4xi32>
    %c0_i32_14 = arith.constant 0 : i32
    %49 = vector.broadcast %c0_i32_14 : i32 to vector<4x4xi32>
    %50 = arith.cmpi slt, %46, %49 : vector<4x4xi32>
    %c0_i32_15 = arith.constant 0 : i32
    %51 = arith.cmpi slt, %44, %c0_i32_15 : i32
    %52 = vector.broadcast %51 : i1 to vector<4x4xi1>
    %53 = vector.broadcast %52 : vector<4x4xi1> to vector<4x4xi1>
    %54 = arith.xori %50, %53 : vector<4x4xi1>
    %55 = arith.andi %54, %48 : vector<4x4xi1>
    %56 = vector.broadcast %44 : i32 to vector<4x4xi32>
    %57 = arith.addi %46, %56 : vector<4x4xi32>
    %58 = arith.select %55, %57, %46 : vector<4x4xi1>, vector<4x4xi32>
    %59 = arith.cmpi eq, %18, %58 : vector<4x4xi32>
    %60 = arith.extui %59 : vector<4x4xi1> to vector<4x4xi32>
    %61 = arith.sitofp %60 : vector<4x4xi32> to vector<4x4xf32>
    %cst_16 = arith.constant dense<0.000000e+00> : vector<8x4xf32>
    %62 = tpu.matmul %1, %40, %cst_16 {dimension_numbers = #tpu.dot_dimension_numbers<[1], [0], [0], [1], [0, 0, 1, 1], [], []>} : vector<8x4xf32>, vector<4x4xf32>, vector<8x4xf32> -> vector<8x4xf32>
    %cst_17 = arith.constant dense<0.000000e+00> : vector<8x4xf32>
    %63 = tpu.matmul %1, %61, %cst_17 {dimension_numbers = #tpu.dot_dimension_numbers<[1], [0], [0], [1], [0, 0, 1, 1], [], []>} : vector<8x4xf32>, vector<4x4xf32>, vector<8x4xf32> -> vector<8x4xf32>
    %c0_18 = arith.constant 0 : index
    %c0_19 = arith.constant 0 : index
    %c0_20 = arith.constant 0 : index
    %64 = vector.load %arg4[%c0_18, %c0_19, %c0_20] : memref<3x2x8xf32, #tpu.memory_space<vmem>>, vector<1x2x8xf32>
    %65 = vector.shape_cast %64 : vector<1x2x8xf32> to vector<2x8xf32>
    %cst_21 = arith.constant dense<0.000000e+00> : vector<2x4xf32>
    %66 = tpu.matmul %65, %62, %cst_21 {dimension_numbers = #tpu.dot_dimension_numbers<[1], [0], [0], [1], [0, 0, 1, 1], [], []>} : vector<2x8xf32>, vector<8x4xf32>, vector<2x4xf32> -> vector<2x4xf32>
    %c1 = arith.constant 1 : index
    %c0_22 = arith.constant 0 : index
    %c0_23 = arith.constant 0 : index
    %67 = vector.load %arg4[%c1, %c0_22, %c0_23] : memref<3x2x8xf32, #tpu.memory_space<vmem>>, vector<1x2x8xf32>
    %68 = vector.shape_cast %67 : vector<1x2x8xf32> to vector<2x8xf32>
    %cst_24 = arith.constant dense<0.000000e+00> : vector<2x4xf32>
    %69 = tpu.matmul %68, %1, %cst_24 {dimension_numbers = #tpu.dot_dimension_numbers<[1], [0], [0], [1], [0, 0, 1, 1], [], []>} : vector<2x8xf32>, vector<8x4xf32>, vector<2x4xf32> -> vector<2x4xf32>
    %70 = arith.addf %66, %69 : vector<2x4xf32>
    %c2 = arith.constant 2 : index
    %c0_25 = arith.constant 0 : index
    %c0_26 = arith.constant 0 : index
    %71 = vector.load %arg4[%c2, %c0_25, %c0_26] : memref<3x2x8xf32, #tpu.memory_space<vmem>>, vector<1x2x8xf32>
    %72 = vector.shape_cast %71 : vector<1x2x8xf32> to vector<2x8xf32>
    %cst_27 = arith.constant dense<0.000000e+00> : vector<2x4xf32>
    %73 = tpu.matmul %72, %63, %cst_27 {dimension_numbers = #tpu.dot_dimension_numbers<[1], [0], [0], [1], [0, 0, 1, 1], [], []>} : vector<2x8xf32>, vector<8x4xf32>, vector<2x4xf32> -> vector<2x4xf32>
    %74 = arith.addf %70, %73 : vector<2x4xf32>
    %75 = vector.extract_strided_slice %74 {offsets = [0, 0], sizes = [1, 4], strides = [1, 1]} : vector<2x4xf32> to vector<1x4xf32>
    %c0_28 = arith.constant 0 : index
    %c0_29 = arith.constant 0 : index
    %c0_30 = arith.constant 0 : index
    %76 = vector.load %arg5[%c0_28, %c0_29, %c0_30] : memref<2x4x16xf32, #tpu.memory_space<vmem>>, vector<1x4x16xf32>
    %77 = vector.shape_cast %76 : vector<1x4x16xf32> to vector<4x16xf32>
    %cst_31 = arith.constant dense<0.000000e+00> : vector<1x16xf32>
    %78 = tpu.matmul %75, %77, %cst_31 {dimension_numbers = #tpu.dot_dimension_numbers<[1], [0], [0], [1], [0, 0, 1, 1], [], []>} : vector<1x4xf32>, vector<4x16xf32>, vector<1x16xf32> -> vector<1x16xf32>
    %c0_32 = arith.constant 0 : index
    %c0_33 = arith.constant 0 : index
    %c0_34 = arith.constant 0 : index
    %79 = vector.load %arg6[%c0_32, %c0_33, %c0_34] : memref<2x4x16xf32, #tpu.memory_space<vmem>>, vector<1x4x16xf32>
    %80 = vector.shape_cast %79 : vector<1x4x16xf32> to vector<4x16xf32>
    %cst_35 = arith.constant dense<0.000000e+00> : vector<1x16xf32>
    %81 = tpu.matmul %15, %80, %cst_35 {dimension_numbers = #tpu.dot_dimension_numbers<[1], [0], [0], [1], [0, 0, 1, 1], [], []>} : vector<1x4xf32>, vector<4x16xf32>, vector<1x16xf32> -> vector<1x16xf32>
    %82 = arith.addf %78, %81 : vector<1x16xf32>
    %c0_36 = arith.constant 0 : index
    %c0_37 = arith.constant 0 : index
    %c0_38 = arith.constant 0 : index
    %83 = vector.load %arg7[%c0_36, %c0_37, %c0_38] : memref<2x1x16xf32, #tpu.memory_space<vmem>>, vector<1x1x16xf32>
    %84 = vector.shape_cast %83 : vector<1x1x16xf32> to vector<1x16xf32>
    %85 = arith.addf %82, %84 : vector<1x16xf32>
    %cst_39 = arith.constant 0.000000e+00 : f32
    %86 = vector.broadcast %cst_39 : f32 to vector<1x16xf32>
    %87 = arith.maximumf %85, %86 : vector<1x16xf32>
    %c0_40 = arith.constant 0 : index
    %c0_41 = arith.constant 0 : index
    %c0_42 = arith.constant 0 : index
    %88 = vector.load %arg8[%c0_40, %c0_41, %c0_42] : memref<2x16x16xf32, #tpu.memory_space<vmem>>, vector<1x16x16xf32>
    %89 = vector.shape_cast %88 : vector<1x16x16xf32> to vector<16x16xf32>
    %cst_43 = arith.constant dense<0.000000e+00> : vector<1x16xf32>
    %90 = tpu.matmul %87, %89, %cst_43 {dimension_numbers = #tpu.dot_dimension_numbers<[1], [0], [0], [1], [0, 0, 1, 1], [], []>} : vector<1x16xf32>, vector<16x16xf32>, vector<1x16xf32> -> vector<1x16xf32>
    %c0_44 = arith.constant 0 : index
    %c0_45 = arith.constant 0 : index
    %c0_46 = arith.constant 0 : index
    %91 = vector.load %arg9[%c0_44, %c0_45, %c0_46] : memref<2x1x16xf32, #tpu.memory_space<vmem>>, vector<1x1x16xf32>
    %92 = vector.shape_cast %91 : vector<1x1x16xf32> to vector<1x16xf32>
    %93 = arith.addf %90, %92 : vector<1x16xf32>
    %cst_47 = arith.constant 0.000000e+00 : f32
    %94 = vector.broadcast %cst_47 : f32 to vector<1x16xf32>
    %95 = arith.maximumf %93, %94 : vector<1x16xf32>
    %96 = vector.extract_strided_slice %74 {offsets = [1, 0], sizes = [1, 4], strides = [1, 1]} : vector<2x4xf32> to vector<1x4xf32>
    %c1_48 = arith.constant 1 : index
    %c0_49 = arith.constant 0 : index
    %c0_50 = arith.constant 0 : index
    %97 = vector.load %arg5[%c1_48, %c0_49, %c0_50] : memref<2x4x16xf32, #tpu.memory_space<vmem>>, vector<1x4x16xf32>
    %98 = vector.shape_cast %97 : vector<1x4x16xf32> to vector<4x16xf32>
    %cst_51 = arith.constant dense<0.000000e+00> : vector<1x16xf32>
    %99 = tpu.matmul %96, %98, %cst_51 {dimension_numbers = #tpu.dot_dimension_numbers<[1], [0], [0], [1], [0, 0, 1, 1], [], []>} : vector<1x4xf32>, vector<4x16xf32>, vector<1x16xf32> -> vector<1x16xf32>
    %c1_52 = arith.constant 1 : index
    %c0_53 = arith.constant 0 : index
    %c0_54 = arith.constant 0 : index
    %100 = vector.load %arg6[%c1_52, %c0_53, %c0_54] : memref<2x4x16xf32, #tpu.memory_space<vmem>>, vector<1x4x16xf32>
    %101 = vector.shape_cast %100 : vector<1x4x16xf32> to vector<4x16xf32>
    %cst_55 = arith.constant dense<0.000000e+00> : vector<1x16xf32>
    %102 = tpu.matmul %5, %101, %cst_55 {dimension_numbers = #tpu.dot_dimension_numbers<[1], [0], [0], [1], [0, 0, 1, 1], [], []>} : vector<1x4xf32>, vector<4x16xf32>, vector<1x16xf32> -> vector<1x16xf32>
    %103 = arith.addf %99, %102 : vector<1x16xf32>
    %c1_56 = arith.constant 1 : index
    %c0_57 = arith.constant 0 : index
    %c0_58 = arith.constant 0 : index
    %104 = vector.load %arg7[%c1_56, %c0_57, %c0_58] : memref<2x1x16xf32, #tpu.memory_space<vmem>>, vector<1x1x16xf32>
    %105 = vector.shape_cast %104 : vector<1x1x16xf32> to vector<1x16xf32>
    %106 = arith.addf %103, %105 : vector<1x16xf32>
    %cst_59 = arith.constant 0.000000e+00 : f32
    %107 = vector.broadcast %cst_59 : f32 to vector<1x16xf32>
    %108 = arith.maximumf %106, %107 : vector<1x16xf32>
    %c1_60 = arith.constant 1 : index
    %c0_61 = arith.constant 0 : index
    %c0_62 = arith.constant 0 : index
    %109 = vector.load %arg8[%c1_60, %c0_61, %c0_62] : memref<2x16x16xf32, #tpu.memory_space<vmem>>, vector<1x16x16xf32>
    %110 = vector.shape_cast %109 : vector<1x16x16xf32> to vector<16x16xf32>
    %cst_63 = arith.constant dense<0.000000e+00> : vector<1x16xf32>
    %111 = tpu.matmul %108, %110, %cst_63 {dimension_numbers = #tpu.dot_dimension_numbers<[1], [0], [0], [1], [0, 0, 1, 1], [], []>} : vector<1x16xf32>, vector<16x16xf32>, vector<1x16xf32> -> vector<1x16xf32>
    %c1_64 = arith.constant 1 : index
    %c0_65 = arith.constant 0 : index
    %c0_66 = arith.constant 0 : index
    %112 = vector.load %arg9[%c1_64, %c0_65, %c0_66] : memref<2x1x16xf32, #tpu.memory_space<vmem>>, vector<1x1x16xf32>
    %113 = vector.shape_cast %112 : vector<1x1x16xf32> to vector<1x16xf32>
    %114 = arith.addf %111, %113 : vector<1x16xf32>
    %cst_67 = arith.constant 0.000000e+00 : f32
    %115 = vector.broadcast %cst_67 : f32 to vector<1x16xf32>
    %116 = arith.maximumf %114, %115 : vector<1x16xf32>
    %c0_68 = arith.constant 0 : index
    %c0_69 = arith.constant 0 : index
    %117 = vector.load %arg10[%c0_68, %c0_69] : memref<1x16xf32, #tpu.memory_space<vmem>>, vector<1x16xf32>
    %118 = arith.mulf %95, %117 : vector<1x16xf32>
    %cst_70 = arith.constant dense<0.000000e+00> : vector<1xf32>
    %119 = vector.multi_reduction <add>, %118, %cst_70 [1] : vector<1x16xf32> to vector<1xf32>
    %120 = vector.shape_cast %119 : vector<1xf32> to vector<1x1xf32>
    %121 = math.exp %120 : vector<1x1xf32>
    %c0_71 = arith.constant 0 : index
    %c0_72 = arith.constant 0 : index
    %122 = vector.load %arg11[%c0_71, %c0_72] : memref<16x8xf32, #tpu.memory_space<vmem>>, vector<16x8xf32>
    %cst_73 = arith.constant dense<0.000000e+00> : vector<1x8xf32>
    %123 = tpu.matmul %116, %122, %cst_73 {dimension_numbers = #tpu.dot_dimension_numbers<[1], [0], [0], [1], [0, 0, 1, 1], [], []>} : vector<1x16xf32>, vector<16x8xf32>, vector<1x8xf32> -> vector<1x8xf32>
    %cst_74 = arith.constant 0.353553385 : f32
    %124 = vector.broadcast %cst_74 : f32 to vector<1x1xf32>
    %125 = arith.mulf %121, %124 : vector<1x1xf32>
    %cst_75 = arith.constant 0.353553385 : f32
    %126 = vector.broadcast %cst_75 : f32 to vector<1x8xf32>
    %127 = arith.mulf %123, %126 : vector<1x8xf32>
    %128 = tpu.iota {dimensions = array<i32: 0>} : vector<8x8xi32>
    %129 = tpu.iota {dimensions = array<i32: 1>} : vector<8x8xi32>
    %c7_i32 = arith.constant 7 : i32
    %130 = vector.broadcast %c7_i32 : i32 to vector<8x8xi32>
    %131 = arith.addi %128, %130 : vector<8x8xi32>
    %c8_i32 = arith.constant 8 : i32
    %c0_i32_76 = arith.constant 0 : i32
    %132 = arith.cmpi eq, %c8_i32, %c0_i32_76 : i32
    %c1_i32_77 = arith.constant 1 : i32
    %133 = arith.select %132, %c1_i32_77, %c8_i32 : i32
    %134 = vector.broadcast %133 : i32 to vector<8x8xi32>
    %135 = arith.remsi %131, %134 : vector<8x8xi32>
    %c0_i32_78 = arith.constant 0 : i32
    %136 = vector.broadcast %c0_i32_78 : i32 to vector<8x8xi32>
    %137 = arith.cmpi ne, %135, %136 : vector<8x8xi32>
    %c0_i32_79 = arith.constant 0 : i32
    %138 = vector.broadcast %c0_i32_79 : i32 to vector<8x8xi32>
    %139 = arith.cmpi slt, %135, %138 : vector<8x8xi32>
    %c0_i32_80 = arith.constant 0 : i32
    %140 = arith.cmpi slt, %133, %c0_i32_80 : i32
    %141 = vector.broadcast %140 : i1 to vector<8x8xi1>
    %142 = vector.broadcast %141 : vector<8x8xi1> to vector<8x8xi1>
    %143 = arith.xori %139, %142 : vector<8x8xi1>
    %144 = arith.andi %143, %137 : vector<8x8xi1>
    %145 = vector.broadcast %133 : i32 to vector<8x8xi32>
    %146 = arith.addi %135, %145 : vector<8x8xi32>
    %147 = arith.select %144, %146, %135 : vector<8x8xi1>, vector<8x8xi32>
    %148 = arith.cmpi eq, %129, %147 : vector<8x8xi32>
    %149 = arith.extui %148 : vector<8x8xi1> to vector<8x8xi32>
    %150 = arith.sitofp %149 : vector<8x8xi32> to vector<8x8xf32>
    %c1_i32_81 = arith.constant 1 : i32
    %151 = vector.broadcast %c1_i32_81 : i32 to vector<8x8xi32>
    %152 = arith.addi %128, %151 : vector<8x8xi32>
    %c8_i32_82 = arith.constant 8 : i32
    %c0_i32_83 = arith.constant 0 : i32
    %153 = arith.cmpi eq, %c8_i32_82, %c0_i32_83 : i32
    %c1_i32_84 = arith.constant 1 : i32
    %154 = arith.select %153, %c1_i32_84, %c8_i32_82 : i32
    %155 = vector.broadcast %154 : i32 to vector<8x8xi32>
    %156 = arith.remsi %152, %155 : vector<8x8xi32>
    %c0_i32_85 = arith.constant 0 : i32
    %157 = vector.broadcast %c0_i32_85 : i32 to vector<8x8xi32>
    %158 = arith.cmpi ne, %156, %157 : vector<8x8xi32>
    %c0_i32_86 = arith.constant 0 : i32
    %159 = vector.broadcast %c0_i32_86 : i32 to vector<8x8xi32>
    %160 = arith.cmpi slt, %156, %159 : vector<8x8xi32>
    %c0_i32_87 = arith.constant 0 : i32
    %161 = arith.cmpi slt, %154, %c0_i32_87 : i32
    %162 = vector.broadcast %161 : i1 to vector<8x8xi1>
    %163 = vector.broadcast %162 : vector<8x8xi1> to vector<8x8xi1>
    %164 = arith.xori %160, %163 : vector<8x8xi1>
    %165 = arith.andi %164, %158 : vector<8x8xi1>
    %166 = vector.broadcast %154 : i32 to vector<8x8xi32>
    %167 = arith.addi %156, %166 : vector<8x8xi32>
    %168 = arith.select %165, %167, %156 : vector<8x8xi1>, vector<8x8xi32>
    %169 = arith.cmpi eq, %129, %168 : vector<8x8xi32>
    %170 = arith.extui %169 : vector<8x8xi1> to vector<8x8xi32>
    %171 = arith.sitofp %170 : vector<8x8xi32> to vector<8x8xf32>
    %cst_88 = arith.constant dense<0.000000e+00> : vector<8x4xf32>
    %172 = tpu.matmul %150, %17, %cst_88 {dimension_numbers = #tpu.dot_dimension_numbers<[1], [0], [0], [1], [0, 0, 1, 1], [], []>} : vector<8x8xf32>, vector<8x4xf32>, vector<8x4xf32> -> vector<8x4xf32>
    %cst_89 = arith.constant dense<0.000000e+00> : vector<8x4xf32>
    %173 = tpu.matmul %171, %17, %cst_89 {dimension_numbers = #tpu.dot_dimension_numbers<[1], [0], [0], [1], [0, 0, 1, 1], [], []>} : vector<8x8xf32>, vector<8x4xf32>, vector<8x4xf32> -> vector<8x4xf32>
    %c0_90 = arith.constant 0 : index
    %c0_91 = arith.constant 0 : index
    %174 = vector.load %arg2[%c0_90, %c0_91] : memref<8x32xf32, #tpu.memory_space<vmem>>, vector<8x32xf32>
    %c0_92 = arith.constant 0 : index
    %c0_93 = arith.constant 0 : index
    %c0_94 = arith.constant 0 : index
    %c0_95 = arith.constant 0 : index
    %175 = vector.load %arg3[%c0_92, %c0_93, %c0_94, %c0_95] : memref<2x3x4x32xf32, #tpu.memory_space<vmem>>, vector<1x1x4x32xf32>
    %176 = vector.shape_cast %175 : vector<1x1x4x32xf32> to vector<4x32xf32>
    %cst_96 = arith.constant dense<0.000000e+00> : vector<8x32xf32>
    %177 = tpu.matmul %172, %176, %cst_96 {dimension_numbers = #tpu.dot_dimension_numbers<[1], [0], [0], [1], [0, 0, 1, 1], [], []>} : vector<8x4xf32>, vector<4x32xf32>, vector<8x32xf32> -> vector<8x32xf32>
    %c0_97 = arith.constant 0 : index
    %c1_98 = arith.constant 1 : index
    %c0_99 = arith.constant 0 : index
    %c0_100 = arith.constant 0 : index
    %178 = vector.load %arg3[%c0_97, %c1_98, %c0_99, %c0_100] : memref<2x3x4x32xf32, #tpu.memory_space<vmem>>, vector<1x1x4x32xf32>
    %179 = vector.shape_cast %178 : vector<1x1x4x32xf32> to vector<4x32xf32>
    %cst_101 = arith.constant dense<0.000000e+00> : vector<8x32xf32>
    %180 = tpu.matmul %17, %179, %cst_101 {dimension_numbers = #tpu.dot_dimension_numbers<[1], [0], [0], [1], [0, 0, 1, 1], [], []>} : vector<8x4xf32>, vector<4x32xf32>, vector<8x32xf32> -> vector<8x32xf32>
    %181 = arith.addf %177, %180 : vector<8x32xf32>
    %c0_102 = arith.constant 0 : index
    %c2_103 = arith.constant 2 : index
    %c0_104 = arith.constant 0 : index
    %c0_105 = arith.constant 0 : index
    %182 = vector.load %arg3[%c0_102, %c2_103, %c0_104, %c0_105] : memref<2x3x4x32xf32, #tpu.memory_space<vmem>>, vector<1x1x4x32xf32>
    %183 = vector.shape_cast %182 : vector<1x1x4x32xf32> to vector<4x32xf32>
    %cst_106 = arith.constant dense<0.000000e+00> : vector<8x32xf32>
    %184 = tpu.matmul %173, %183, %cst_106 {dimension_numbers = #tpu.dot_dimension_numbers<[1], [0], [0], [1], [0, 0, 1, 1], [], []>} : vector<8x4xf32>, vector<4x32xf32>, vector<8x32xf32> -> vector<8x32xf32>
    %185 = arith.addf %181, %184 : vector<8x32xf32>
    %186 = arith.addf %185, %174 : vector<8x32xf32>
    %c1_107 = arith.constant 1 : index
    %c0_108 = arith.constant 0 : index
    %c0_109 = arith.constant 0 : index
    %c0_110 = arith.constant 0 : index
    %187 = vector.load %arg3[%c1_107, %c0_108, %c0_109, %c0_110] : memref<2x3x4x32xf32, #tpu.memory_space<vmem>>, vector<1x1x4x32xf32>
    %188 = vector.shape_cast %187 : vector<1x1x4x32xf32> to vector<4x32xf32>
    %cst_111 = arith.constant dense<0.000000e+00> : vector<8x32xf32>
    %189 = tpu.matmul %172, %188, %cst_111 {dimension_numbers = #tpu.dot_dimension_numbers<[1], [0], [0], [1], [0, 0, 1, 1], [], []>} : vector<8x4xf32>, vector<4x32xf32>, vector<8x32xf32> -> vector<8x32xf32>
    %c1_112 = arith.constant 1 : index
    %c1_113 = arith.constant 1 : index
    %c0_114 = arith.constant 0 : index
    %c0_115 = arith.constant 0 : index
    %190 = vector.load %arg3[%c1_112, %c1_113, %c0_114, %c0_115] : memref<2x3x4x32xf32, #tpu.memory_space<vmem>>, vector<1x1x4x32xf32>
    %191 = vector.shape_cast %190 : vector<1x1x4x32xf32> to vector<4x32xf32>
    %cst_116 = arith.constant dense<0.000000e+00> : vector<8x32xf32>
    %192 = tpu.matmul %17, %191, %cst_116 {dimension_numbers = #tpu.dot_dimension_numbers<[1], [0], [0], [1], [0, 0, 1, 1], [], []>} : vector<8x4xf32>, vector<4x32xf32>, vector<8x32xf32> -> vector<8x32xf32>
    %193 = arith.addf %189, %192 : vector<8x32xf32>
    %c1_117 = arith.constant 1 : index
    %c2_118 = arith.constant 2 : index
    %c0_119 = arith.constant 0 : index
    %c0_120 = arith.constant 0 : index
    %194 = vector.load %arg3[%c1_117, %c2_118, %c0_119, %c0_120] : memref<2x3x4x32xf32, #tpu.memory_space<vmem>>, vector<1x1x4x32xf32>
    %195 = vector.shape_cast %194 : vector<1x1x4x32xf32> to vector<4x32xf32>
    %cst_121 = arith.constant dense<0.000000e+00> : vector<8x32xf32>
    %196 = tpu.matmul %173, %195, %cst_121 {dimension_numbers = #tpu.dot_dimension_numbers<[1], [0], [0], [1], [0, 0, 1, 1], [], []>} : vector<8x4xf32>, vector<4x32xf32>, vector<8x32xf32> -> vector<8x32xf32>
    %197 = arith.addf %193, %196 : vector<8x32xf32>
    %198 = arith.addf %197, %174 : vector<8x32xf32>
    %c0_122 = arith.constant 0 : index
    %c0_123 = arith.constant 0 : index
    %c0_124 = arith.constant 0 : index
    %c0_125 = arith.constant 0 : index
    %199 = vector.load %arg12[%c0_122, %c0_123, %c0_124, %c0_125] : memref<2x3x32x32xf32, #tpu.memory_space<vmem>>, vector<1x1x32x32xf32>
    %200 = vector.shape_cast %199 : vector<1x1x32x32xf32> to vector<32x32xf32>
    %c0_126 = arith.constant 0 : index
    %c0_127 = arith.constant 0 : index
    %c0_128 = arith.constant 0 : index
    %c0_129 = arith.constant 0 : index
    %201 = vector.load %arg13[%c0_126, %c0_127, %c0_128, %c0_129] : memref<2x3x1x32xf32, #tpu.memory_space<vmem>>, vector<1x1x1x32xf32>
    %202 = vector.shape_cast %201 : vector<1x1x1x32xf32> to vector<1x32xf32>
    %c0_130 = arith.constant 0 : index
    %c1_131 = arith.constant 1 : index
    %c0_132 = arith.constant 0 : index
    %c0_133 = arith.constant 0 : index
    %203 = vector.load %arg12[%c0_130, %c1_131, %c0_132, %c0_133] : memref<2x3x32x32xf32, #tpu.memory_space<vmem>>, vector<1x1x32x32xf32>
    %204 = vector.shape_cast %203 : vector<1x1x32x32xf32> to vector<32x32xf32>
    %c0_134 = arith.constant 0 : index
    %c1_135 = arith.constant 1 : index
    %c0_136 = arith.constant 0 : index
    %c0_137 = arith.constant 0 : index
    %205 = vector.load %arg13[%c0_134, %c1_135, %c0_136, %c0_137] : memref<2x3x1x32xf32, #tpu.memory_space<vmem>>, vector<1x1x1x32xf32>
    %206 = vector.shape_cast %205 : vector<1x1x1x32xf32> to vector<1x32xf32>
    %c0_138 = arith.constant 0 : index
    %c2_139 = arith.constant 2 : index
    %c0_140 = arith.constant 0 : index
    %c0_141 = arith.constant 0 : index
    %207 = vector.load %arg12[%c0_138, %c2_139, %c0_140, %c0_141] : memref<2x3x32x32xf32, #tpu.memory_space<vmem>>, vector<1x1x32x32xf32>
    %208 = vector.shape_cast %207 : vector<1x1x32x32xf32> to vector<32x32xf32>
    %c0_142 = arith.constant 0 : index
    %c2_143 = arith.constant 2 : index
    %c0_144 = arith.constant 0 : index
    %c0_145 = arith.constant 0 : index
    %209 = vector.load %arg13[%c0_142, %c2_143, %c0_144, %c0_145] : memref<2x3x1x32xf32, #tpu.memory_space<vmem>>, vector<1x1x1x32xf32>
    %210 = vector.shape_cast %209 : vector<1x1x1x32xf32> to vector<1x32xf32>
    %c0_146 = arith.constant 0 : index
    %c0_147 = arith.constant 0 : index
    %c0_148 = arith.constant 0 : index
    %c0_149 = arith.constant 0 : index
    %211 = vector.load %arg14[%c0_146, %c0_147, %c0_148, %c0_149] : memref<2x4x8x32xf32, #tpu.memory_space<vmem>>, vector<1x4x8x32xf32>
    %212 = vector.shape_cast %211 : vector<1x4x8x32xf32> to vector<4x8x32xf32>
    %c0_150 = arith.constant 0 : index
    %c0_151 = arith.constant 0 : index
    %c0_152 = arith.constant 0 : index
    %213 = vector.load %arg15[%c0_150, %c0_151, %c0_152] : memref<2x1x32xf32, #tpu.memory_space<vmem>>, vector<1x1x32xf32>
    %214 = vector.shape_cast %213 : vector<1x1x32xf32> to vector<1x32xf32>
    %cst_153 = arith.constant dense<0.000000e+00> : vector<8x32xf32>
    %215 = tpu.matmul %186, %200, %cst_153 {dimension_numbers = #tpu.dot_dimension_numbers<[1], [0], [0], [1], [0, 0, 1, 1], [], []>} : vector<8x32xf32>, vector<32x32xf32>, vector<8x32xf32> -> vector<8x32xf32>
    %216 = vector.broadcast %202 : vector<1x32xf32> to vector<8x32xf32>
    %217 = arith.addf %215, %216 : vector<8x32xf32>
    %cst_154 = arith.constant dense<0.000000e+00> : vector<8x32xf32>
    %218 = tpu.matmul %186, %204, %cst_154 {dimension_numbers = #tpu.dot_dimension_numbers<[1], [0], [0], [1], [0, 0, 1, 1], [], []>} : vector<8x32xf32>, vector<32x32xf32>, vector<8x32xf32> -> vector<8x32xf32>
    %219 = vector.broadcast %206 : vector<1x32xf32> to vector<8x32xf32>
    %220 = arith.addf %218, %219 : vector<8x32xf32>
    %cst_155 = arith.constant dense<0.000000e+00> : vector<8x32xf32>
    %221 = tpu.matmul %186, %208, %cst_155 {dimension_numbers = #tpu.dot_dimension_numbers<[1], [0], [0], [1], [0, 0, 1, 1], [], []>} : vector<8x32xf32>, vector<32x32xf32>, vector<8x32xf32> -> vector<8x32xf32>
    %222 = vector.broadcast %210 : vector<1x32xf32> to vector<8x32xf32>
    %223 = arith.addf %221, %222 : vector<8x32xf32>
    %224 = vector.extract_strided_slice %217 {offsets = [0, 0], sizes = [8, 8], strides = [1, 1]} : vector<8x32xf32> to vector<8x8xf32>
    %225 = vector.extract_strided_slice %217 {offsets = [0, 8], sizes = [8, 8], strides = [1, 1]} : vector<8x32xf32> to vector<8x8xf32>
    %226 = vector.extract_strided_slice %217 {offsets = [0, 16], sizes = [8, 8], strides = [1, 1]} : vector<8x32xf32> to vector<8x8xf32>
    %227 = vector.extract_strided_slice %217 {offsets = [0, 24], sizes = [8, 8], strides = [1, 1]} : vector<8x32xf32> to vector<8x8xf32>
    %228 = vector.shape_cast %224 : vector<8x8xf32> to vector<1x8x8xf32>
    %229 = vector.shape_cast %225 : vector<8x8xf32> to vector<1x8x8xf32>
    %230 = vector.shape_cast %226 : vector<8x8xf32> to vector<1x8x8xf32>
    %231 = vector.shape_cast %227 : vector<8x8xf32> to vector<1x8x8xf32>
    %232 = tpu.concatenate %228, %229, %230, %231 in 0 : vector<1x8x8xf32>, vector<1x8x8xf32>, vector<1x8x8xf32>, vector<1x8x8xf32> -> vector<4x8x8xf32>
    %233 = vector.extract_strided_slice %220 {offsets = [0, 0], sizes = [8, 8], strides = [1, 1]} : vector<8x32xf32> to vector<8x8xf32>
    %234 = vector.extract_strided_slice %220 {offsets = [0, 8], sizes = [8, 8], strides = [1, 1]} : vector<8x32xf32> to vector<8x8xf32>
    %235 = vector.extract_strided_slice %220 {offsets = [0, 16], sizes = [8, 8], strides = [1, 1]} : vector<8x32xf32> to vector<8x8xf32>
    %236 = vector.extract_strided_slice %220 {offsets = [0, 24], sizes = [8, 8], strides = [1, 1]} : vector<8x32xf32> to vector<8x8xf32>
    %237 = vector.shape_cast %233 : vector<8x8xf32> to vector<1x8x8xf32>
    %238 = vector.shape_cast %234 : vector<8x8xf32> to vector<1x8x8xf32>
    %239 = vector.shape_cast %235 : vector<8x8xf32> to vector<1x8x8xf32>
    %240 = vector.shape_cast %236 : vector<8x8xf32> to vector<1x8x8xf32>
    %241 = tpu.concatenate %237, %238, %239, %240 in 0 : vector<1x8x8xf32>, vector<1x8x8xf32>, vector<1x8x8xf32>, vector<1x8x8xf32> -> vector<4x8x8xf32>
    %242 = vector.extract_strided_slice %223 {offsets = [0, 0], sizes = [8, 8], strides = [1, 1]} : vector<8x32xf32> to vector<8x8xf32>
    %243 = vector.extract_strided_slice %223 {offsets = [0, 8], sizes = [8, 8], strides = [1, 1]} : vector<8x32xf32> to vector<8x8xf32>
    %244 = vector.extract_strided_slice %223 {offsets = [0, 16], sizes = [8, 8], strides = [1, 1]} : vector<8x32xf32> to vector<8x8xf32>
    %245 = vector.extract_strided_slice %223 {offsets = [0, 24], sizes = [8, 8], strides = [1, 1]} : vector<8x32xf32> to vector<8x8xf32>
    %246 = vector.shape_cast %242 : vector<8x8xf32> to vector<1x8x8xf32>
    %247 = vector.shape_cast %243 : vector<8x8xf32> to vector<1x8x8xf32>
    %248 = vector.shape_cast %244 : vector<8x8xf32> to vector<1x8x8xf32>
    %249 = vector.shape_cast %245 : vector<8x8xf32> to vector<1x8x8xf32>
    %250 = tpu.concatenate %246, %247, %248, %249 in 0 : vector<1x8x8xf32>, vector<1x8x8xf32>, vector<1x8x8xf32>, vector<1x8x8xf32> -> vector<4x8x8xf32>
    %cst_156 = arith.constant dense<0.000000e+00> : vector<4x8x8xf32>
    %251 = tpu.matmul %232, %241, %cst_156 {dimension_numbers = #tpu.dot_dimension_numbers<[2], [2], [1], [1], [0, 0, 0, 1, 1, 1], [0], [0]>} : vector<4x8x8xf32>, vector<4x8x8xf32>, vector<4x8x8xf32> -> vector<4x8x8xf32>
    %252 = vector.shape_cast %125 : vector<1x1xf32> to vector<1x1x1xf32>
    %253 = vector.broadcast %252 : vector<1x1x1xf32> to vector<4x8x8xf32>
    %254 = arith.mulf %251, %253 : vector<4x8x8xf32>
    %255 = vector.shape_cast %127 : vector<1x8xf32> to vector<1x1x8xf32>
    %256 = vector.broadcast %255 : vector<1x1x8xf32> to vector<4x8x8xf32>
    %257 = arith.addf %254, %256 : vector<4x8x8xf32>
    %cst_157 = arith.constant dense<0xFF800000> : vector<4x8xf32>
    %258 = vector.multi_reduction <maximumf>, %257, %cst_157 [2] : vector<4x8x8xf32> to vector<4x8xf32>
    %259 = vector.shape_cast %258 : vector<4x8xf32> to vector<4x8x1xf32>
    %260 = vector.broadcast %259 : vector<4x8x1xf32> to vector<4x8x8xf32>
    %261 = arith.subf %257, %260 : vector<4x8x8xf32>
    %262 = math.exp %261 : vector<4x8x8xf32>
    %cst_158 = arith.constant dense<0.000000e+00> : vector<4x8xf32>
    %263 = vector.multi_reduction <add>, %262, %cst_158 [2] : vector<4x8x8xf32> to vector<4x8xf32>
    %264 = vector.shape_cast %263 : vector<4x8xf32> to vector<4x8x1xf32>
    %265 = tpu.reciprocal %264 {approx = true} : vector<4x8x1xf32> -> vector<4x8x1xf32>
    %266 = vector.broadcast %265 : vector<4x8x1xf32> to vector<4x8x8xf32>
    %267 = arith.mulf %262, %266 : vector<4x8x8xf32>
    %cst_159 = arith.constant dense<0.000000e+00> : vector<4x8x8xf32>
    %268 = tpu.matmul %267, %250, %cst_159 {dimension_numbers = #tpu.dot_dimension_numbers<[2], [1], [1], [2], [0, 0, 0, 1, 1, 2], [0], [0]>} : vector<4x8x8xf32>, vector<4x8x8xf32>, vector<4x8x8xf32> -> vector<4x8x8xf32>
    %cst_160 = arith.constant dense<0.000000e+00> : vector<4x8x32xf32>
    %269 = tpu.matmul %268, %212, %cst_160 {dimension_numbers = #tpu.dot_dimension_numbers<[2], [1], [1], [2], [0, 0, 0, 1, 1, 2], [0], [0]>} : vector<4x8x8xf32>, vector<4x8x32xf32>, vector<4x8x32xf32> -> vector<4x8x32xf32>
    %cst_161 = arith.constant dense<0.000000e+00> : vector<8x32xf32>
    %270 = vector.multi_reduction <add>, %269, %cst_161 [0] : vector<4x8x32xf32> to vector<8x32xf32>
    %271 = vector.broadcast %214 : vector<1x32xf32> to vector<8x32xf32>
    %272 = arith.addf %270, %271 : vector<8x32xf32>
    %273 = arith.addf %186, %272 : vector<8x32xf32>
    %c0_162 = arith.constant 0 : index
    %c0_163 = arith.constant 0 : index
    %c0_164 = arith.constant 0 : index
    %c0_165 = arith.constant 0 : index
    %274 = vector.load %arg20[%c0_162, %c0_163, %c0_164, %c0_165] : memref<2x4x1x32xf32, #tpu.memory_space<vmem>>, vector<1x1x1x32xf32>
    %275 = vector.shape_cast %274 : vector<1x1x1x32xf32> to vector<1x32xf32>
    %c0_166 = arith.constant 0 : index
    %c1_167 = arith.constant 1 : index
    %c0_168 = arith.constant 0 : index
    %c0_169 = arith.constant 0 : index
    %276 = vector.load %arg20[%c0_166, %c1_167, %c0_168, %c0_169] : memref<2x4x1x32xf32, #tpu.memory_space<vmem>>, vector<1x1x1x32xf32>
    %277 = vector.shape_cast %276 : vector<1x1x1x32xf32> to vector<1x32xf32>
    %cst_170 = arith.constant dense<0.000000e+00> : vector<8xf32>
    %278 = vector.multi_reduction <add>, %273, %cst_170 [1] : vector<8x32xf32> to vector<8xf32>
    %279 = vector.shape_cast %278 : vector<8xf32> to vector<8x1xf32>
    %cst_171 = arith.constant 3.200000e+01 : f32
    %280 = vector.broadcast %cst_171 : f32 to vector<8x1xf32>
    %281 = arith.divf %279, %280 : vector<8x1xf32>
    %282 = vector.broadcast %281 : vector<8x1xf32> to vector<8x32xf32>
    %283 = arith.subf %273, %282 : vector<8x32xf32>
    %284 = arith.mulf %283, %283 : vector<8x32xf32>
    %cst_172 = arith.constant dense<0.000000e+00> : vector<8xf32>
    %285 = vector.multi_reduction <add>, %284, %cst_172 [1] : vector<8x32xf32> to vector<8xf32>
    %286 = vector.shape_cast %285 : vector<8xf32> to vector<8x1xf32>
    %cst_173 = arith.constant 3.200000e+01 : f32
    %287 = vector.broadcast %cst_173 : f32 to vector<8x1xf32>
    %288 = arith.divf %286, %287 : vector<8x1xf32>
    %cst_174 = arith.constant 9.99999974E-6 : f32
    %289 = vector.broadcast %cst_174 : f32 to vector<8x1xf32>
    %290 = arith.addf %288, %289 : vector<8x1xf32>
    %291 = math.rsqrt %290 : vector<8x1xf32>
    %292 = vector.broadcast %291 : vector<8x1xf32> to vector<8x32xf32>
    %293 = arith.mulf %283, %292 : vector<8x32xf32>
    %294 = vector.broadcast %275 : vector<1x32xf32> to vector<8x32xf32>
    %295 = arith.mulf %293, %294 : vector<8x32xf32>
    %296 = vector.broadcast %277 : vector<1x32xf32> to vector<8x32xf32>
    %297 = arith.addf %295, %296 : vector<8x32xf32>
    %c0_175 = arith.constant 0 : index
    %c0_176 = arith.constant 0 : index
    %c0_177 = arith.constant 0 : index
    %298 = vector.load %arg16[%c0_175, %c0_176, %c0_177] : memref<2x32x64xf32, #tpu.memory_space<vmem>>, vector<1x32x64xf32>
    %299 = vector.shape_cast %298 : vector<1x32x64xf32> to vector<32x64xf32>
    %cst_178 = arith.constant dense<0.000000e+00> : vector<8x64xf32>
    %300 = tpu.matmul %297, %299, %cst_178 {dimension_numbers = #tpu.dot_dimension_numbers<[1], [0], [0], [1], [0, 0, 1, 1], [], []>} : vector<8x32xf32>, vector<32x64xf32>, vector<8x64xf32> -> vector<8x64xf32>
    %c0_179 = arith.constant 0 : index
    %c0_180 = arith.constant 0 : index
    %c0_181 = arith.constant 0 : index
    %301 = vector.load %arg17[%c0_179, %c0_180, %c0_181] : memref<2x1x64xf32, #tpu.memory_space<vmem>>, vector<1x1x64xf32>
    %302 = vector.shape_cast %301 : vector<1x1x64xf32> to vector<1x64xf32>
    %303 = vector.broadcast %302 : vector<1x64xf32> to vector<8x64xf32>
    %304 = arith.addf %300, %303 : vector<8x64xf32>
    %cst_182 = arith.constant 0.000000e+00 : f32
    %305 = vector.broadcast %cst_182 : f32 to vector<8x64xf32>
    %306 = arith.maximumf %304, %305 : vector<8x64xf32>
    %c0_183 = arith.constant 0 : index
    %c0_184 = arith.constant 0 : index
    %c0_185 = arith.constant 0 : index
    %307 = vector.load %arg18[%c0_183, %c0_184, %c0_185] : memref<2x64x32xf32, #tpu.memory_space<vmem>>, vector<1x64x32xf32>
    %308 = vector.shape_cast %307 : vector<1x64x32xf32> to vector<64x32xf32>
    %cst_186 = arith.constant dense<0.000000e+00> : vector<8x32xf32>
    %309 = tpu.matmul %306, %308, %cst_186 {dimension_numbers = #tpu.dot_dimension_numbers<[1], [0], [0], [1], [0, 0, 1, 1], [], []>} : vector<8x64xf32>, vector<64x32xf32>, vector<8x32xf32> -> vector<8x32xf32>
    %c0_187 = arith.constant 0 : index
    %c0_188 = arith.constant 0 : index
    %c0_189 = arith.constant 0 : index
    %310 = vector.load %arg19[%c0_187, %c0_188, %c0_189] : memref<2x1x32xf32, #tpu.memory_space<vmem>>, vector<1x1x32xf32>
    %311 = vector.shape_cast %310 : vector<1x1x32xf32> to vector<1x32xf32>
    %312 = vector.broadcast %311 : vector<1x32xf32> to vector<8x32xf32>
    %313 = arith.addf %309, %312 : vector<8x32xf32>
    %314 = arith.addf %297, %313 : vector<8x32xf32>
    %c0_190 = arith.constant 0 : index
    %c2_191 = arith.constant 2 : index
    %c0_192 = arith.constant 0 : index
    %c0_193 = arith.constant 0 : index
    %315 = vector.load %arg20[%c0_190, %c2_191, %c0_192, %c0_193] : memref<2x4x1x32xf32, #tpu.memory_space<vmem>>, vector<1x1x1x32xf32>
    %316 = vector.shape_cast %315 : vector<1x1x1x32xf32> to vector<1x32xf32>
    %c0_194 = arith.constant 0 : index
    %c3 = arith.constant 3 : index
    %c0_195 = arith.constant 0 : index
    %c0_196 = arith.constant 0 : index
    %317 = vector.load %arg20[%c0_194, %c3, %c0_195, %c0_196] : memref<2x4x1x32xf32, #tpu.memory_space<vmem>>, vector<1x1x1x32xf32>
    %318 = vector.shape_cast %317 : vector<1x1x1x32xf32> to vector<1x32xf32>
    %cst_197 = arith.constant dense<0.000000e+00> : vector<8xf32>
    %319 = vector.multi_reduction <add>, %314, %cst_197 [1] : vector<8x32xf32> to vector<8xf32>
    %320 = vector.shape_cast %319 : vector<8xf32> to vector<8x1xf32>
    %cst_198 = arith.constant 3.200000e+01 : f32
    %321 = vector.broadcast %cst_198 : f32 to vector<8x1xf32>
    %322 = arith.divf %320, %321 : vector<8x1xf32>
    %323 = vector.broadcast %322 : vector<8x1xf32> to vector<8x32xf32>
    %324 = arith.subf %314, %323 : vector<8x32xf32>
    %325 = arith.mulf %324, %324 : vector<8x32xf32>
    %cst_199 = arith.constant dense<0.000000e+00> : vector<8xf32>
    %326 = vector.multi_reduction <add>, %325, %cst_199 [1] : vector<8x32xf32> to vector<8xf32>
    %327 = vector.shape_cast %326 : vector<8xf32> to vector<8x1xf32>
    %cst_200 = arith.constant 3.200000e+01 : f32
    %328 = vector.broadcast %cst_200 : f32 to vector<8x1xf32>
    %329 = arith.divf %327, %328 : vector<8x1xf32>
    %cst_201 = arith.constant 9.99999974E-6 : f32
    %330 = vector.broadcast %cst_201 : f32 to vector<8x1xf32>
    %331 = arith.addf %329, %330 : vector<8x1xf32>
    %332 = math.rsqrt %331 : vector<8x1xf32>
    %333 = vector.broadcast %332 : vector<8x1xf32> to vector<8x32xf32>
    %334 = arith.mulf %324, %333 : vector<8x32xf32>
    %335 = vector.broadcast %316 : vector<1x32xf32> to vector<8x32xf32>
    %336 = arith.mulf %334, %335 : vector<8x32xf32>
    %337 = vector.broadcast %318 : vector<1x32xf32> to vector<8x32xf32>
    %338 = arith.addf %336, %337 : vector<8x32xf32>
    %c1_202 = arith.constant 1 : index
    %c0_203 = arith.constant 0 : index
    %c0_204 = arith.constant 0 : index
    %c0_205 = arith.constant 0 : index
    %339 = vector.load %arg12[%c1_202, %c0_203, %c0_204, %c0_205] : memref<2x3x32x32xf32, #tpu.memory_space<vmem>>, vector<1x1x32x32xf32>
    %340 = vector.shape_cast %339 : vector<1x1x32x32xf32> to vector<32x32xf32>
    %c1_206 = arith.constant 1 : index
    %c0_207 = arith.constant 0 : index
    %c0_208 = arith.constant 0 : index
    %c0_209 = arith.constant 0 : index
    %341 = vector.load %arg13[%c1_206, %c0_207, %c0_208, %c0_209] : memref<2x3x1x32xf32, #tpu.memory_space<vmem>>, vector<1x1x1x32xf32>
    %342 = vector.shape_cast %341 : vector<1x1x1x32xf32> to vector<1x32xf32>
    %c1_210 = arith.constant 1 : index
    %c1_211 = arith.constant 1 : index
    %c0_212 = arith.constant 0 : index
    %c0_213 = arith.constant 0 : index
    %343 = vector.load %arg12[%c1_210, %c1_211, %c0_212, %c0_213] : memref<2x3x32x32xf32, #tpu.memory_space<vmem>>, vector<1x1x32x32xf32>
    %344 = vector.shape_cast %343 : vector<1x1x32x32xf32> to vector<32x32xf32>
    %c1_214 = arith.constant 1 : index
    %c1_215 = arith.constant 1 : index
    %c0_216 = arith.constant 0 : index
    %c0_217 = arith.constant 0 : index
    %345 = vector.load %arg13[%c1_214, %c1_215, %c0_216, %c0_217] : memref<2x3x1x32xf32, #tpu.memory_space<vmem>>, vector<1x1x1x32xf32>
    %346 = vector.shape_cast %345 : vector<1x1x1x32xf32> to vector<1x32xf32>
    %c1_218 = arith.constant 1 : index
    %c2_219 = arith.constant 2 : index
    %c0_220 = arith.constant 0 : index
    %c0_221 = arith.constant 0 : index
    %347 = vector.load %arg12[%c1_218, %c2_219, %c0_220, %c0_221] : memref<2x3x32x32xf32, #tpu.memory_space<vmem>>, vector<1x1x32x32xf32>
    %348 = vector.shape_cast %347 : vector<1x1x32x32xf32> to vector<32x32xf32>
    %c1_222 = arith.constant 1 : index
    %c2_223 = arith.constant 2 : index
    %c0_224 = arith.constant 0 : index
    %c0_225 = arith.constant 0 : index
    %349 = vector.load %arg13[%c1_222, %c2_223, %c0_224, %c0_225] : memref<2x3x1x32xf32, #tpu.memory_space<vmem>>, vector<1x1x1x32xf32>
    %350 = vector.shape_cast %349 : vector<1x1x1x32xf32> to vector<1x32xf32>
    %c1_226 = arith.constant 1 : index
    %c0_227 = arith.constant 0 : index
    %c0_228 = arith.constant 0 : index
    %c0_229 = arith.constant 0 : index
    %351 = vector.load %arg14[%c1_226, %c0_227, %c0_228, %c0_229] : memref<2x4x8x32xf32, #tpu.memory_space<vmem>>, vector<1x4x8x32xf32>
    %352 = vector.shape_cast %351 : vector<1x4x8x32xf32> to vector<4x8x32xf32>
    %c1_230 = arith.constant 1 : index
    %c0_231 = arith.constant 0 : index
    %c0_232 = arith.constant 0 : index
    %353 = vector.load %arg15[%c1_230, %c0_231, %c0_232] : memref<2x1x32xf32, #tpu.memory_space<vmem>>, vector<1x1x32xf32>
    %354 = vector.shape_cast %353 : vector<1x1x32xf32> to vector<1x32xf32>
    %cst_233 = arith.constant dense<0.000000e+00> : vector<8x32xf32>
    %355 = tpu.matmul %338, %340, %cst_233 {dimension_numbers = #tpu.dot_dimension_numbers<[1], [0], [0], [1], [0, 0, 1, 1], [], []>} : vector<8x32xf32>, vector<32x32xf32>, vector<8x32xf32> -> vector<8x32xf32>
    %356 = vector.broadcast %342 : vector<1x32xf32> to vector<8x32xf32>
    %357 = arith.addf %355, %356 : vector<8x32xf32>
    %cst_234 = arith.constant dense<0.000000e+00> : vector<8x32xf32>
    %358 = tpu.matmul %338, %344, %cst_234 {dimension_numbers = #tpu.dot_dimension_numbers<[1], [0], [0], [1], [0, 0, 1, 1], [], []>} : vector<8x32xf32>, vector<32x32xf32>, vector<8x32xf32> -> vector<8x32xf32>
    %359 = vector.broadcast %346 : vector<1x32xf32> to vector<8x32xf32>
    %360 = arith.addf %358, %359 : vector<8x32xf32>
    %cst_235 = arith.constant dense<0.000000e+00> : vector<8x32xf32>
    %361 = tpu.matmul %338, %348, %cst_235 {dimension_numbers = #tpu.dot_dimension_numbers<[1], [0], [0], [1], [0, 0, 1, 1], [], []>} : vector<8x32xf32>, vector<32x32xf32>, vector<8x32xf32> -> vector<8x32xf32>
    %362 = vector.broadcast %350 : vector<1x32xf32> to vector<8x32xf32>
    %363 = arith.addf %361, %362 : vector<8x32xf32>
    %364 = vector.extract_strided_slice %357 {offsets = [0, 0], sizes = [8, 8], strides = [1, 1]} : vector<8x32xf32> to vector<8x8xf32>
    %365 = vector.extract_strided_slice %357 {offsets = [0, 8], sizes = [8, 8], strides = [1, 1]} : vector<8x32xf32> to vector<8x8xf32>
    %366 = vector.extract_strided_slice %357 {offsets = [0, 16], sizes = [8, 8], strides = [1, 1]} : vector<8x32xf32> to vector<8x8xf32>
    %367 = vector.extract_strided_slice %357 {offsets = [0, 24], sizes = [8, 8], strides = [1, 1]} : vector<8x32xf32> to vector<8x8xf32>
    %368 = vector.shape_cast %364 : vector<8x8xf32> to vector<1x8x8xf32>
    %369 = vector.shape_cast %365 : vector<8x8xf32> to vector<1x8x8xf32>
    %370 = vector.shape_cast %366 : vector<8x8xf32> to vector<1x8x8xf32>
    %371 = vector.shape_cast %367 : vector<8x8xf32> to vector<1x8x8xf32>
    %372 = tpu.concatenate %368, %369, %370, %371 in 0 : vector<1x8x8xf32>, vector<1x8x8xf32>, vector<1x8x8xf32>, vector<1x8x8xf32> -> vector<4x8x8xf32>
    %373 = vector.extract_strided_slice %360 {offsets = [0, 0], sizes = [8, 8], strides = [1, 1]} : vector<8x32xf32> to vector<8x8xf32>
    %374 = vector.extract_strided_slice %360 {offsets = [0, 8], sizes = [8, 8], strides = [1, 1]} : vector<8x32xf32> to vector<8x8xf32>
    %375 = vector.extract_strided_slice %360 {offsets = [0, 16], sizes = [8, 8], strides = [1, 1]} : vector<8x32xf32> to vector<8x8xf32>
    %376 = vector.extract_strided_slice %360 {offsets = [0, 24], sizes = [8, 8], strides = [1, 1]} : vector<8x32xf32> to vector<8x8xf32>
    %377 = vector.shape_cast %373 : vector<8x8xf32> to vector<1x8x8xf32>
    %378 = vector.shape_cast %374 : vector<8x8xf32> to vector<1x8x8xf32>
    %379 = vector.shape_cast %375 : vector<8x8xf32> to vector<1x8x8xf32>
    %380 = vector.shape_cast %376 : vector<8x8xf32> to vector<1x8x8xf32>
    %381 = tpu.concatenate %377, %378, %379, %380 in 0 : vector<1x8x8xf32>, vector<1x8x8xf32>, vector<1x8x8xf32>, vector<1x8x8xf32> -> vector<4x8x8xf32>
    %382 = vector.extract_strided_slice %363 {offsets = [0, 0], sizes = [8, 8], strides = [1, 1]} : vector<8x32xf32> to vector<8x8xf32>
    %383 = vector.extract_strided_slice %363 {offsets = [0, 8], sizes = [8, 8], strides = [1, 1]} : vector<8x32xf32> to vector<8x8xf32>
    %384 = vector.extract_strided_slice %363 {offsets = [0, 16], sizes = [8, 8], strides = [1, 1]} : vector<8x32xf32> to vector<8x8xf32>
    %385 = vector.extract_strided_slice %363 {offsets = [0, 24], sizes = [8, 8], strides = [1, 1]} : vector<8x32xf32> to vector<8x8xf32>
    %386 = vector.shape_cast %382 : vector<8x8xf32> to vector<1x8x8xf32>
    %387 = vector.shape_cast %383 : vector<8x8xf32> to vector<1x8x8xf32>
    %388 = vector.shape_cast %384 : vector<8x8xf32> to vector<1x8x8xf32>
    %389 = vector.shape_cast %385 : vector<8x8xf32> to vector<1x8x8xf32>
    %390 = tpu.concatenate %386, %387, %388, %389 in 0 : vector<1x8x8xf32>, vector<1x8x8xf32>, vector<1x8x8xf32>, vector<1x8x8xf32> -> vector<4x8x8xf32>
    %cst_236 = arith.constant dense<0.000000e+00> : vector<4x8x8xf32>
    %391 = tpu.matmul %372, %381, %cst_236 {dimension_numbers = #tpu.dot_dimension_numbers<[2], [2], [1], [1], [0, 0, 0, 1, 1, 1], [0], [0]>} : vector<4x8x8xf32>, vector<4x8x8xf32>, vector<4x8x8xf32> -> vector<4x8x8xf32>
    %392 = vector.shape_cast %125 : vector<1x1xf32> to vector<1x1x1xf32>
    %393 = vector.broadcast %392 : vector<1x1x1xf32> to vector<4x8x8xf32>
    %394 = arith.mulf %391, %393 : vector<4x8x8xf32>
    %395 = vector.shape_cast %127 : vector<1x8xf32> to vector<1x1x8xf32>
    %396 = vector.broadcast %395 : vector<1x1x8xf32> to vector<4x8x8xf32>
    %397 = arith.addf %394, %396 : vector<4x8x8xf32>
    %cst_237 = arith.constant dense<0xFF800000> : vector<4x8xf32>
    %398 = vector.multi_reduction <maximumf>, %397, %cst_237 [2] : vector<4x8x8xf32> to vector<4x8xf32>
    %399 = vector.shape_cast %398 : vector<4x8xf32> to vector<4x8x1xf32>
    %400 = vector.broadcast %399 : vector<4x8x1xf32> to vector<4x8x8xf32>
    %401 = arith.subf %397, %400 : vector<4x8x8xf32>
    %402 = math.exp %401 : vector<4x8x8xf32>
    %cst_238 = arith.constant dense<0.000000e+00> : vector<4x8xf32>
    %403 = vector.multi_reduction <add>, %402, %cst_238 [2] : vector<4x8x8xf32> to vector<4x8xf32>
    %404 = vector.shape_cast %403 : vector<4x8xf32> to vector<4x8x1xf32>
    %405 = tpu.reciprocal %404 {approx = true} : vector<4x8x1xf32> -> vector<4x8x1xf32>
    %406 = vector.broadcast %405 : vector<4x8x1xf32> to vector<4x8x8xf32>
    %407 = arith.mulf %402, %406 : vector<4x8x8xf32>
    %cst_239 = arith.constant dense<0.000000e+00> : vector<4x8x8xf32>
    %408 = tpu.matmul %407, %390, %cst_239 {dimension_numbers = #tpu.dot_dimension_numbers<[2], [1], [1], [2], [0, 0, 0, 1, 1, 2], [0], [0]>} : vector<4x8x8xf32>, vector<4x8x8xf32>, vector<4x8x8xf32> -> vector<4x8x8xf32>
    %cst_240 = arith.constant dense<0.000000e+00> : vector<4x8x32xf32>
    %409 = tpu.matmul %408, %352, %cst_240 {dimension_numbers = #tpu.dot_dimension_numbers<[2], [1], [1], [2], [0, 0, 0, 1, 1, 2], [0], [0]>} : vector<4x8x8xf32>, vector<4x8x32xf32>, vector<4x8x32xf32> -> vector<4x8x32xf32>
    %cst_241 = arith.constant dense<0.000000e+00> : vector<8x32xf32>
    %410 = vector.multi_reduction <add>, %409, %cst_241 [0] : vector<4x8x32xf32> to vector<8x32xf32>
    %411 = vector.broadcast %354 : vector<1x32xf32> to vector<8x32xf32>
    %412 = arith.addf %410, %411 : vector<8x32xf32>
    %413 = arith.addf %338, %412 : vector<8x32xf32>
    %c1_242 = arith.constant 1 : index
    %c0_243 = arith.constant 0 : index
    %c0_244 = arith.constant 0 : index
    %c0_245 = arith.constant 0 : index
    %414 = vector.load %arg20[%c1_242, %c0_243, %c0_244, %c0_245] : memref<2x4x1x32xf32, #tpu.memory_space<vmem>>, vector<1x1x1x32xf32>
    %415 = vector.shape_cast %414 : vector<1x1x1x32xf32> to vector<1x32xf32>
    %c1_246 = arith.constant 1 : index
    %c1_247 = arith.constant 1 : index
    %c0_248 = arith.constant 0 : index
    %c0_249 = arith.constant 0 : index
    %416 = vector.load %arg20[%c1_246, %c1_247, %c0_248, %c0_249] : memref<2x4x1x32xf32, #tpu.memory_space<vmem>>, vector<1x1x1x32xf32>
    %417 = vector.shape_cast %416 : vector<1x1x1x32xf32> to vector<1x32xf32>
    %cst_250 = arith.constant dense<0.000000e+00> : vector<8xf32>
    %418 = vector.multi_reduction <add>, %413, %cst_250 [1] : vector<8x32xf32> to vector<8xf32>
    %419 = vector.shape_cast %418 : vector<8xf32> to vector<8x1xf32>
    %cst_251 = arith.constant 3.200000e+01 : f32
    %420 = vector.broadcast %cst_251 : f32 to vector<8x1xf32>
    %421 = arith.divf %419, %420 : vector<8x1xf32>
    %422 = vector.broadcast %421 : vector<8x1xf32> to vector<8x32xf32>
    %423 = arith.subf %413, %422 : vector<8x32xf32>
    %424 = arith.mulf %423, %423 : vector<8x32xf32>
    %cst_252 = arith.constant dense<0.000000e+00> : vector<8xf32>
    %425 = vector.multi_reduction <add>, %424, %cst_252 [1] : vector<8x32xf32> to vector<8xf32>
    %426 = vector.shape_cast %425 : vector<8xf32> to vector<8x1xf32>
    %cst_253 = arith.constant 3.200000e+01 : f32
    %427 = vector.broadcast %cst_253 : f32 to vector<8x1xf32>
    %428 = arith.divf %426, %427 : vector<8x1xf32>
    %cst_254 = arith.constant 9.99999974E-6 : f32
    %429 = vector.broadcast %cst_254 : f32 to vector<8x1xf32>
    %430 = arith.addf %428, %429 : vector<8x1xf32>
    %431 = math.rsqrt %430 : vector<8x1xf32>
    %432 = vector.broadcast %431 : vector<8x1xf32> to vector<8x32xf32>
    %433 = arith.mulf %423, %432 : vector<8x32xf32>
    %434 = vector.broadcast %415 : vector<1x32xf32> to vector<8x32xf32>
    %435 = arith.mulf %433, %434 : vector<8x32xf32>
    %436 = vector.broadcast %417 : vector<1x32xf32> to vector<8x32xf32>
    %437 = arith.addf %435, %436 : vector<8x32xf32>
    %c1_255 = arith.constant 1 : index
    %c0_256 = arith.constant 0 : index
    %c0_257 = arith.constant 0 : index
    %438 = vector.load %arg16[%c1_255, %c0_256, %c0_257] : memref<2x32x64xf32, #tpu.memory_space<vmem>>, vector<1x32x64xf32>
    %439 = vector.shape_cast %438 : vector<1x32x64xf32> to vector<32x64xf32>
    %cst_258 = arith.constant dense<0.000000e+00> : vector<8x64xf32>
    %440 = tpu.matmul %437, %439, %cst_258 {dimension_numbers = #tpu.dot_dimension_numbers<[1], [0], [0], [1], [0, 0, 1, 1], [], []>} : vector<8x32xf32>, vector<32x64xf32>, vector<8x64xf32> -> vector<8x64xf32>
    %c1_259 = arith.constant 1 : index
    %c0_260 = arith.constant 0 : index
    %c0_261 = arith.constant 0 : index
    %441 = vector.load %arg17[%c1_259, %c0_260, %c0_261] : memref<2x1x64xf32, #tpu.memory_space<vmem>>, vector<1x1x64xf32>
    %442 = vector.shape_cast %441 : vector<1x1x64xf32> to vector<1x64xf32>
    %443 = vector.broadcast %442 : vector<1x64xf32> to vector<8x64xf32>
    %444 = arith.addf %440, %443 : vector<8x64xf32>
    %cst_262 = arith.constant 0.000000e+00 : f32
    %445 = vector.broadcast %cst_262 : f32 to vector<8x64xf32>
    %446 = arith.maximumf %444, %445 : vector<8x64xf32>
    %c1_263 = arith.constant 1 : index
    %c0_264 = arith.constant 0 : index
    %c0_265 = arith.constant 0 : index
    %447 = vector.load %arg18[%c1_263, %c0_264, %c0_265] : memref<2x64x32xf32, #tpu.memory_space<vmem>>, vector<1x64x32xf32>
    %448 = vector.shape_cast %447 : vector<1x64x32xf32> to vector<64x32xf32>
    %cst_266 = arith.constant dense<0.000000e+00> : vector<8x32xf32>
    %449 = tpu.matmul %446, %448, %cst_266 {dimension_numbers = #tpu.dot_dimension_numbers<[1], [0], [0], [1], [0, 0, 1, 1], [], []>} : vector<8x64xf32>, vector<64x32xf32>, vector<8x32xf32> -> vector<8x32xf32>
    %c1_267 = arith.constant 1 : index
    %c0_268 = arith.constant 0 : index
    %c0_269 = arith.constant 0 : index
    %450 = vector.load %arg19[%c1_267, %c0_268, %c0_269] : memref<2x1x32xf32, #tpu.memory_space<vmem>>, vector<1x1x32xf32>
    %451 = vector.shape_cast %450 : vector<1x1x32xf32> to vector<1x32xf32>
    %452 = vector.broadcast %451 : vector<1x32xf32> to vector<8x32xf32>
    %453 = arith.addf %449, %452 : vector<8x32xf32>
    %454 = arith.addf %437, %453 : vector<8x32xf32>
    %c1_270 = arith.constant 1 : index
    %c2_271 = arith.constant 2 : index
    %c0_272 = arith.constant 0 : index
    %c0_273 = arith.constant 0 : index
    %455 = vector.load %arg20[%c1_270, %c2_271, %c0_272, %c0_273] : memref<2x4x1x32xf32, #tpu.memory_space<vmem>>, vector<1x1x1x32xf32>
    %456 = vector.shape_cast %455 : vector<1x1x1x32xf32> to vector<1x32xf32>
    %c1_274 = arith.constant 1 : index
    %c3_275 = arith.constant 3 : index
    %c0_276 = arith.constant 0 : index
    %c0_277 = arith.constant 0 : index
    %457 = vector.load %arg20[%c1_274, %c3_275, %c0_276, %c0_277] : memref<2x4x1x32xf32, #tpu.memory_space<vmem>>, vector<1x1x1x32xf32>
    %458 = vector.shape_cast %457 : vector<1x1x1x32xf32> to vector<1x32xf32>
    %cst_278 = arith.constant dense<0.000000e+00> : vector<8xf32>
    %459 = vector.multi_reduction <add>, %454, %cst_278 [1] : vector<8x32xf32> to vector<8xf32>
    %460 = vector.shape_cast %459 : vector<8xf32> to vector<8x1xf32>
    %cst_279 = arith.constant 3.200000e+01 : f32
    %461 = vector.broadcast %cst_279 : f32 to vector<8x1xf32>
    %462 = arith.divf %460, %461 : vector<8x1xf32>
    %463 = vector.broadcast %462 : vector<8x1xf32> to vector<8x32xf32>
    %464 = arith.subf %454, %463 : vector<8x32xf32>
    %465 = arith.mulf %464, %464 : vector<8x32xf32>
    %cst_280 = arith.constant dense<0.000000e+00> : vector<8xf32>
    %466 = vector.multi_reduction <add>, %465, %cst_280 [1] : vector<8x32xf32> to vector<8xf32>
    %467 = vector.shape_cast %466 : vector<8xf32> to vector<8x1xf32>
    %cst_281 = arith.constant 3.200000e+01 : f32
    %468 = vector.broadcast %cst_281 : f32 to vector<8x1xf32>
    %469 = arith.divf %467, %468 : vector<8x1xf32>
    %cst_282 = arith.constant 9.99999974E-6 : f32
    %470 = vector.broadcast %cst_282 : f32 to vector<8x1xf32>
    %471 = arith.addf %469, %470 : vector<8x1xf32>
    %472 = math.rsqrt %471 : vector<8x1xf32>
    %473 = vector.broadcast %472 : vector<8x1xf32> to vector<8x32xf32>
    %474 = arith.mulf %464, %473 : vector<8x32xf32>
    %475 = vector.broadcast %456 : vector<1x32xf32> to vector<8x32xf32>
    %476 = arith.mulf %474, %475 : vector<8x32xf32>
    %477 = vector.broadcast %458 : vector<1x32xf32> to vector<8x32xf32>
    %478 = arith.addf %476, %477 : vector<8x32xf32>
    %c0_283 = arith.constant 0 : index
    %c0_284 = arith.constant 0 : index
    %c0_285 = arith.constant 0 : index
    %479 = vector.load %arg21[%c0_283, %c0_284, %c0_285] : memref<2x1x32xf32, #tpu.memory_space<vmem>>, vector<1x1x32xf32>
    %480 = vector.shape_cast %479 : vector<1x1x32xf32> to vector<1x32xf32>
    %c1_286 = arith.constant 1 : index
    %c0_287 = arith.constant 0 : index
    %c0_288 = arith.constant 0 : index
    %481 = vector.load %arg21[%c1_286, %c0_287, %c0_288] : memref<2x1x32xf32, #tpu.memory_space<vmem>>, vector<1x1x32xf32>
    %482 = vector.shape_cast %481 : vector<1x1x32xf32> to vector<1x32xf32>
    %cst_289 = arith.constant dense<0.000000e+00> : vector<8xf32>
    %483 = vector.multi_reduction <add>, %478, %cst_289 [1] : vector<8x32xf32> to vector<8xf32>
    %484 = vector.shape_cast %483 : vector<8xf32> to vector<8x1xf32>
    %cst_290 = arith.constant 3.200000e+01 : f32
    %485 = vector.broadcast %cst_290 : f32 to vector<8x1xf32>
    %486 = arith.divf %484, %485 : vector<8x1xf32>
    %487 = vector.broadcast %486 : vector<8x1xf32> to vector<8x32xf32>
    %488 = arith.subf %478, %487 : vector<8x32xf32>
    %489 = arith.mulf %488, %488 : vector<8x32xf32>
    %cst_291 = arith.constant dense<0.000000e+00> : vector<8xf32>
    %490 = vector.multi_reduction <add>, %489, %cst_291 [1] : vector<8x32xf32> to vector<8xf32>
    %491 = vector.shape_cast %490 : vector<8xf32> to vector<8x1xf32>
    %cst_292 = arith.constant 3.200000e+01 : f32
    %492 = vector.broadcast %cst_292 : f32 to vector<8x1xf32>
    %493 = arith.divf %491, %492 : vector<8x1xf32>
    %cst_293 = arith.constant 9.99999974E-6 : f32
    %494 = vector.broadcast %cst_293 : f32 to vector<8x1xf32>
    %495 = arith.addf %493, %494 : vector<8x1xf32>
    %496 = math.rsqrt %495 : vector<8x1xf32>
    %497 = vector.broadcast %496 : vector<8x1xf32> to vector<8x32xf32>
    %498 = arith.mulf %488, %497 : vector<8x32xf32>
    %499 = vector.broadcast %480 : vector<1x32xf32> to vector<8x32xf32>
    %500 = arith.mulf %498, %499 : vector<8x32xf32>
    %501 = vector.broadcast %482 : vector<1x32xf32> to vector<8x32xf32>
    %502 = arith.addf %500, %501 : vector<8x32xf32>
    %c0_294 = arith.constant 0 : index
    %c0_295 = arith.constant 0 : index
    %c0_296 = arith.constant 0 : index
    %c0_297 = arith.constant 0 : index
    %503 = vector.load %arg22[%c0_294, %c0_295, %c0_296, %c0_297] : memref<1x3x32x32xf32, #tpu.memory_space<vmem>>, vector<1x1x32x32xf32>
    %504 = vector.shape_cast %503 : vector<1x1x32x32xf32> to vector<32x32xf32>
    %c0_298 = arith.constant 0 : index
    %c0_299 = arith.constant 0 : index
    %c0_300 = arith.constant 0 : index
    %c0_301 = arith.constant 0 : index
    %505 = vector.load %arg23[%c0_298, %c0_299, %c0_300, %c0_301] : memref<1x3x1x32xf32, #tpu.memory_space<vmem>>, vector<1x1x1x32xf32>
    %506 = vector.shape_cast %505 : vector<1x1x1x32xf32> to vector<1x32xf32>
    %c0_302 = arith.constant 0 : index
    %c1_303 = arith.constant 1 : index
    %c0_304 = arith.constant 0 : index
    %c0_305 = arith.constant 0 : index
    %507 = vector.load %arg22[%c0_302, %c1_303, %c0_304, %c0_305] : memref<1x3x32x32xf32, #tpu.memory_space<vmem>>, vector<1x1x32x32xf32>
    %508 = vector.shape_cast %507 : vector<1x1x32x32xf32> to vector<32x32xf32>
    %c0_306 = arith.constant 0 : index
    %c1_307 = arith.constant 1 : index
    %c0_308 = arith.constant 0 : index
    %c0_309 = arith.constant 0 : index
    %509 = vector.load %arg23[%c0_306, %c1_307, %c0_308, %c0_309] : memref<1x3x1x32xf32, #tpu.memory_space<vmem>>, vector<1x1x1x32xf32>
    %510 = vector.shape_cast %509 : vector<1x1x1x32xf32> to vector<1x32xf32>
    %c0_310 = arith.constant 0 : index
    %c2_311 = arith.constant 2 : index
    %c0_312 = arith.constant 0 : index
    %c0_313 = arith.constant 0 : index
    %511 = vector.load %arg22[%c0_310, %c2_311, %c0_312, %c0_313] : memref<1x3x32x32xf32, #tpu.memory_space<vmem>>, vector<1x1x32x32xf32>
    %512 = vector.shape_cast %511 : vector<1x1x32x32xf32> to vector<32x32xf32>
    %c0_314 = arith.constant 0 : index
    %c2_315 = arith.constant 2 : index
    %c0_316 = arith.constant 0 : index
    %c0_317 = arith.constant 0 : index
    %513 = vector.load %arg23[%c0_314, %c2_315, %c0_316, %c0_317] : memref<1x3x1x32xf32, #tpu.memory_space<vmem>>, vector<1x1x1x32xf32>
    %514 = vector.shape_cast %513 : vector<1x1x1x32xf32> to vector<1x32xf32>
    %c0_318 = arith.constant 0 : index
    %c0_319 = arith.constant 0 : index
    %c0_320 = arith.constant 0 : index
    %c0_321 = arith.constant 0 : index
    %515 = vector.load %arg24[%c0_318, %c0_319, %c0_320, %c0_321] : memref<1x4x8x32xf32, #tpu.memory_space<vmem>>, vector<1x4x8x32xf32>
    %516 = vector.shape_cast %515 : vector<1x4x8x32xf32> to vector<4x8x32xf32>
    %c0_322 = arith.constant 0 : index
    %c0_323 = arith.constant 0 : index
    %c0_324 = arith.constant 0 : index
    %517 = vector.load %arg25[%c0_322, %c0_323, %c0_324] : memref<1x1x32xf32, #tpu.memory_space<vmem>>, vector<1x1x32xf32>
    %518 = vector.shape_cast %517 : vector<1x1x32xf32> to vector<1x32xf32>
    %cst_325 = arith.constant dense<0.000000e+00> : vector<8x32xf32>
    %519 = tpu.matmul %198, %504, %cst_325 {dimension_numbers = #tpu.dot_dimension_numbers<[1], [0], [0], [1], [0, 0, 1, 1], [], []>} : vector<8x32xf32>, vector<32x32xf32>, vector<8x32xf32> -> vector<8x32xf32>
    %520 = vector.broadcast %506 : vector<1x32xf32> to vector<8x32xf32>
    %521 = arith.addf %519, %520 : vector<8x32xf32>
    %cst_326 = arith.constant dense<0.000000e+00> : vector<8x32xf32>
    %522 = tpu.matmul %198, %508, %cst_326 {dimension_numbers = #tpu.dot_dimension_numbers<[1], [0], [0], [1], [0, 0, 1, 1], [], []>} : vector<8x32xf32>, vector<32x32xf32>, vector<8x32xf32> -> vector<8x32xf32>
    %523 = vector.broadcast %510 : vector<1x32xf32> to vector<8x32xf32>
    %524 = arith.addf %522, %523 : vector<8x32xf32>
    %cst_327 = arith.constant dense<0.000000e+00> : vector<8x32xf32>
    %525 = tpu.matmul %198, %512, %cst_327 {dimension_numbers = #tpu.dot_dimension_numbers<[1], [0], [0], [1], [0, 0, 1, 1], [], []>} : vector<8x32xf32>, vector<32x32xf32>, vector<8x32xf32> -> vector<8x32xf32>
    %526 = vector.broadcast %514 : vector<1x32xf32> to vector<8x32xf32>
    %527 = arith.addf %525, %526 : vector<8x32xf32>
    %528 = vector.extract_strided_slice %521 {offsets = [0, 0], sizes = [8, 8], strides = [1, 1]} : vector<8x32xf32> to vector<8x8xf32>
    %529 = vector.extract_strided_slice %521 {offsets = [0, 8], sizes = [8, 8], strides = [1, 1]} : vector<8x32xf32> to vector<8x8xf32>
    %530 = vector.extract_strided_slice %521 {offsets = [0, 16], sizes = [8, 8], strides = [1, 1]} : vector<8x32xf32> to vector<8x8xf32>
    %531 = vector.extract_strided_slice %521 {offsets = [0, 24], sizes = [8, 8], strides = [1, 1]} : vector<8x32xf32> to vector<8x8xf32>
    %532 = vector.shape_cast %528 : vector<8x8xf32> to vector<1x8x8xf32>
    %533 = vector.shape_cast %529 : vector<8x8xf32> to vector<1x8x8xf32>
    %534 = vector.shape_cast %530 : vector<8x8xf32> to vector<1x8x8xf32>
    %535 = vector.shape_cast %531 : vector<8x8xf32> to vector<1x8x8xf32>
    %536 = tpu.concatenate %532, %533, %534, %535 in 0 : vector<1x8x8xf32>, vector<1x8x8xf32>, vector<1x8x8xf32>, vector<1x8x8xf32> -> vector<4x8x8xf32>
    %537 = vector.extract_strided_slice %524 {offsets = [0, 0], sizes = [8, 8], strides = [1, 1]} : vector<8x32xf32> to vector<8x8xf32>
    %538 = vector.extract_strided_slice %524 {offsets = [0, 8], sizes = [8, 8], strides = [1, 1]} : vector<8x32xf32> to vector<8x8xf32>
    %539 = vector.extract_strided_slice %524 {offsets = [0, 16], sizes = [8, 8], strides = [1, 1]} : vector<8x32xf32> to vector<8x8xf32>
    %540 = vector.extract_strided_slice %524 {offsets = [0, 24], sizes = [8, 8], strides = [1, 1]} : vector<8x32xf32> to vector<8x8xf32>
    %541 = vector.shape_cast %537 : vector<8x8xf32> to vector<1x8x8xf32>
    %542 = vector.shape_cast %538 : vector<8x8xf32> to vector<1x8x8xf32>
    %543 = vector.shape_cast %539 : vector<8x8xf32> to vector<1x8x8xf32>
    %544 = vector.shape_cast %540 : vector<8x8xf32> to vector<1x8x8xf32>
    %545 = tpu.concatenate %541, %542, %543, %544 in 0 : vector<1x8x8xf32>, vector<1x8x8xf32>, vector<1x8x8xf32>, vector<1x8x8xf32> -> vector<4x8x8xf32>
    %546 = vector.extract_strided_slice %527 {offsets = [0, 0], sizes = [8, 8], strides = [1, 1]} : vector<8x32xf32> to vector<8x8xf32>
    %547 = vector.extract_strided_slice %527 {offsets = [0, 8], sizes = [8, 8], strides = [1, 1]} : vector<8x32xf32> to vector<8x8xf32>
    %548 = vector.extract_strided_slice %527 {offsets = [0, 16], sizes = [8, 8], strides = [1, 1]} : vector<8x32xf32> to vector<8x8xf32>
    %549 = vector.extract_strided_slice %527 {offsets = [0, 24], sizes = [8, 8], strides = [1, 1]} : vector<8x32xf32> to vector<8x8xf32>
    %550 = vector.shape_cast %546 : vector<8x8xf32> to vector<1x8x8xf32>
    %551 = vector.shape_cast %547 : vector<8x8xf32> to vector<1x8x8xf32>
    %552 = vector.shape_cast %548 : vector<8x8xf32> to vector<1x8x8xf32>
    %553 = vector.shape_cast %549 : vector<8x8xf32> to vector<1x8x8xf32>
    %554 = tpu.concatenate %550, %551, %552, %553 in 0 : vector<1x8x8xf32>, vector<1x8x8xf32>, vector<1x8x8xf32>, vector<1x8x8xf32> -> vector<4x8x8xf32>
    %cst_328 = arith.constant dense<0.000000e+00> : vector<4x8x8xf32>
    %555 = tpu.matmul %536, %545, %cst_328 {dimension_numbers = #tpu.dot_dimension_numbers<[2], [2], [1], [1], [0, 0, 0, 1, 1, 1], [0], [0]>} : vector<4x8x8xf32>, vector<4x8x8xf32>, vector<4x8x8xf32> -> vector<4x8x8xf32>
    %556 = vector.shape_cast %125 : vector<1x1xf32> to vector<1x1x1xf32>
    %557 = vector.broadcast %556 : vector<1x1x1xf32> to vector<4x8x8xf32>
    %558 = arith.mulf %555, %557 : vector<4x8x8xf32>
    %559 = tpu.iota {dimensions = array<i32: 0>} : vector<8x8xi32>
    %560 = tpu.iota {dimensions = array<i32: 1>} : vector<8x8xi32>
    %561 = arith.cmpi sgt, %560, %559 : vector<8x8xi32>
    %cst_329 = arith.constant -1.000000e+30 : f32
    %562 = vector.shape_cast %561 : vector<8x8xi1> to vector<1x8x8xi1>
    %563 = vector.broadcast %562 : vector<1x8x8xi1> to vector<4x8x8xi1>
    %564 = vector.broadcast %cst_329 : f32 to vector<4x8x8xf32>
    %565 = arith.select %563, %564, %558 : vector<4x8x8xi1>, vector<4x8x8xf32>
    %cst_330 = arith.constant dense<0xFF800000> : vector<4x8xf32>
    %566 = vector.multi_reduction <maximumf>, %565, %cst_330 [2] : vector<4x8x8xf32> to vector<4x8xf32>
    %567 = vector.shape_cast %566 : vector<4x8xf32> to vector<4x8x1xf32>
    %568 = vector.broadcast %567 : vector<4x8x1xf32> to vector<4x8x8xf32>
    %569 = arith.subf %565, %568 : vector<4x8x8xf32>
    %570 = math.exp %569 : vector<4x8x8xf32>
    %cst_331 = arith.constant dense<0.000000e+00> : vector<4x8xf32>
    %571 = vector.multi_reduction <add>, %570, %cst_331 [2] : vector<4x8x8xf32> to vector<4x8xf32>
    %572 = vector.shape_cast %571 : vector<4x8xf32> to vector<4x8x1xf32>
    %573 = tpu.reciprocal %572 {approx = true} : vector<4x8x1xf32> -> vector<4x8x1xf32>
    %574 = vector.broadcast %573 : vector<4x8x1xf32> to vector<4x8x8xf32>
    %575 = arith.mulf %570, %574 : vector<4x8x8xf32>
    %cst_332 = arith.constant dense<0.000000e+00> : vector<4x8x8xf32>
    %576 = tpu.matmul %575, %554, %cst_332 {dimension_numbers = #tpu.dot_dimension_numbers<[2], [1], [1], [2], [0, 0, 0, 1, 1, 2], [0], [0]>} : vector<4x8x8xf32>, vector<4x8x8xf32>, vector<4x8x8xf32> -> vector<4x8x8xf32>
    %cst_333 = arith.constant dense<0.000000e+00> : vector<4x8x32xf32>
    %577 = tpu.matmul %576, %516, %cst_333 {dimension_numbers = #tpu.dot_dimension_numbers<[2], [1], [1], [2], [0, 0, 0, 1, 1, 2], [0], [0]>} : vector<4x8x8xf32>, vector<4x8x32xf32>, vector<4x8x32xf32> -> vector<4x8x32xf32>
    %cst_334 = arith.constant dense<0.000000e+00> : vector<8x32xf32>
    %578 = vector.multi_reduction <add>, %577, %cst_334 [0] : vector<4x8x32xf32> to vector<8x32xf32>
    %579 = vector.broadcast %518 : vector<1x32xf32> to vector<8x32xf32>
    %580 = arith.addf %578, %579 : vector<8x32xf32>
    %581 = arith.addf %198, %580 : vector<8x32xf32>
    %c0_335 = arith.constant 0 : index
    %c0_336 = arith.constant 0 : index
    %c0_337 = arith.constant 0 : index
    %c0_338 = arith.constant 0 : index
    %582 = vector.load %arg34[%c0_335, %c0_336, %c0_337, %c0_338] : memref<1x6x1x32xf32, #tpu.memory_space<vmem>>, vector<1x1x1x32xf32>
    %583 = vector.shape_cast %582 : vector<1x1x1x32xf32> to vector<1x32xf32>
    %c0_339 = arith.constant 0 : index
    %c1_340 = arith.constant 1 : index
    %c0_341 = arith.constant 0 : index
    %c0_342 = arith.constant 0 : index
    %584 = vector.load %arg34[%c0_339, %c1_340, %c0_341, %c0_342] : memref<1x6x1x32xf32, #tpu.memory_space<vmem>>, vector<1x1x1x32xf32>
    %585 = vector.shape_cast %584 : vector<1x1x1x32xf32> to vector<1x32xf32>
    %cst_343 = arith.constant dense<0.000000e+00> : vector<8xf32>
    %586 = vector.multi_reduction <add>, %581, %cst_343 [1] : vector<8x32xf32> to vector<8xf32>
    %587 = vector.shape_cast %586 : vector<8xf32> to vector<8x1xf32>
    %cst_344 = arith.constant 3.200000e+01 : f32
    %588 = vector.broadcast %cst_344 : f32 to vector<8x1xf32>
    %589 = arith.divf %587, %588 : vector<8x1xf32>
    %590 = vector.broadcast %589 : vector<8x1xf32> to vector<8x32xf32>
    %591 = arith.subf %581, %590 : vector<8x32xf32>
    %592 = arith.mulf %591, %591 : vector<8x32xf32>
    %cst_345 = arith.constant dense<0.000000e+00> : vector<8xf32>
    %593 = vector.multi_reduction <add>, %592, %cst_345 [1] : vector<8x32xf32> to vector<8xf32>
    %594 = vector.shape_cast %593 : vector<8xf32> to vector<8x1xf32>
    %cst_346 = arith.constant 3.200000e+01 : f32
    %595 = vector.broadcast %cst_346 : f32 to vector<8x1xf32>
    %596 = arith.divf %594, %595 : vector<8x1xf32>
    %cst_347 = arith.constant 9.99999974E-6 : f32
    %597 = vector.broadcast %cst_347 : f32 to vector<8x1xf32>
    %598 = arith.addf %596, %597 : vector<8x1xf32>
    %599 = math.rsqrt %598 : vector<8x1xf32>
    %600 = vector.broadcast %599 : vector<8x1xf32> to vector<8x32xf32>
    %601 = arith.mulf %591, %600 : vector<8x32xf32>
    %602 = vector.broadcast %583 : vector<1x32xf32> to vector<8x32xf32>
    %603 = arith.mulf %601, %602 : vector<8x32xf32>
    %604 = vector.broadcast %585 : vector<1x32xf32> to vector<8x32xf32>
    %605 = arith.addf %603, %604 : vector<8x32xf32>
    %c0_348 = arith.constant 0 : index
    %c0_349 = arith.constant 0 : index
    %c0_350 = arith.constant 0 : index
    %c0_351 = arith.constant 0 : index
    %606 = vector.load %arg26[%c0_348, %c0_349, %c0_350, %c0_351] : memref<1x3x32x32xf32, #tpu.memory_space<vmem>>, vector<1x1x32x32xf32>
    %607 = vector.shape_cast %606 : vector<1x1x32x32xf32> to vector<32x32xf32>
    %c0_352 = arith.constant 0 : index
    %c0_353 = arith.constant 0 : index
    %c0_354 = arith.constant 0 : index
    %c0_355 = arith.constant 0 : index
    %608 = vector.load %arg27[%c0_352, %c0_353, %c0_354, %c0_355] : memref<1x3x1x32xf32, #tpu.memory_space<vmem>>, vector<1x1x1x32xf32>
    %609 = vector.shape_cast %608 : vector<1x1x1x32xf32> to vector<1x32xf32>
    %c0_356 = arith.constant 0 : index
    %c1_357 = arith.constant 1 : index
    %c0_358 = arith.constant 0 : index
    %c0_359 = arith.constant 0 : index
    %610 = vector.load %arg26[%c0_356, %c1_357, %c0_358, %c0_359] : memref<1x3x32x32xf32, #tpu.memory_space<vmem>>, vector<1x1x32x32xf32>
    %611 = vector.shape_cast %610 : vector<1x1x32x32xf32> to vector<32x32xf32>
    %c0_360 = arith.constant 0 : index
    %c1_361 = arith.constant 1 : index
    %c0_362 = arith.constant 0 : index
    %c0_363 = arith.constant 0 : index
    %612 = vector.load %arg27[%c0_360, %c1_361, %c0_362, %c0_363] : memref<1x3x1x32xf32, #tpu.memory_space<vmem>>, vector<1x1x1x32xf32>
    %613 = vector.shape_cast %612 : vector<1x1x1x32xf32> to vector<1x32xf32>
    %c0_364 = arith.constant 0 : index
    %c2_365 = arith.constant 2 : index
    %c0_366 = arith.constant 0 : index
    %c0_367 = arith.constant 0 : index
    %614 = vector.load %arg26[%c0_364, %c2_365, %c0_366, %c0_367] : memref<1x3x32x32xf32, #tpu.memory_space<vmem>>, vector<1x1x32x32xf32>
    %615 = vector.shape_cast %614 : vector<1x1x32x32xf32> to vector<32x32xf32>
    %c0_368 = arith.constant 0 : index
    %c2_369 = arith.constant 2 : index
    %c0_370 = arith.constant 0 : index
    %c0_371 = arith.constant 0 : index
    %616 = vector.load %arg27[%c0_368, %c2_369, %c0_370, %c0_371] : memref<1x3x1x32xf32, #tpu.memory_space<vmem>>, vector<1x1x1x32xf32>
    %617 = vector.shape_cast %616 : vector<1x1x1x32xf32> to vector<1x32xf32>
    %c0_372 = arith.constant 0 : index
    %c0_373 = arith.constant 0 : index
    %c0_374 = arith.constant 0 : index
    %c0_375 = arith.constant 0 : index
    %618 = vector.load %arg28[%c0_372, %c0_373, %c0_374, %c0_375] : memref<1x4x8x32xf32, #tpu.memory_space<vmem>>, vector<1x4x8x32xf32>
    %619 = vector.shape_cast %618 : vector<1x4x8x32xf32> to vector<4x8x32xf32>
    %c0_376 = arith.constant 0 : index
    %c0_377 = arith.constant 0 : index
    %c0_378 = arith.constant 0 : index
    %620 = vector.load %arg29[%c0_376, %c0_377, %c0_378] : memref<1x1x32xf32, #tpu.memory_space<vmem>>, vector<1x1x32xf32>
    %621 = vector.shape_cast %620 : vector<1x1x32xf32> to vector<1x32xf32>
    %cst_379 = arith.constant dense<0.000000e+00> : vector<8x32xf32>
    %622 = tpu.matmul %605, %607, %cst_379 {dimension_numbers = #tpu.dot_dimension_numbers<[1], [0], [0], [1], [0, 0, 1, 1], [], []>} : vector<8x32xf32>, vector<32x32xf32>, vector<8x32xf32> -> vector<8x32xf32>
    %623 = vector.broadcast %609 : vector<1x32xf32> to vector<8x32xf32>
    %624 = arith.addf %622, %623 : vector<8x32xf32>
    %cst_380 = arith.constant dense<0.000000e+00> : vector<8x32xf32>
    %625 = tpu.matmul %502, %611, %cst_380 {dimension_numbers = #tpu.dot_dimension_numbers<[1], [0], [0], [1], [0, 0, 1, 1], [], []>} : vector<8x32xf32>, vector<32x32xf32>, vector<8x32xf32> -> vector<8x32xf32>
    %626 = vector.broadcast %613 : vector<1x32xf32> to vector<8x32xf32>
    %627 = arith.addf %625, %626 : vector<8x32xf32>
    %cst_381 = arith.constant dense<0.000000e+00> : vector<8x32xf32>
    %628 = tpu.matmul %502, %615, %cst_381 {dimension_numbers = #tpu.dot_dimension_numbers<[1], [0], [0], [1], [0, 0, 1, 1], [], []>} : vector<8x32xf32>, vector<32x32xf32>, vector<8x32xf32> -> vector<8x32xf32>
    %629 = vector.broadcast %617 : vector<1x32xf32> to vector<8x32xf32>
    %630 = arith.addf %628, %629 : vector<8x32xf32>
    %631 = vector.extract_strided_slice %624 {offsets = [0, 0], sizes = [8, 8], strides = [1, 1]} : vector<8x32xf32> to vector<8x8xf32>
    %632 = vector.extract_strided_slice %624 {offsets = [0, 8], sizes = [8, 8], strides = [1, 1]} : vector<8x32xf32> to vector<8x8xf32>
    %633 = vector.extract_strided_slice %624 {offsets = [0, 16], sizes = [8, 8], strides = [1, 1]} : vector<8x32xf32> to vector<8x8xf32>
    %634 = vector.extract_strided_slice %624 {offsets = [0, 24], sizes = [8, 8], strides = [1, 1]} : vector<8x32xf32> to vector<8x8xf32>
    %635 = vector.shape_cast %631 : vector<8x8xf32> to vector<1x8x8xf32>
    %636 = vector.shape_cast %632 : vector<8x8xf32> to vector<1x8x8xf32>
    %637 = vector.shape_cast %633 : vector<8x8xf32> to vector<1x8x8xf32>
    %638 = vector.shape_cast %634 : vector<8x8xf32> to vector<1x8x8xf32>
    %639 = tpu.concatenate %635, %636, %637, %638 in 0 : vector<1x8x8xf32>, vector<1x8x8xf32>, vector<1x8x8xf32>, vector<1x8x8xf32> -> vector<4x8x8xf32>
    %640 = vector.extract_strided_slice %627 {offsets = [0, 0], sizes = [8, 8], strides = [1, 1]} : vector<8x32xf32> to vector<8x8xf32>
    %641 = vector.extract_strided_slice %627 {offsets = [0, 8], sizes = [8, 8], strides = [1, 1]} : vector<8x32xf32> to vector<8x8xf32>
    %642 = vector.extract_strided_slice %627 {offsets = [0, 16], sizes = [8, 8], strides = [1, 1]} : vector<8x32xf32> to vector<8x8xf32>
    %643 = vector.extract_strided_slice %627 {offsets = [0, 24], sizes = [8, 8], strides = [1, 1]} : vector<8x32xf32> to vector<8x8xf32>
    %644 = vector.shape_cast %640 : vector<8x8xf32> to vector<1x8x8xf32>
    %645 = vector.shape_cast %641 : vector<8x8xf32> to vector<1x8x8xf32>
    %646 = vector.shape_cast %642 : vector<8x8xf32> to vector<1x8x8xf32>
    %647 = vector.shape_cast %643 : vector<8x8xf32> to vector<1x8x8xf32>
    %648 = tpu.concatenate %644, %645, %646, %647 in 0 : vector<1x8x8xf32>, vector<1x8x8xf32>, vector<1x8x8xf32>, vector<1x8x8xf32> -> vector<4x8x8xf32>
    %649 = vector.extract_strided_slice %630 {offsets = [0, 0], sizes = [8, 8], strides = [1, 1]} : vector<8x32xf32> to vector<8x8xf32>
    %650 = vector.extract_strided_slice %630 {offsets = [0, 8], sizes = [8, 8], strides = [1, 1]} : vector<8x32xf32> to vector<8x8xf32>
    %651 = vector.extract_strided_slice %630 {offsets = [0, 16], sizes = [8, 8], strides = [1, 1]} : vector<8x32xf32> to vector<8x8xf32>
    %652 = vector.extract_strided_slice %630 {offsets = [0, 24], sizes = [8, 8], strides = [1, 1]} : vector<8x32xf32> to vector<8x8xf32>
    %653 = vector.shape_cast %649 : vector<8x8xf32> to vector<1x8x8xf32>
    %654 = vector.shape_cast %650 : vector<8x8xf32> to vector<1x8x8xf32>
    %655 = vector.shape_cast %651 : vector<8x8xf32> to vector<1x8x8xf32>
    %656 = vector.shape_cast %652 : vector<8x8xf32> to vector<1x8x8xf32>
    %657 = tpu.concatenate %653, %654, %655, %656 in 0 : vector<1x8x8xf32>, vector<1x8x8xf32>, vector<1x8x8xf32>, vector<1x8x8xf32> -> vector<4x8x8xf32>
    %cst_382 = arith.constant dense<0.000000e+00> : vector<4x8x8xf32>
    %658 = tpu.matmul %639, %648, %cst_382 {dimension_numbers = #tpu.dot_dimension_numbers<[2], [2], [1], [1], [0, 0, 0, 1, 1, 1], [0], [0]>} : vector<4x8x8xf32>, vector<4x8x8xf32>, vector<4x8x8xf32> -> vector<4x8x8xf32>
    %659 = vector.shape_cast %125 : vector<1x1xf32> to vector<1x1x1xf32>
    %660 = vector.broadcast %659 : vector<1x1x1xf32> to vector<4x8x8xf32>
    %661 = arith.mulf %658, %660 : vector<4x8x8xf32>
    %662 = vector.shape_cast %127 : vector<1x8xf32> to vector<1x1x8xf32>
    %663 = vector.broadcast %662 : vector<1x1x8xf32> to vector<4x8x8xf32>
    %664 = arith.addf %661, %663 : vector<4x8x8xf32>
    %cst_383 = arith.constant dense<0xFF800000> : vector<4x8xf32>
    %665 = vector.multi_reduction <maximumf>, %664, %cst_383 [2] : vector<4x8x8xf32> to vector<4x8xf32>
    %666 = vector.shape_cast %665 : vector<4x8xf32> to vector<4x8x1xf32>
    %667 = vector.broadcast %666 : vector<4x8x1xf32> to vector<4x8x8xf32>
    %668 = arith.subf %664, %667 : vector<4x8x8xf32>
    %669 = math.exp %668 : vector<4x8x8xf32>
    %cst_384 = arith.constant dense<0.000000e+00> : vector<4x8xf32>
    %670 = vector.multi_reduction <add>, %669, %cst_384 [2] : vector<4x8x8xf32> to vector<4x8xf32>
    %671 = vector.shape_cast %670 : vector<4x8xf32> to vector<4x8x1xf32>
    %672 = tpu.reciprocal %671 {approx = true} : vector<4x8x1xf32> -> vector<4x8x1xf32>
    %673 = vector.broadcast %672 : vector<4x8x1xf32> to vector<4x8x8xf32>
    %674 = arith.mulf %669, %673 : vector<4x8x8xf32>
    %cst_385 = arith.constant dense<0.000000e+00> : vector<4x8x8xf32>
    %675 = tpu.matmul %674, %657, %cst_385 {dimension_numbers = #tpu.dot_dimension_numbers<[2], [1], [1], [2], [0, 0, 0, 1, 1, 2], [0], [0]>} : vector<4x8x8xf32>, vector<4x8x8xf32>, vector<4x8x8xf32> -> vector<4x8x8xf32>
    %cst_386 = arith.constant dense<0.000000e+00> : vector<4x8x32xf32>
    %676 = tpu.matmul %675, %619, %cst_386 {dimension_numbers = #tpu.dot_dimension_numbers<[2], [1], [1], [2], [0, 0, 0, 1, 1, 2], [0], [0]>} : vector<4x8x8xf32>, vector<4x8x32xf32>, vector<4x8x32xf32> -> vector<4x8x32xf32>
    %cst_387 = arith.constant dense<0.000000e+00> : vector<8x32xf32>
    %677 = vector.multi_reduction <add>, %676, %cst_387 [0] : vector<4x8x32xf32> to vector<8x32xf32>
    %678 = vector.broadcast %621 : vector<1x32xf32> to vector<8x32xf32>
    %679 = arith.addf %677, %678 : vector<8x32xf32>
    %680 = arith.addf %605, %679 : vector<8x32xf32>
    %c0_388 = arith.constant 0 : index
    %c2_389 = arith.constant 2 : index
    %c0_390 = arith.constant 0 : index
    %c0_391 = arith.constant 0 : index
    %681 = vector.load %arg34[%c0_388, %c2_389, %c0_390, %c0_391] : memref<1x6x1x32xf32, #tpu.memory_space<vmem>>, vector<1x1x1x32xf32>
    %682 = vector.shape_cast %681 : vector<1x1x1x32xf32> to vector<1x32xf32>
    %c0_392 = arith.constant 0 : index
    %c3_393 = arith.constant 3 : index
    %c0_394 = arith.constant 0 : index
    %c0_395 = arith.constant 0 : index
    %683 = vector.load %arg34[%c0_392, %c3_393, %c0_394, %c0_395] : memref<1x6x1x32xf32, #tpu.memory_space<vmem>>, vector<1x1x1x32xf32>
    %684 = vector.shape_cast %683 : vector<1x1x1x32xf32> to vector<1x32xf32>
    %cst_396 = arith.constant dense<0.000000e+00> : vector<8xf32>
    %685 = vector.multi_reduction <add>, %680, %cst_396 [1] : vector<8x32xf32> to vector<8xf32>
    %686 = vector.shape_cast %685 : vector<8xf32> to vector<8x1xf32>
    %cst_397 = arith.constant 3.200000e+01 : f32
    %687 = vector.broadcast %cst_397 : f32 to vector<8x1xf32>
    %688 = arith.divf %686, %687 : vector<8x1xf32>
    %689 = vector.broadcast %688 : vector<8x1xf32> to vector<8x32xf32>
    %690 = arith.subf %680, %689 : vector<8x32xf32>
    %691 = arith.mulf %690, %690 : vector<8x32xf32>
    %cst_398 = arith.constant dense<0.000000e+00> : vector<8xf32>
    %692 = vector.multi_reduction <add>, %691, %cst_398 [1] : vector<8x32xf32> to vector<8xf32>
    %693 = vector.shape_cast %692 : vector<8xf32> to vector<8x1xf32>
    %cst_399 = arith.constant 3.200000e+01 : f32
    %694 = vector.broadcast %cst_399 : f32 to vector<8x1xf32>
    %695 = arith.divf %693, %694 : vector<8x1xf32>
    %cst_400 = arith.constant 9.99999974E-6 : f32
    %696 = vector.broadcast %cst_400 : f32 to vector<8x1xf32>
    %697 = arith.addf %695, %696 : vector<8x1xf32>
    %698 = math.rsqrt %697 : vector<8x1xf32>
    %699 = vector.broadcast %698 : vector<8x1xf32> to vector<8x32xf32>
    %700 = arith.mulf %690, %699 : vector<8x32xf32>
    %701 = vector.broadcast %682 : vector<1x32xf32> to vector<8x32xf32>
    %702 = arith.mulf %700, %701 : vector<8x32xf32>
    %703 = vector.broadcast %684 : vector<1x32xf32> to vector<8x32xf32>
    %704 = arith.addf %702, %703 : vector<8x32xf32>
    %c0_401 = arith.constant 0 : index
    %c0_402 = arith.constant 0 : index
    %c0_403 = arith.constant 0 : index
    %705 = vector.load %arg30[%c0_401, %c0_402, %c0_403] : memref<1x32x64xf32, #tpu.memory_space<vmem>>, vector<1x32x64xf32>
    %706 = vector.shape_cast %705 : vector<1x32x64xf32> to vector<32x64xf32>
    %cst_404 = arith.constant dense<0.000000e+00> : vector<8x64xf32>
    %707 = tpu.matmul %704, %706, %cst_404 {dimension_numbers = #tpu.dot_dimension_numbers<[1], [0], [0], [1], [0, 0, 1, 1], [], []>} : vector<8x32xf32>, vector<32x64xf32>, vector<8x64xf32> -> vector<8x64xf32>
    %c0_405 = arith.constant 0 : index
    %c0_406 = arith.constant 0 : index
    %c0_407 = arith.constant 0 : index
    %708 = vector.load %arg31[%c0_405, %c0_406, %c0_407] : memref<1x1x64xf32, #tpu.memory_space<vmem>>, vector<1x1x64xf32>
    %709 = vector.shape_cast %708 : vector<1x1x64xf32> to vector<1x64xf32>
    %710 = vector.broadcast %709 : vector<1x64xf32> to vector<8x64xf32>
    %711 = arith.addf %707, %710 : vector<8x64xf32>
    %cst_408 = arith.constant 0.000000e+00 : f32
    %712 = vector.broadcast %cst_408 : f32 to vector<8x64xf32>
    %713 = arith.maximumf %711, %712 : vector<8x64xf32>
    %c0_409 = arith.constant 0 : index
    %c0_410 = arith.constant 0 : index
    %c0_411 = arith.constant 0 : index
    %714 = vector.load %arg32[%c0_409, %c0_410, %c0_411] : memref<1x64x32xf32, #tpu.memory_space<vmem>>, vector<1x64x32xf32>
    %715 = vector.shape_cast %714 : vector<1x64x32xf32> to vector<64x32xf32>
    %cst_412 = arith.constant dense<0.000000e+00> : vector<8x32xf32>
    %716 = tpu.matmul %713, %715, %cst_412 {dimension_numbers = #tpu.dot_dimension_numbers<[1], [0], [0], [1], [0, 0, 1, 1], [], []>} : vector<8x64xf32>, vector<64x32xf32>, vector<8x32xf32> -> vector<8x32xf32>
    %c0_413 = arith.constant 0 : index
    %c0_414 = arith.constant 0 : index
    %c0_415 = arith.constant 0 : index
    %717 = vector.load %arg33[%c0_413, %c0_414, %c0_415] : memref<1x1x32xf32, #tpu.memory_space<vmem>>, vector<1x1x32xf32>
    %718 = vector.shape_cast %717 : vector<1x1x32xf32> to vector<1x32xf32>
    %719 = vector.broadcast %718 : vector<1x32xf32> to vector<8x32xf32>
    %720 = arith.addf %716, %719 : vector<8x32xf32>
    %721 = arith.addf %704, %720 : vector<8x32xf32>
    %c0_416 = arith.constant 0 : index
    %c4 = arith.constant 4 : index
    %c0_417 = arith.constant 0 : index
    %c0_418 = arith.constant 0 : index
    %722 = vector.load %arg34[%c0_416, %c4, %c0_417, %c0_418] : memref<1x6x1x32xf32, #tpu.memory_space<vmem>>, vector<1x1x1x32xf32>
    %723 = vector.shape_cast %722 : vector<1x1x1x32xf32> to vector<1x32xf32>
    %c0_419 = arith.constant 0 : index
    %c5 = arith.constant 5 : index
    %c0_420 = arith.constant 0 : index
    %c0_421 = arith.constant 0 : index
    %724 = vector.load %arg34[%c0_419, %c5, %c0_420, %c0_421] : memref<1x6x1x32xf32, #tpu.memory_space<vmem>>, vector<1x1x1x32xf32>
    %725 = vector.shape_cast %724 : vector<1x1x1x32xf32> to vector<1x32xf32>
    %cst_422 = arith.constant dense<0.000000e+00> : vector<8xf32>
    %726 = vector.multi_reduction <add>, %721, %cst_422 [1] : vector<8x32xf32> to vector<8xf32>
    %727 = vector.shape_cast %726 : vector<8xf32> to vector<8x1xf32>
    %cst_423 = arith.constant 3.200000e+01 : f32
    %728 = vector.broadcast %cst_423 : f32 to vector<8x1xf32>
    %729 = arith.divf %727, %728 : vector<8x1xf32>
    %730 = vector.broadcast %729 : vector<8x1xf32> to vector<8x32xf32>
    %731 = arith.subf %721, %730 : vector<8x32xf32>
    %732 = arith.mulf %731, %731 : vector<8x32xf32>
    %cst_424 = arith.constant dense<0.000000e+00> : vector<8xf32>
    %733 = vector.multi_reduction <add>, %732, %cst_424 [1] : vector<8x32xf32> to vector<8xf32>
    %734 = vector.shape_cast %733 : vector<8xf32> to vector<8x1xf32>
    %cst_425 = arith.constant 3.200000e+01 : f32
    %735 = vector.broadcast %cst_425 : f32 to vector<8x1xf32>
    %736 = arith.divf %734, %735 : vector<8x1xf32>
    %cst_426 = arith.constant 9.99999974E-6 : f32
    %737 = vector.broadcast %cst_426 : f32 to vector<8x1xf32>
    %738 = arith.addf %736, %737 : vector<8x1xf32>
    %739 = math.rsqrt %738 : vector<8x1xf32>
    %740 = vector.broadcast %739 : vector<8x1xf32> to vector<8x32xf32>
    %741 = arith.mulf %731, %740 : vector<8x32xf32>
    %742 = vector.broadcast %723 : vector<1x32xf32> to vector<8x32xf32>
    %743 = arith.mulf %741, %742 : vector<8x32xf32>
    %744 = vector.broadcast %725 : vector<1x32xf32> to vector<8x32xf32>
    %745 = arith.addf %743, %744 : vector<8x32xf32>
    %c0_427 = arith.constant 0 : index
    %c0_428 = arith.constant 0 : index
    %c0_429 = arith.constant 0 : index
    %746 = vector.load %arg35[%c0_427, %c0_428, %c0_429] : memref<2x1x32xf32, #tpu.memory_space<vmem>>, vector<1x1x32xf32>
    %747 = vector.shape_cast %746 : vector<1x1x32xf32> to vector<1x32xf32>
    %c1_430 = arith.constant 1 : index
    %c0_431 = arith.constant 0 : index
    %c0_432 = arith.constant 0 : index
    %748 = vector.load %arg35[%c1_430, %c0_431, %c0_432] : memref<2x1x32xf32, #tpu.memory_space<vmem>>, vector<1x1x32xf32>
    %749 = vector.shape_cast %748 : vector<1x1x32xf32> to vector<1x32xf32>
    %cst_433 = arith.constant dense<0.000000e+00> : vector<8xf32>
    %750 = vector.multi_reduction <add>, %745, %cst_433 [1] : vector<8x32xf32> to vector<8xf32>
    %751 = vector.shape_cast %750 : vector<8xf32> to vector<8x1xf32>
    %cst_434 = arith.constant 3.200000e+01 : f32
    %752 = vector.broadcast %cst_434 : f32 to vector<8x1xf32>
    %753 = arith.divf %751, %752 : vector<8x1xf32>
    %754 = vector.broadcast %753 : vector<8x1xf32> to vector<8x32xf32>
    %755 = arith.subf %745, %754 : vector<8x32xf32>
    %756 = arith.mulf %755, %755 : vector<8x32xf32>
    %cst_435 = arith.constant dense<0.000000e+00> : vector<8xf32>
    %757 = vector.multi_reduction <add>, %756, %cst_435 [1] : vector<8x32xf32> to vector<8xf32>
    %758 = vector.shape_cast %757 : vector<8xf32> to vector<8x1xf32>
    %cst_436 = arith.constant 3.200000e+01 : f32
    %759 = vector.broadcast %cst_436 : f32 to vector<8x1xf32>
    %760 = arith.divf %758, %759 : vector<8x1xf32>
    %cst_437 = arith.constant 9.99999974E-6 : f32
    %761 = vector.broadcast %cst_437 : f32 to vector<8x1xf32>
    %762 = arith.addf %760, %761 : vector<8x1xf32>
    %763 = math.rsqrt %762 : vector<8x1xf32>
    %764 = vector.broadcast %763 : vector<8x1xf32> to vector<8x32xf32>
    %765 = arith.mulf %755, %764 : vector<8x32xf32>
    %766 = vector.broadcast %747 : vector<1x32xf32> to vector<8x32xf32>
    %767 = arith.mulf %765, %766 : vector<8x32xf32>
    %768 = vector.broadcast %749 : vector<1x32xf32> to vector<8x32xf32>
    %769 = arith.addf %767, %768 : vector<8x32xf32>
    %c0_438 = arith.constant 0 : index
    %c0_439 = arith.constant 0 : index
    %770 = vector.load %arg36[%c0_438, %c0_439] : memref<32x4xf32, #tpu.memory_space<vmem>>, vector<32x4xf32>
    %cst_440 = arith.constant dense<0.000000e+00> : vector<8x4xf32>
    %771 = tpu.matmul %769, %770, %cst_440 {dimension_numbers = #tpu.dot_dimension_numbers<[1], [0], [0], [1], [0, 0, 1, 1], [], []>} : vector<8x32xf32>, vector<32x4xf32>, vector<8x4xf32> -> vector<8x4xf32>
    %c0_441 = arith.constant 0 : index
    %c0_442 = arith.constant 0 : index
    %772 = vector.load %arg37[%c0_441, %c0_442] : memref<1x4xf32, #tpu.memory_space<vmem>>, vector<1x4xf32>
    %773 = vector.broadcast %772 : vector<1x4xf32> to vector<8x4xf32>
    %774 = arith.addf %771, %773 : vector<8x4xf32>
    %775 = vector.broadcast %15 : vector<1x4xf32> to vector<8x4xf32>
    %776 = arith.mulf %774, %775 : vector<8x4xf32>
    %777 = vector.broadcast %5 : vector<1x4xf32> to vector<8x4xf32>
    %778 = arith.addf %776, %777 : vector<8x4xf32>
    %c0_443 = arith.constant 0 : index
    %c0_444 = arith.constant 0 : index
    %c0_445 = arith.constant 0 : index
    %779 = vector.load %arg38[%c0_443, %c0_444, %c0_445] : memref<1x8x4xf32, #tpu.memory_space<vmem>>, vector<1x8x4xf32>
    %780 = vector.shape_cast %779 : vector<1x8x4xf32> to vector<8x4xf32>
    %781 = vector.shape_cast %778 : vector<8x4xf32> to vector<1x8x4xf32>
    tpu.vector_store %arg38[%c0_443, %c0_444, %c0_445], %781 {strides = array<i32>} : memref<1x8x4xf32, #tpu.memory_space<vmem>>, vector<1x8x4xf32>,
    return
  }
  func.func @transform_0(%arg0: i32) -> (i32, i32, i32) {
    %c0_i32 = arith.constant 0 : i32
    %c0_i32_0 = arith.constant 0 : i32
    %c0_i32_1 = arith.constant 0 : i32
    return %arg0, %c0_i32, %c0_i32_0 : i32, i32, i32
  }
  func.func @transform_1(%arg0: i32) -> (i32, i32) {
    %c0_i32 = arith.constant 0 : i32
    %c0_i32_0 = arith.constant 0 : i32
    %c0_i32_1 = arith.constant 0 : i32
    return %c0_i32, %c0_i32_0 : i32, i32
  }
  func.func @transform_2(%arg0: i32) -> (i32, i32, i32, i32) {
    %c0_i32 = arith.constant 0 : i32
    %c0_i32_0 = arith.constant 0 : i32
    %c0_i32_1 = arith.constant 0 : i32
    %c0_i32_2 = arith.constant 0 : i32
    %c0_i32_3 = arith.constant 0 : i32
    return %c0_i32, %c0_i32_0, %c0_i32_1, %c0_i32_2 : i32, i32, i32, i32
  }
  func.func @transform_3(%arg0: i32) -> (i32, i32, i32) {
    %c0_i32 = arith.constant 0 : i32
    %c0_i32_0 = arith.constant 0 : i32
    %c0_i32_1 = arith.constant 0 : i32
    %c0_i32_2 = arith.constant 0 : i32
    return %c0_i32, %c0_i32_0, %c0_i32_1 : i32, i32, i32
  }
  func.func @transform_4(%arg0: i32) -> (i32, i32, i32) {
    %c0_i32 = arith.constant 0 : i32
    %c0_i32_0 = arith.constant 0 : i32
    %c0_i32_1 = arith.constant 0 : i32
    %c0_i32_2 = arith.constant 0 : i32
    return %c0_i32, %c0_i32_0, %c0_i32_1 : i32, i32, i32
  }
  func.func @transform_5(%arg0: i32) -> (i32, i32, i32) {
    %c0_i32 = arith.constant 0 : i32
    %c0_i32_0 = arith.constant 0 : i32
    %c0_i32_1 = arith.constant 0 : i32
    %c0_i32_2 = arith.constant 0 : i32
    return %c0_i32, %c0_i32_0, %c0_i32_1 : i32, i32, i32
  }
  func.func @transform_6(%arg0: i32) -> (i32, i32, i32) {
    %c0_i32 = arith.constant 0 : i32
    %c0_i32_0 = arith.constant 0 : i32
    %c0_i32_1 = arith.constant 0 : i32
    %c0_i32_2 = arith.constant 0 : i32
    return %c0_i32, %c0_i32_0, %c0_i32_1 : i32, i32, i32
  }
  func.func @transform_7(%arg0: i32) -> (i32, i32, i32) {
    %c0_i32 = arith.constant 0 : i32
    %c0_i32_0 = arith.constant 0 : i32
    %c0_i32_1 = arith.constant 0 : i32
    %c0_i32_2 = arith.constant 0 : i32
    return %c0_i32, %c0_i32_0, %c0_i32_1 : i32, i32, i32
  }
  func.func @transform_8(%arg0: i32) -> (i32, i32, i32) {
    %c0_i32 = arith.constant 0 : i32
    %c0_i32_0 = arith.constant 0 : i32
    %c0_i32_1 = arith.constant 0 : i32
    %c0_i32_2 = arith.constant 0 : i32
    return %c0_i32, %c0_i32_0, %c0_i32_1 : i32, i32, i32
  }
  func.func @transform_9(%arg0: i32) -> (i32, i32) {
    %c0_i32 = arith.constant 0 : i32
    %c0_i32_0 = arith.constant 0 : i32
    %c0_i32_1 = arith.constant 0 : i32
    return %c0_i32, %c0_i32_0 : i32, i32
  }
  func.func @transform_10(%arg0: i32) -> (i32, i32) {
    %c0_i32 = arith.constant 0 : i32
    %c0_i32_0 = arith.constant 0 : i32
    %c0_i32_1 = arith.constant 0 : i32
    return %c0_i32, %c0_i32_0 : i32, i32
  }
  func.func @transform_11(%arg0: i32) -> (i32, i32, i32, i32) {
    %c0_i32 = arith.constant 0 : i32
    %c0_i32_0 = arith.constant 0 : i32
    %c0_i32_1 = arith.constant 0 : i32
    %c0_i32_2 = arith.constant 0 : i32
    %c0_i32_3 = arith.constant 0 : i32
    return %c0_i32, %c0_i32_0, %c0_i32_1, %c0_i32_2 : i32, i32, i32, i32
  }
  func.func @transform_12(%arg0: i32) -> (i32, i32, i32, i32) {
    %c0_i32 = arith.constant 0 : i32
    %c0_i32_0 = arith.constant 0 : i32
    %c0_i32_1 = arith.constant 0 : i32
    %c0_i32_2 = arith.constant 0 : i32
    %c0_i32_3 = arith.constant 0 : i32
    return %c0_i32, %c0_i32_0, %c0_i32_1, %c0_i32_2 : i32, i32, i32, i32
  }
  func.func @transform_13(%arg0: i32) -> (i32, i32, i32, i32) {
    %c0_i32 = arith.constant 0 : i32
    %c0_i32_0 = arith.constant 0 : i32
    %c0_i32_1 = arith.constant 0 : i32
    %c0_i32_2 = arith.constant 0 : i32
    %c0_i32_3 = arith.constant 0 : i32
    return %c0_i32, %c0_i32_0, %c0_i32_1, %c0_i32_2 : i32, i32, i32, i32
  }
  func.func @transform_14(%arg0: i32) -> (i32, i32, i32) {
    %c0_i32 = arith.constant 0 : i32
    %c0_i32_0 = arith.constant 0 : i32
    %c0_i32_1 = arith.constant 0 : i32
    %c0_i32_2 = arith.constant 0 : i32
    return %c0_i32, %c0_i32_0, %c0_i32_1 : i32, i32, i32
  }
  func.func @transform_15(%arg0: i32) -> (i32, i32, i32) {
    %c0_i32 = arith.constant 0 : i32
    %c0_i32_0 = arith.constant 0 : i32
    %c0_i32_1 = arith.constant 0 : i32
    %c0_i32_2 = arith.constant 0 : i32
    return %c0_i32, %c0_i32_0, %c0_i32_1 : i32, i32, i32
  }
  func.func @transform_16(%arg0: i32) -> (i32, i32, i32) {
    %c0_i32 = arith.constant 0 : i32
    %c0_i32_0 = arith.constant 0 : i32
    %c0_i32_1 = arith.constant 0 : i32
    %c0_i32_2 = arith.constant 0 : i32
    return %c0_i32, %c0_i32_0, %c0_i32_1 : i32, i32, i32
  }
  func.func @transform_17(%arg0: i32) -> (i32, i32, i32) {
    %c0_i32 = arith.constant 0 : i32
    %c0_i32_0 = arith.constant 0 : i32
    %c0_i32_1 = arith.constant 0 : i32
    %c0_i32_2 = arith.constant 0 : i32
    return %c0_i32, %c0_i32_0, %c0_i32_1 : i32, i32, i32
  }
  func.func @transform_18(%arg0: i32) -> (i32, i32, i32) {
    %c0_i32 = arith.constant 0 : i32
    %c0_i32_0 = arith.constant 0 : i32
    %c0_i32_1 = arith.constant 0 : i32
    %c0_i32_2 = arith.constant 0 : i32
    return %c0_i32, %c0_i32_0, %c0_i32_1 : i32, i32, i32
  }
  func.func @transform_19(%arg0: i32) -> (i32, i32, i32, i32) {
    %c0_i32 = arith.constant 0 : i32
    %c0_i32_0 = arith.constant 0 : i32
    %c0_i32_1 = arith.constant 0 : i32
    %c0_i32_2 = arith.constant 0 : i32
    %c0_i32_3 = arith.constant 0 : i32
    return %c0_i32, %c0_i32_0, %c0_i32_1, %c0_i32_2 : i32, i32, i32, i32
  }
  func.func @transform_20(%arg0: i32) -> (i32, i32, i32) {
    %c0_i32 = arith.constant 0 : i32
    %c0_i32_0 = arith.constant 0 : i32
    %c0_i32_1 = arith.constant 0 : i32
    %c0_i32_2 = arith.constant 0 : i32
    return %c0_i32, %c0_i32_0, %c0_i32_1 : i32, i32, i32
  }
  func.func @transform_21(%arg0: i32) -> (i32, i32, i32, i32) {
    %c0_i32 = arith.constant 0 : i32
    %c0_i32_0 = arith.constant 0 : i32
    %c0_i32_1 = arith.constant 0 : i32
    %c0_i32_2 = arith.constant 0 : i32
    %c0_i32_3 = arith.constant 0 : i32
    return %c0_i32, %c0_i32_0, %c0_i32_1, %c0_i32_2 : i32, i32, i32, i32
  }
  func.func @transform_22(%arg0: i32) -> (i32, i32, i32, i32) {
    %c0_i32 = arith.constant 0 : i32
    %c0_i32_0 = arith.constant 0 : i32
    %c0_i32_1 = arith.constant 0 : i32
    %c0_i32_2 = arith.constant 0 : i32
    %c0_i32_3 = arith.constant 0 : i32
    return %c0_i32, %c0_i32_0, %c0_i32_1, %c0_i32_2 : i32, i32, i32, i32
  }
  func.func @transform_23(%arg0: i32) -> (i32, i32, i32, i32) {
    %c0_i32 = arith.constant 0 : i32
    %c0_i32_0 = arith.constant 0 : i32
    %c0_i32_1 = arith.constant 0 : i32
    %c0_i32_2 = arith.constant 0 : i32
    %c0_i32_3 = arith.constant 0 : i32
    return %c0_i32, %c0_i32_0, %c0_i32_1, %c0_i32_2 : i32, i32, i32, i32
  }
  func.func @transform_24(%arg0: i32) -> (i32, i32, i32) {
    %c0_i32 = arith.constant 0 : i32
    %c0_i32_0 = arith.constant 0 : i32
    %c0_i32_1 = arith.constant 0 : i32
    %c0_i32_2 = arith.constant 0 : i32
    return %c0_i32, %c0_i32_0, %c0_i32_1 : i32, i32, i32
  }
  func.func @transform_25(%arg0: i32) -> (i32, i32, i32, i32) {
    %c0_i32 = arith.constant 0 : i32
    %c0_i32_0 = arith.constant 0 : i32
    %c0_i32_1 = arith.constant 0 : i32
    %c0_i32_2 = arith.constant 0 : i32
    %c0_i32_3 = arith.constant 0 : i32
    return %c0_i32, %c0_i32_0, %c0_i32_1, %c0_i32_2 : i32, i32, i32, i32
  }
  func.func @transform_26(%arg0: i32) -> (i32, i32, i32, i32) {
    %c0_i32 = arith.constant 0 : i32
    %c0_i32_0 = arith.constant 0 : i32
    %c0_i32_1 = arith.constant 0 : i32
    %c0_i32_2 = arith.constant 0 : i32
    %c0_i32_3 = arith.constant 0 : i32
    return %c0_i32, %c0_i32_0, %c0_i32_1, %c0_i32_2 : i32, i32, i32, i32
  }
  func.func @transform_27(%arg0: i32) -> (i32, i32, i32, i32) {
    %c0_i32 = arith.constant 0 : i32
    %c0_i32_0 = arith.constant 0 : i32
    %c0_i32_1 = arith.constant 0 : i32
    %c0_i32_2 = arith.constant 0 : i32
    %c0_i32_3 = arith.constant 0 : i32
    return %c0_i32, %c0_i32_0, %c0_i32_1, %c0_i32_2 : i32, i32, i32, i32
  }
  func.func @transform_28(%arg0: i32) -> (i32, i32, i32) {
    %c0_i32 = arith.constant 0 : i32
    %c0_i32_0 = arith.constant 0 : i32
    %c0_i32_1 = arith.constant 0 : i32
    %c0_i32_2 = arith.constant 0 : i32
    return %c0_i32, %c0_i32_0, %c0_i32_1 : i32, i32, i32
  }
  func.func @transform_29(%arg0: i32) -> (i32, i32, i32) {
    %c0_i32 = arith.constant 0 : i32
    %c0_i32_0 = arith.constant 0 : i32
    %c0_i32_1 = arith.constant 0 : i32
    %c0_i32_2 = arith.constant 0 : i32
    return %c0_i32, %c0_i32_0, %c0_i32_1 : i32, i32, i32
  }
  func.func @transform_30(%arg0: i32) -> (i32, i32, i32) {
    %c0_i32 = arith.constant 0 : i32
    %c0_i32_0 = arith.constant 0 : i32
    %c0_i32_1 = arith.constant 0 : i32
    %c0_i32_2 = arith.constant 0 : i32
    return %c0_i32, %c0_i32_0, %c0_i32_1 : i32, i32, i32
  }
  func.func @transform_31(%arg0: i32) -> (i32, i32, i32) {
    %c0_i32 = arith.constant 0 : i32
    %c0_i32_0 = arith.constant 0 : i32
    %c0_i32_1 = arith.constant 0 : i32
    %c0_i32_2 = arith.constant 0 : i32
    return %c0_i32, %c0_i32_0, %c0_i32_1 : i32, i32, i32
  }
  func.func @transform_32(%arg0: i32) -> (i32, i32, i32) {
    %c0_i32 = arith.constant 0 : i32
    %c0_i32_0 = arith.constant 0 : i32
    %c0_i32_1 = arith.constant 0 : i32
    %c0_i32_2 = arith.constant 0 : i32
    return %c0_i32, %c0_i32_0, %c0_i32_1 : i32, i32, i32
  }
  func.func @transform_33(%arg0: i32) -> (i32, i32, i32, i32) {
    %c0_i32 = arith.constant 0 : i32
    %c0_i32_0 = arith.constant 0 : i32
    %c0_i32_1 = arith.constant 0 : i32
    %c0_i32_2 = arith.constant 0 : i32
    %c0_i32_3 = arith.constant 0 : i32
    return %c0_i32, %c0_i32_0, %c0_i32_1, %c0_i32_2 : i32, i32, i32, i32
  }
  func.func @transform_34(%arg0: i32) -> (i32, i32, i32) {
    %c0_i32 = arith.constant 0 : i32
    %c0_i32_0 = arith.constant 0 : i32
    %c0_i32_1 = arith.constant 0 : i32
    %c0_i32_2 = arith.constant 0 : i32
    return %c0_i32, %c0_i32_0, %c0_i32_1 : i32, i32, i32
  }
  func.func @transform_35(%arg0: i32) -> (i32, i32) {
    %c0_i32 = arith.constant 0 : i32
    %c0_i32_0 = arith.constant 0 : i32
    %c0_i32_1 = arith.constant 0 : i32
    return %c0_i32, %c0_i32_0 : i32, i32
  }
  func.func @transform_36(%arg0: i32) -> (i32, i32) {
    %c0_i32 = arith.constant 0 : i32
    %c0_i32_0 = arith.constant 0 : i32
    %c0_i32_1 = arith.constant 0 : i32
    return %c0_i32, %c0_i32_0 : i32, i32
  }
  func.func @transform_37(%arg0: i32) -> (i32, i32, i32) {
    %c0_i32 = arith.constant 0 : i32
    %c0_i32_0 = arith.constant 0 : i32
    %c0_i32_1 = arith.constant 0 : i32
    return %arg0, %c0_i32, %c0_i32_0 : i32, i32, i32
  }
}

</mosaic_0001>

<bundles_post_ra>
// kernel: _lambda_.1
= control target key start
LH: loop header
LB: loop body
LE: loop exit
PB: predicated region body
PF: predicated region fallthrough
CT: control target
= control target key end

     0   :  { %s6219_s6 = smov 1   ;;  %s6220_s10 = smov 2   ;;  %s7309_s0 = inlined_call_operand.smem [shape: u32[38], index: -1, kind: input, shape index: {}] }
   0x1   :  { %s6302_s5 = sld [smem:[%s7309_s0]]   ;;  %s6221_s14 = smov 3  }
   0x2   :  { %s6307_s9 = sld [smem:[%s7309_s0 + %s6219_s6]]   ;;  %s6222_s18 = smov 4  }
   0x3   :  { %s6312_s13 = sld [smem:[%s7309_s0 + %s6220_s10]]   ;;  %s6223_s22 = smov 5  }
   0x4   :  { %s6317_s17 = sld [smem:[%s7309_s0 + %s6221_s14]]   ;;  %s6224_s26 = smov 6  }
   0x5   :  { %s6322_s21 = sld [smem:[%s7309_s0 + %s6222_s18]]   ;;  %s6225_s30 = smov 7  }
   0x6   :  { %s6327_s25 = sld [smem:[%s7309_s0 + %s6223_s22]]   ;;  %s6226_s4 = smov 8  }
   0x7   :  { %7346 = sst [smem:[#allocation52_spill]] %s6302_s5  ;;  %s6227_s10 = smov 9  }
   0x8   :  { %7347 = sst [smem:[#allocation53_spill]] %s6307_s9  ;;  %s6228_s15 = smov 10  }
   0x9   :  { %s6332_s29 = sld [smem:[%s7309_s0 + %s6224_s26]]   ;;  %s6229_s20 = smov 11  }
   0xa   :  { %7348 = sst [smem:[#allocation54_spill]] %s6317_s17  ;;  %s6230_s26 = smov 12  }
   0xb   :  { %7349 = sst [smem:[#allocation55_spill]] %s6322_s21  ;;  %s6231_s1 = smov 13  }
   0xc   :  { %7350 = sst [smem:[#allocation56_spill]] %s6327_s25  ;;  %s6232_s7 = smov 14  }
   0xd   :  { %s6337_s3 = sld [smem:[%s7309_s0 + %s6225_s30]]   ;;  %s6234_s22 = smov 16  }
   0xe   :  { %s6342_s8 = sld [smem:[%s7309_s0 + %s6226_s4]]   ;;  %s6235_s28 = smov 17  }
   0xf   :  { %s6347_s14 = sld [smem:[%s7309_s0 + %s6227_s10]]  }
  0x10   :  { %s6352_s19 = sld [smem:[%s7309_s0 + %s6228_s15]]   ;;  %s6233_s15 = smov 15  }
  0x11   :  { %s6357_s24 = sld [smem:[%s7309_s0 + %s6229_s20]]  }
  0x12   :  { %s6362_s30 = sld [smem:[%s7309_s0 + %s6230_s26]]  }
  0x13   :  { %7351 = sst [smem:[#allocation57_spill]] %s6337_s3 }
  0x14   :  { %7352 = sst [smem:[#allocation58_spill]] %s6342_s8 }
  0x15   :  { %7353 = sst [smem:[#allocation59_spill]] %s6347_s14 }
  0x16   :  { %7354 = sst [smem:[#allocation60_spill]] %s6352_s19 }
  0x17   :  { %7355 = sst [smem:[#allocation61_spill]] %s6357_s24 }
  0x18   :  { %s6367_s6 = sld [smem:[%s7309_s0 + %s6231_s1]]  }
  0x19   :  { %s6372_s12 = sld [smem:[%s7309_s0 + %s6232_s7]]   ;;  %s6236_s7 = smov 18  }
  0x1a   :  { %s6377_s20 = sld [smem:[%s7309_s0 + %s6233_s15]]   ;;  %s6237_s15 = smov 19  }
  0x1b   :  { %s6382_s27 = sld [smem:[%s7309_s0 + %s6234_s22]]   ;;  %s6238_s22 = smov 20  }
  0x1c   :  { %s6387_s4 = sld [smem:[%s7309_s0 + %s6235_s28]]   ;;  %s6239_s28 = smov 21  }
  0x1d   :  { %s6392_s14 = sld [smem:[%s7309_s0 + %s6236_s7]]   ;;  %s6240_s7 = smov 22  }
  0x1e   :  { %7356 = sst [smem:[#allocation62_spill]] %s6367_s6 }
  0x1f   :  { %7357 = sst [smem:[#allocation63_spill]] %s6372_s12 }
  0x20   :  { %7358 = sst [smem:[#allocation64_spill]] %s6377_s20 }
  0x21   :  { %s6397_s9 = sld [smem:[%s7309_s0 + %s6237_s15]]   ;;  %s6241_s15 = smov 23  }
  0x22   :  { %7359 = sst [smem:[#allocation65_spill]] %s6387_s4 }
  0x23   :  { %7360 = sst [smem:[#allocation66_spill]] %s6392_s14 }
  0x24   :  { %s6402_s24 = sld [smem:[%s7309_s0 + %s6238_s22]]   ;;  %s6242_s22 = smov 24  }
  0x25   :  { %s6407_s4 = sld [smem:[%s7309_s0 + %s6239_s28]]   ;;  %s6243_s28 = smov 25  }
  0x26   :  { %s6412_s8 = sld [smem:[%s7309_s0 + %s6240_s7]]   ;;  %s6244_s7 = smov 26  }
  0x27   :  { %7361 = sst [smem:[#allocation67_spill]] %s6397_s9 }
  0x28   :  { %s6417_s19 = sld [smem:[%s7309_s0 + %s6241_s15]]   ;;  %s6245_s15 = smov 27  }
  0x29   :  { %s6422_s3 = sld [smem:[%s7309_s0 + %s6242_s22]]   ;;  %s6246_s22 = smov 28  }
  0x2a   :  { %7362 = sst [smem:[#allocation68_spill]] %s6402_s24 }
  0x2b   :  { %7363 = sst [smem:[#allocation69_spill]] %s6407_s4 }
  0x2c   :  { %7364 = sst [smem:[#allocation70_spill]] %s6412_s8 }
  0x2d   :  { %s6427_s21 = sld [smem:[%s7309_s0 + %s6243_s28]]   ;;  %s6247_s28 = smov 29  }
  0x2e   :  { %7365 = sst [smem:[#allocation71_spill]] %s6417_s19 }
  0x2f   :  { %7366 = sst [smem:[#allocation72_spill]] %s6422_s3 }
  0x30   :  { %s6432_s25 = sld [smem:[%s7309_s0 + %s6244_s7]]   ;;  %s6248_s7 = smov 30  }
  0x31   :  { %s6437_s19 = sld [smem:[%s7309_s0 + %s6245_s15]]   ;;  %s6249_s15 = smov 31  }
  0x32   :  { %s6442_s5 = sld [smem:[%s7309_s0 + %s6246_s22]]   ;;  %s6250_s22 = smov 32  }
  0x33   :  { %7367 = sst [smem:[#allocation73_spill]] %s6427_s21 }
  0x34   :  { %s6447_s21 = sld [smem:[%s7309_s0 + %s6247_s28]]   ;;  %s6251_s28 = smov 33  }
  0x35   :  { %s6452_s8 = sld [smem:[%s7309_s0 + %s6248_s7]]   ;;  %s6252_s7 = smov 34  }
  0x36   :  { %s6462_s24 = sld [smem:[%s7309_s0 + %s6250_s22]]   ;;  %s6254_s22 = smov 36  }
  0x37   :  { %7368 = sst [smem:[#allocation74_spill]] %s6437_s19 }
  0x38   :  { %7369 = sst [smem:[#allocation75_spill]] %s6442_s5 }
  0x39   :  { %s6457_s19 = sld [smem:[%s7309_s0 + %s6249_s15]]   ;;  %s6253_s15 = smov 35  }
  0x3a   :  { %7370 = sst [smem:[#allocation76_spill]] %s6447_s21 }
  0x3b   :  { %7371 = sst [smem:[#allocation77_spill]] %s6452_s8 }
  0x3c   :  { %7373 = sst [smem:[#allocation79_spill]] %s6462_s24 }
  0x3d   :  { %s6467_s21 = sld [smem:[%s7309_s0 + %s6251_s28]]   ;;  %s6255_s28 = smov 37  }
  0x3e   :  { %s6472_s14 = sld [smem:[%s7309_s0 + %s6252_s7]]  }
  0x3f   :  { %7372 = sst [smem:[#allocation78_spill]] %s6457_s19 }
  0x40   :  { %s6477_s19 = sld [smem:[%s7309_s0 + %s6253_s15]]  }
  0x41   :  { %s6482_s24 = sld [smem:[%s7309_s0 + %s6254_s22]]  }
  0x42   :  { %s6487_s20 = sld [smem:[%s7309_s0 + %s6255_s28]]  }
  0x43   :  { %80 = vsyncpa [#allocation3], 0 }
  0x44   :  { %81 = vsyncpa [#allocation5], 0 }
  0x45   :  { %82 = vsyncpa [#allocation8], 0 }
  0x46   :  { %83 = vsyncpa [#allocation11], 0 }
  0x47   :  { %84 = vsyncpa [#allocation14], 0 }
  0x48   :  { %85 = vsyncpa [#allocation17], 0 }
  0x49   :  { %86 = vsyncpa [#allocation20], 0 }
  0x4a   :  { %87 = vsyncpa [#allocation23], 0 }
  0x4b   :  { %88 = vsyncpa [#allocation26], 0 }
  0x4c   :  { %89 = vsyncpa [#allocation29], 0 }
  0x4d   :  { %90 = vsyncpa [#allocation32], 0 }
  0x4e   :  { %91 = vsyncpa [#allocation35], 0 }
  0x4f   :  { %92 = vsyncpa [#allocation38], 0  ;;  %s6489_s7 = smov 0  }
  0x50 LB: > { %s7374_s12 = sld [smem:[#allocation63_spill]]  ;;  %s6495_s0 = sadd.s32 4294967295, %s6217_s7   ;;  %s6217_s7 = sphi %s6489_s7, %s98_s7  }
  0x51   : > { %s7375_s9 = sld [smem:[#allocation67_spill]]  ;;  %p4920_p0 = scmp.ge.s32.totalorder %s6217_s7, 1 }
  0x52   : > { %s7376_s6 = sld [smem:[#allocation62_spill]]  ;;  %p911_p1 = scmp.lt.s32.totalorder %s6217_s7, 3 }
  0x53   : > { %s7377_s8 = sld [smem:[#allocation77_spill]] }
  0x54   : > { %s7378_s5 = sld [smem:[#allocation75_spill]]  ;;  %p6499_p2 = pnand %p4920_p0, %p911_p1 }
  0x55   : > { %s7379_s4 = sld [smem:[#allocation69_spill]]  ;;  %p5223_p3 = scmp.eq.s32.totalorder (!%p6499_p2), %s6495_s0, 0 }
  0x56   : > { %s7380_s3 = sld [smem:[#allocation72_spill]]  ;;  %915 = sbr.rel (%p6499_p2) target bundleno = 411 (0x19b), region = 12 }
  0x57   : > { %s7381_s17 = sld [smem:[#allocation54_spill]]  ;;  %s6256_s15 = smov (!%p6499_p2), [#allocation4]  }
  0x58   : > { %s941_s16 = sshll.u32 (!%p6499_p2), %s6256_s15, 4  ;;  %s942_s16 = int_to_ptr.vmem [resolvable:$true] %s941_s16 }
  0x5d   : > { %s939_s11 = sshll.u32 %s7381_s17, 4  ;;  %s5493_s23 = scalar_lea.hbm %s7381_s17, 6  ;;  %s940_s11 = int_to_ptr.hbm [resolvable:$true] %s939_s11 }
  0x5e   : > { %s5487_s18 = sshra.s32 %s940_s11, 4  ;;  %s5488_s18 = int_to_ptr.hbm [resolvable:$true] %s5487_s18 }
  0x5f   : > { %s5489_s22 = scalar_lea.hbm %s5488_s18, 6  ;;  %p5494_p7 = scmp.lt.s32.totalorder %s5488_s18, %s7381_s17 }
  0x60   : > { %p5490_p4 = scmp.ne.s32.totalorder %s5488_s18, %s5489_s22  ;;  %p5495_p8 = scmp.lt.s32.totalorder %s5493_s23, %s5489_s22 }
  0x62   : > { %p5491_p5 = pnand %p5490_p4, %p5223_p3  ;;  %p5496_p9 = por %p5495_p8, %p5494_p7 }
  0x64   : > { %p5492_p6 = pneg %p5491_p5 }
  0x66   : > { %p5497_p10 = pnand %p5496_p9, %p5492_p6 }
  0x68   : > { %5500 = shalt.err (!%p5497_p10)
}
  0x69   : > { %s6257_s26 = smov 32   ;;  %s6258_s28 = smov 2  }
  0x6a   : > { %5130 = dma.hbm_to_vmem [thread:$0]  (%p5223_p3), %s940_s11, 96, %s942_s16, [#allocation5], %s6257_s26, %s6257_s26, %s6258_s28  }
  0x6b   : > { %s988_s1 = sshll.u32 %s6362_s30, 4  ;;  %s6259_s2 = smov [#allocation7]   ;;  %s989_s1 = int_to_ptr.hbm [resolvable:$true] %s988_s1 }
  0x6c   : > { %s990_s15 = sshll.u32 %s6259_s2, 4  ;;  %s1016_s18 = sshll.u32 %s7374_s12, 4  ;;  %s991_s15 = int_to_ptr.vmem [resolvable:$true] %s990_s15  ;;  %s1017_s18 = int_to_ptr.hbm [resolvable:$true] %s1016_s18 }
  0x6d   : > { %s5515_s22 = sshra.s32 %s989_s1, 4  ;;  %s5521_s17 = scalar_lea.hbm %s6362_s30, 6  ;;  %s5516_s22 = int_to_ptr.hbm [resolvable:$true] %s5515_s22 }
  0x6e   : > { %s5517_s23 = scalar_lea.hbm %s5516_s22, 6  ;;  %p5522_p0 = scmp.lt.s32.totalorder %s5516_s22, %s6362_s30 }
  0x6f   : > { %p5518_p11 = scmp.ne.s32.totalorder %s5516_s22, %s5517_s23  ;;  %p5523_p1 = scmp.lt.s32.totalorder %s5521_s17, %s5517_s23 }
  0x71   : > { %p5519_p12 = pnand %p5518_p11, %p5223_p3  ;;  %p5524_p4 = por %p5523_p1, %p5522_p0 }
  0x73   : > { %p5520_p13 = pneg %p5519_p12 }
  0x75   : > { %p5525_p5 = pnand %p5524_p4, %p5520_p13 }
  0x77   : > { %5528 = shalt.err (!%p5525_p5)
}
  0x78   : > { %s7328_s11 = smov 16   ;;  %s7330_s16 = smov 1  }
  0x79   : > { %5134 = dma.hbm_to_vmem [thread:$0]  (%p5223_p3), %s989_s1, 96, %s991_s15, [#allocation8], %s7328_s11, %s7328_s11, %s7330_s16  }
  0x7a   : > { %s6262_s26 = smov [#allocation10]   ;;  %s1044_s2 = sshll.u32 %s6382_s27, 4  ;;  %s6525_s2 = int_to_ptr.hbm [resolvable:$true] %s1044_s2 }
  0x7b   : > { %s1018_s28 = sshll.u32 %s6262_s26, 4  ;;  %s5543_s17 = sshra.s32 %s1017_s18, 4  ;;  %s1019_s28 = int_to_ptr.vmem [resolvable:$true] %s1018_s28  ;;  %s5544_s17 = int_to_ptr.hbm [resolvable:$true] %s5543_s17 }
  0x7c   : > { %s5545_s22 = scalar_lea.hbm %s5544_s17, 2  ;;  %s5549_s23 = scalar_lea.hbm %s7374_s12, 2 }
  0x7d   : > { %p5546_p6 = scmp.ne.s32.totalorder %s5544_s17, %s5545_s22  ;;  %p5550_p9 = scmp.lt.s32.totalorder %s5544_s17, %s7374_s12 }
  0x7e   : > { %p5551_p10 = scmp.lt.s32.totalorder %s5549_s23, %s5545_s22 }
  0x7f   : > { %p5547_p7 = pnand %p5546_p6, %p5223_p3 }
  0x80   : > { %p5552_p11 = por %p5551_p10, %p5550_p9 }
  0x81   : > { %p5548_p8 = pneg %p5547_p7 }
  0x83   : > { %p5553_p12 = pnand %p5552_p11, %p5548_p8 }
  0x85   : > { %5556 = shalt.err (!%p5553_p12)
}
  0x86   : > { %5138 = dma.hbm_to_vmem [thread:$0]  (%p5223_p3), %s1017_s18, 32, %s1019_s28, [#allocation11], %s7328_s11, %s7328_s11, %s7330_s16  }
  0x87   : > { %s1075_s1 = sshll.u32 %s7375_s9, 4  ;;  %s6263_s15 = smov [#allocation13]   ;;  %s6537_s1 = int_to_ptr.hbm [resolvable:$true] %s1075_s1 }
  0x88   : > { %s1046_s26 = sshll.u32 %s6263_s15, 4  ;;  %s5571_s17 = sshra.s32 %s6525_s2, 4  ;;  %s1047_s26 = int_to_ptr.vmem [resolvable:$true] %s1046_s26  ;;  %s5572_s17 = int_to_ptr.hbm [resolvable:$true] %s5571_s17 }
  0x89   : > { %s5573_s22 = scalar_lea.hbm %s5572_s17, 2  ;;  %s5577_s23 = scalar_lea.hbm %s6382_s27, 2 }
  0x8a   : > { %p5574_p13 = scmp.ne.s32.totalorder %s5572_s17, %s5573_s22  ;;  %p5578_p4 = scmp.lt.s32.totalorder %s5572_s17, %s6382_s27 }
  0x8b   : > { %p5579_p5 = scmp.lt.s32.totalorder %s5577_s23, %s5573_s22 }
  0x8c   : > { %p5575_p0 = pnand %p5574_p13, %p5223_p3 }
  0x8d   : > { %p5580_p6 = por %p5579_p5, %p5578_p4 }
  0x8e   : > { %p5576_p1 = pneg %p5575_p0 }
  0x90   : > { %p5581_p7 = pnand %p5580_p6, %p5576_p1 }
  0x92   : > { %5584 = shalt.err (!%p5581_p7)
}
  0x93   : > { %5142 = dma.hbm_to_vmem [thread:$0]  (%p5223_p3), %s6525_s2, 32, %s1047_s26, [#allocation14], %s7328_s11, %s7328_s11, %s7330_s16  }
  0x94   : > { %s6264_s18 = smov [#allocation16]   ;;  %s5599_s15 = sshra.s32 %s6537_s1, 4  ;;  %s5600_s15 = int_to_ptr.hbm [resolvable:$true] %s5599_s15 }
  0x95   : > { %s1077_s28 = sshll.u32 %s6264_s18, 4  ;;  %s5601_s17 = scalar_lea.hbm %s5600_s15, 8  ;;  %s1078_s28 = int_to_ptr.vmem [resolvable:$true] %s1077_s28 }
  0x96   : > { %p5602_p8 = scmp.ne.s32.totalorder %s5600_s15, %s5601_s17  ;;  %s5605_s22 = scalar_lea.hbm %s7375_s9, 8 }
  0x97   : > { %p5606_p11 = scmp.lt.s32.totalorder %s5600_s15, %s7375_s9  ;;  %p5607_p12 = scmp.lt.s32.totalorder %s5605_s22, %s5601_s17 }
  0x98   : > { %p5603_p9 = pnand %p5602_p8, %p5223_p3 }
  0x99   : > { %p5608_p13 = por %p5607_p12, %p5606_p11 }
  0x9a   : > { %p5604_p10 = pneg %p5603_p9 }
  0x9c   : > { %p5609_p0 = pnand %p5608_p13, %p5604_p10 }
  0x9e   : > { %5612 = shalt.err (!%p5609_p0)
}
  0x9f   : > { %5146 = dma.hbm_to_vmem [thread:$0]  (%p5223_p3), %s6537_s1, 128, %s1078_s28, [#allocation17], %s7328_s11, %s7328_s11, %s7330_s16  }
  0xa0   : > { %s1103_s2 = sshll.u32 %s7379_s4, 4  ;;  %s6265_s26 = smov [#allocation19]   ;;  %s1104_s2 = int_to_ptr.hbm [resolvable:$true] %s1103_s2 }
  0xa1   : > { %s1105_s23 = sshll.u32 %s6265_s26, 4  ;;  %s1135_s18 = sshll.u32 %s7380_s3, 4  ;;  %s1106_s23 = int_to_ptr.vmem [resolvable:$true] %s1105_s23  ;;  %s1136_s18 = int_to_ptr.hbm [resolvable:$true] %s1135_s18 }
  0xa2   : > { %s5627_s15 = sshra.s32 %s1104_s2, 4  ;;  %s5633_s22 = scalar_lea.hbm %s7379_s4, 96  ;;  %s5628_s15 = int_to_ptr.hbm [resolvable:$true] %s5627_s15 }
  0xa3   : > { %s5629_s17 = scalar_lea.hbm %s5628_s15, 96  ;;  %p5634_p6 = scmp.lt.s32.totalorder %s5628_s15, %s7379_s4 }
  0xa4   : > { %p5630_p1 = scmp.ne.s32.totalorder %s5628_s15, %s5629_s17  ;;  %p5635_p7 = scmp.lt.s32.totalorder %s5633_s22, %s5629_s17 }
  0xa6   : > { %p5631_p4 = pnand %p5630_p1, %p5223_p3  ;;  %p5636_p8 = por %p5635_p7, %p5634_p6 }
  0xa8   : > { %p5632_p5 = pneg %p5631_p4 }
  0xaa   : > { %p5637_p9 = pnand %p5636_p8, %p5632_p5 }
  0xac   : > { %5640 = shalt.err (!%p5637_p9)
}
  0xad   : > { %s7332_s1 = smov 128   ;;  %s7334_s28 = smov 8  }
  0xae   : > { %5150 = dma.hbm_to_vmem [thread:$0]  (%p5223_p3), %s1104_s2, 1536, %s1106_s23, [#allocation20], %s7332_s1, %s7332_s1, %s7334_s28  }
  0xaf   : > { %s6268_s26 = smov [#allocation22]   ;;  %s1160_s15 = sshll.u32 %s6432_s25, 4  ;;  %s6573_s15 = int_to_ptr.hbm [resolvable:$true] %s1160_s15 }
  0xb0   : > { %s1137_s11 = sshll.u32 %s6268_s26, 4  ;;  %s5655_s17 = sshra.s32 %s1136_s18, 4  ;;  %s1138_s11 = int_to_ptr.vmem [resolvable:$true] %s1137_s11  ;;  %s5656_s17 = int_to_ptr.hbm [resolvable:$true] %s5655_s17 }
  0xb1   : > { %s5657_s22 = scalar_lea.hbm %s5656_s17, 1  ;;  %s5661_s16 = scalar_lea.hbm %s7380_s3, 1 }
  0xb2   : > { %p5658_p10 = scmp.ne.s32.totalorder %s5656_s17, %s5657_s22  ;;  %p5662_p13 = scmp.lt.s32.totalorder %s5656_s17, %s7380_s3 }
  0xb3   : > { %p5663_p0 = scmp.lt.s32.totalorder %s5661_s16, %s5657_s22 }
  0xb4   : > { %p5659_p11 = pnand %p5658_p10, %p5223_p3 }
  0xb5   : > { %p5664_p1 = por %p5663_p0, %p5662_p13 }
  0xb6   : > { %p5660_p12 = pneg %p5659_p11 }
  0xb8   : > { %p5665_p4 = pnand %p5664_p1, %p5660_p12 }
  0xba   : > { %5668 = shalt.err (!%p5665_p4)
}
  0xbb   : > { %5154 = dma.hbm_to_vmem [thread:$0]  (%p5223_p3), %s1136_s18, 16, %s1138_s11, [#allocation23]  }
  0xbc   : > { %s1189_s2 = sshll.u32 %s7378_s5, 4  ;;  %s6269_s23 = smov [#allocation25]   ;;  %s6582_s2 = int_to_ptr.hbm [resolvable:$true] %s1189_s2 }
  0xbd   : > { %s1162_s26 = sshll.u32 %s6269_s23, 4  ;;  %s5683_s1 = sshra.s32 %s6573_s15, 4  ;;  %s1163_s26 = int_to_ptr.vmem [resolvable:$true] %s1162_s26  ;;  %s5684_s1 = int_to_ptr.hbm [resolvable:$true] %s5683_s1 }
  0xbe   : > { %s5685_s16 = scalar_lea.hbm %s5684_s1, 3  ;;  %s5689_s17 = scalar_lea.hbm %s6432_s25, 3 }
  0xbf   : > { %p5686_p5 = scmp.ne.s32.totalorder %s5684_s1, %s5685_s16  ;;  %p5690_p8 = scmp.lt.s32.totalorder %s5684_s1, %s6432_s25 }
  0xc0   : > { %p5691_p9 = scmp.lt.s32.totalorder %s5689_s17, %s5685_s16 }
  0xc1   : > { %p5687_p6 = pnand %p5686_p5, %p5223_p3 }
  0xc2   : > { %p5692_p10 = por %p5691_p9, %p5690_p8 }
  0xc3   : > { %p5688_p7 = pneg %p5687_p6 }
  0xc5   : > { %p5693_p11 = pnand %p5692_p10, %p5688_p7 }
  0xc7   : > { %5696 = shalt.err (!%p5693_p11)
}
  0xc8   : > { %s7383_s11 = smov 1   ;;  %s7384_s18 = smov 16  }
  0xc9   : > { %5158 = dma.hbm_to_vmem [thread:$0]  (%p5223_p3), %s6573_s15, 48, %s1163_s26, [#allocation26], %s7384_s18, %s7384_s18, %s7383_s11  }
  0xca   : > { %s6270_s22 = smov [#allocation28]   ;;  %s1215_s28 = sshll.u32 %s7377_s8, 4  ;;  %s6596_s28 = int_to_ptr.hbm [resolvable:$true] %s1215_s28 }
  0xcb   : > { %s1191_s23 = sshll.u32 %s6270_s22, 4  ;;  %s5711_s1 = sshra.s32 %s6582_s2, 4  ;;  %s1192_s23 = int_to_ptr.vmem [resolvable:$true] %s1191_s23  ;;  %s5712_s1 = int_to_ptr.hbm [resolvable:$true] %s5711_s1 }
  0xcc   : > { %s5713_s16 = scalar_lea.hbm %s5712_s1, 1  ;;  %s5717_s17 = scalar_lea.hbm %s7378_s5, 1 }
  0xcd   : > { %p5714_p12 = scmp.ne.s32.totalorder %s5712_s1, %s5713_s16  ;;  %p5718_p1 = scmp.lt.s32.totalorder %s5712_s1, %s7378_s5 }
  0xce   : > { %p5719_p4 = scmp.lt.s32.totalorder %s5717_s17, %s5713_s16 }
  0xcf   : > { %p5715_p13 = pnand %p5714_p12, %p5223_p3 }
  0xd0   : > { %p5720_p5 = por %p5719_p4, %p5718_p1 }
  0xd1   : > { %p5716_p0 = pneg %p5715_p13 }
  0xd3   : > { %p5721_p6 = pnand %p5720_p5, %p5716_p0 }
  0xd5   : > { %5724 = shalt.err (!%p5721_p6)
}
  0xd6   : > { %5162 = dma.hbm_to_vmem [thread:$0]  (%p5223_p3), %s6582_s2, 16, %s1192_s23, [#allocation29]  }
  0xd7   : > { %s1241_s15 = sshll.u32 %s6467_s21, 4  ;;  %s6271_s26 = smov [#allocation31]   ;;  %s6607_s15 = int_to_ptr.hbm [resolvable:$true] %s1241_s15 }
  0xd8   : > { %s1217_s22 = sshll.u32 %s6271_s26, 4  ;;  %s5739_s1 = sshra.s32 %s6596_s28, 4  ;;  %s1218_s22 = int_to_ptr.vmem [resolvable:$true] %s1217_s22  ;;  %s5740_s1 = int_to_ptr.hbm [resolvable:$true] %s5739_s1 }
  0xd9   : > { %s5741_s16 = scalar_lea.hbm %s5740_s1, 1  ;;  %s5745_s17 = scalar_lea.hbm %s7377_s8, 1 }
  0xda   : > { %p5742_p7 = scmp.ne.s32.totalorder %s5740_s1, %s5741_s16  ;;  %p5746_p10 = scmp.lt.s32.totalorder %s5740_s1, %s7377_s8 }
  0xdb   : > { %p5747_p11 = scmp.lt.s32.totalorder %s5745_s17, %s5741_s16 }
  0xdc   : > { %p5743_p8 = pnand %p5742_p7, %p5223_p3 }
  0xdd   : > { %p5748_p12 = por %p5747_p11, %p5746_p10 }
  0xde   : > { %p5744_p9 = pneg %p5743_p8 }
  0xe0   : > { %p5749_p13 = pnand %p5748_p12, %p5744_p9 }
  0xe2   : > { %5752 = shalt.err (!%p5749_p13)
}
  0xe3   : > { %5166 = dma.hbm_to_vmem [thread:$0]  (%p5223_p3), %s6596_s28, 16, %s1218_s22, [#allocation32]  }
  0xe4   : > { %s6272_s2 = smov [#allocation34]   ;;  %s925_s26 = sshll.u32 %s6312_s13, 4  ;;  %s926_s26 = int_to_ptr.hbm [resolvable:$true] %s925_s26 }
  0xe5   : > { %s1243_s23 = sshll.u32 %s6272_s2, 4  ;;  %s5767_s3 = sshra.s32 %s6607_s15, 4  ;;  %s1244_s23 = int_to_ptr.vmem [resolvable:$true] %s1243_s23  ;;  %s5768_s3 = int_to_ptr.hbm [resolvable:$true] %s5767_s3 }
  0xe6   : > { %s5769_s1 = scalar_lea.hbm %s5768_s3, 6  ;;  %s5773_s16 = scalar_lea.hbm %s6467_s21, 6 }
  0xe7   : > { %p5770_p0 = scmp.ne.s32.totalorder %s5768_s3, %s5769_s1  ;;  %p5774_p5 = scmp.lt.s32.totalorder %s5768_s3, %s6467_s21 }
  0xe8   : > { %p5775_p6 = scmp.lt.s32.totalorder %s5773_s16, %s5769_s1 }
  0xe9   : > { %p5771_p1 = pnand %p5770_p0, %p5223_p3 }
  0xea   : > { %p5776_p7 = por %p5775_p6, %p5774_p5 }
  0xeb   : > { %p5772_p4 = pneg %p5771_p1 }
  0xed   : > { %p5777_p8 = pnand %p5776_p7, %p5772_p4 }
  0xef   : > { %5780 = shalt.err (!%p5777_p8)
}
  0xf0   : > { %5170 = dma.hbm_to_vmem [thread:$0]  (%p5223_p3), %s6607_s15, 96, %s1244_s23, [#allocation35], %s7384_s18, %s7384_s18, %s7383_s11  }
  0xf1   : > { %s6273_s28 = smov [#allocation2]   ;;  %s5795_s17 = sshra.s32 %s926_s26, 4  ;;  %s5796_s17 = int_to_ptr.hbm [resolvable:$true] %s5795_s17 }
  0xf2   : > { %s927_s22 = sshll.u32 %s6273_s28, 4  ;;  %s5797_s3 = scalar_lea.hbm %s5796_s17, 24  ;;  %s928_s22 = int_to_ptr.vmem [resolvable:$true] %s927_s22 }
  0xf3   : > { %p5798_p9 = scmp.ne.s32.totalorder %s5796_s17, %s5797_s3  ;;  %s5801_s2 = scalar_lea.hbm %s6312_s13, 24 }
  0xf4   : > { %p5802_p12 = scmp.lt.s32.totalorder %s5796_s17, %s6312_s13  ;;  %p5803_p13 = scmp.lt.s32.totalorder %s5801_s2, %s5797_s3 }
  0xf5   : > { %p5799_p10 = pnand %p5798_p9, %p5223_p3 }
  0xf6   : > { %p5804_p0 = por %p5803_p13, %p5802_p12 }
  0xf7   : > { %p5800_p11 = pneg %p5799_p10 }
  0xf9   : > { %p5805_p1 = pnand %p5804_p0, %p5800_p11 }
  0xfb   : > { %5808 = shalt.err (!%p5805_p1)
}
  0xfc   : > { %s6274_s1 = smov 64   ;;  %s6275_s15 = smov 4  }
  0xfd   : > { %5128 = dma.hbm_to_vmem [thread:$0]  (%p5223_p3), %s926_s26, 384, %s928_s22, [#allocation3], %s6274_s1, %s6274_s1, %s6275_s15  }
  0xfe   : > { %s959_s23 = sshll.u32 %s6332_s29, 4  ;;  %s6276_s16 = smov [#allocation6]   ;;  %s960_s23 = int_to_ptr.hbm [resolvable:$true] %s959_s23 }
  0xff   : > { %s961_s28 = sshll.u32 %s6276_s16, 4  ;;  %s1002_s17 = sshll.u32 %s7376_s6, 4  ;;  %s962_s28 = int_to_ptr.vmem [resolvable:$true] %s961_s28  ;;  %s1003_s17 = int_to_ptr.hbm [resolvable:$true] %s1002_s17 }
 0x100   : > { %s5823_s3 = sshra.s32 %s960_s23, 4  ;;  %s5829_s4 = scalar_lea.hbm %s6332_s29, 2  ;;  %s5824_s3 = int_to_ptr.hbm [resolvable:$true] %s5823_s3 }
 0x101   : > { %s5825_s2 = scalar_lea.hbm %s5824_s3, 2  ;;  %p5830_p7 = scmp.lt.s32.totalorder %s5824_s3, %s6332_s29 }
 0x102   : > { %p5826_p4 = scmp.ne.s32.totalorder %s5824_s3, %s5825_s2  ;;  %p5831_p8 = scmp.lt.s32.totalorder %s5829_s4, %s5825_s2 }
 0x104   : > { %p5827_p5 = pnand %p5826_p4, %p5223_p3  ;;  %p5832_p9 = por %p5831_p8, %p5830_p7 }
 0x106   : > { %p5828_p6 = pneg %p5827_p5 }
 0x108   : > { %p5833_p10 = pnand %p5832_p9, %p5828_p6 }
 0x10a   : > { %5836 = shalt.err (!%p5833_p10)
}
 0x10b   : > { %s7385_s26 = sld [smem:[#allocation64_spill]]  ;;  %s6277_s22 = smov [#allocation9]  }
 0x10c   : > { %5132 = dma.hbm_to_vmem [thread:$0]  (%p5223_p3), %s960_s23, 32, %s962_s28, [#allocation5], %s7384_s18, %s7384_s18, %s7383_s11  }
 0x10d   : > { %s1004_s1 = sshll.u32 %s6277_s22, 4  ;;  %s5851_s4 = sshra.s32 %s1003_s17, 4  ;;  %s1005_s1 = int_to_ptr.vmem [resolvable:$true] %s1004_s1  ;;  %s5852_s4 = int_to_ptr.hbm [resolvable:$true] %s5851_s4 }
 0x10e   : > { %s5853_s16 = scalar_lea.hbm %s5852_s4, 64  ;;  %s5857_s3 = scalar_lea.hbm %s7376_s6, 64 }
 0x10f   : > { %p5854_p11 = scmp.ne.s32.totalorder %s5852_s4, %s5853_s16  ;;  %p5858_p0 = scmp.lt.s32.totalorder %s5852_s4, %s7376_s6 }
 0x110   : > { %p5859_p1 = scmp.lt.s32.totalorder %s5857_s3, %s5853_s16 }
 0x111   : > { %s1030_s15 = sshll.u32 %s7385_s26, 4  ;;  %p5855_p12 = pnand %p5854_p11, %p5223_p3  ;;  %s6647_s15 = int_to_ptr.hbm [resolvable:$true] %s1030_s15 }
 0x112   : > { %p5860_p4 = por %p5859_p1, %p5858_p0 }
 0x113   : > { %p5856_p13 = pneg %p5855_p12 }
 0x115   : > { %p5861_p5 = pnand %p5860_p4, %p5856_p13 }
 0x117   : > { %5864 = shalt.err (!%p5861_p5)
}
 0x118   : > { %s7386_s23 = smov 8   ;;  %s7387_s28 = smov 128  }
 0x119   : > { %s7388_s2 = sld [smem:[#allocation66_spill]]  ;;  %s6278_s5 = smov [#allocation12]  }
 0x11a   : > { %5136 = dma.hbm_to_vmem [thread:$0]  (%p5223_p3), %s1003_s17, 1024, %s1005_s1, [#allocation8], %s7387_s28, %s7387_s28, %s7386_s23  }
 0x11b   : > { %s1032_s8 = sshll.u32 %s6278_s5, 4  ;;  %s5879_s4 = sshra.s32 %s6647_s15, 4  ;;  %s1033_s8 = int_to_ptr.vmem [resolvable:$true] %s1032_s8  ;;  %s5880_s4 = int_to_ptr.hbm [resolvable:$true] %s5879_s4 }
 0x11c   : > { %s5881_s16 = scalar_lea.hbm %s5880_s4, 64  ;;  %s5885_s3 = scalar_lea.hbm %s7385_s26, 64 }
 0x11d   : > { %p5882_p6 = scmp.ne.s32.totalorder %s5880_s4, %s5881_s16  ;;  %p5886_p9 = scmp.lt.s32.totalorder %s5880_s4, %s7385_s26 }
 0x11e   : > { %p5887_p10 = scmp.lt.s32.totalorder %s5885_s3, %s5881_s16 }
 0x11f   : > { %s1061_s22 = sshll.u32 %s7388_s2, 4  ;;  %p5883_p7 = pnand %p5882_p6, %p5223_p3  ;;  %s6659_s22 = int_to_ptr.hbm [resolvable:$true] %s1061_s22 }
 0x120   : > { %p5888_p11 = por %p5887_p10, %p5886_p9 }
 0x121   : > { %p5884_p8 = pneg %p5883_p7 }
 0x123   : > { %p5889_p12 = pnand %p5888_p11, %p5884_p8 }
 0x125   : > { %5892 = shalt.err (!%p5889_p12)
}
 0x126   : > { %s7389_s5 = sld [smem:[#allocation68_spill]]  ;;  %s6279_s17 = smov [#allocation15]  }
 0x127   : > { %5140 = dma.hbm_to_vmem [thread:$0]  (%p5223_p3), %s6647_s15, 1024, %s1033_s8, [#allocation11], %s7387_s28, %s7387_s28, %s7386_s23  }
 0x128   : > { %s1063_s1 = sshll.u32 %s6279_s17, 4  ;;  %s5907_s4 = sshra.s32 %s6659_s22, 4  ;;  %s1064_s1 = int_to_ptr.vmem [resolvable:$true] %s1063_s1  ;;  %s5908_s4 = int_to_ptr.hbm [resolvable:$true] %s5907_s4 }
 0x129   : > { %s5909_s16 = scalar_lea.hbm %s5908_s4, 2  ;;  %s5913_s3 = scalar_lea.hbm %s7388_s2, 2 }
 0x12a   : > { %p5910_p13 = scmp.ne.s32.totalorder %s5908_s4, %s5909_s16  ;;  %p5914_p4 = scmp.lt.s32.totalorder %s5908_s4, %s7388_s2 }
 0x12b   : > { %p5915_p5 = scmp.lt.s32.totalorder %s5913_s3, %s5909_s16 }
 0x12c   : > { %s1089_s6 = sshll.u32 %s7389_s5, 4  ;;  %p5911_p0 = pnand %p5910_p13, %p5223_p3  ;;  %s6673_s6 = int_to_ptr.hbm [resolvable:$true] %s1089_s6 }
 0x12d   : > { %p5916_p6 = por %p5915_p5, %p5914_p4 }
 0x12e   : > { %p5912_p1 = pneg %p5911_p0 }
 0x130   : > { %p5917_p7 = pnand %p5916_p6, %p5912_p1 }
 0x132   : > { %5920 = shalt.err (!%p5917_p7)
}
 0x133   : > { %s7390_s8 = sld [smem:[#allocation70_spill]]  ;;  %s6280_s17 = smov [#allocation18]  }
 0x134   : > { %5144 = dma.hbm_to_vmem [thread:$0]  (%p5223_p3), %s6659_s22, 32, %s1064_s1, [#allocation14], %s7384_s18, %s7384_s18, %s7383_s11  }
 0x135   : > { %s1091_s9 = sshll.u32 %s6280_s17, 4  ;;  %s5935_s4 = sshra.s32 %s6673_s6, 4  ;;  %s1092_s9 = int_to_ptr.vmem [resolvable:$true] %s1091_s9  ;;  %s5936_s4 = int_to_ptr.hbm [resolvable:$true] %s5935_s4 }
 0x136   : > { %s5937_s16 = scalar_lea.hbm %s5936_s4, 2  ;;  %s5941_s3 = scalar_lea.hbm %s7389_s5, 2 }
 0x137   : > { %p5938_p8 = scmp.ne.s32.totalorder %s5936_s4, %s5937_s16  ;;  %p5942_p11 = scmp.lt.s32.totalorder %s5936_s4, %s7389_s5 }
 0x138   : > { %p5943_p12 = scmp.lt.s32.totalorder %s5941_s3, %s5937_s16 }
 0x139   : > { %s1117_s15 = sshll.u32 %s7390_s8, 4  ;;  %p5939_p9 = pnand %p5938_p8, %p5223_p3  ;;  %s6687_s15 = int_to_ptr.hbm [resolvable:$true] %s1117_s15 }
 0x13a   : > { %p5944_p13 = por %p5943_p12, %p5942_p11 }
 0x13b   : > { %p5940_p10 = pneg %p5939_p9 }
 0x13d   : > { %p5945_p0 = pnand %p5944_p13, %p5940_p10 }
 0x13f   : > { %5948 = shalt.err (!%p5945_p0)
}
 0x140   : > { %s7391_s22 = sld [smem:[#allocation73_spill]]  ;;  %s6281_s1 = smov [#allocation21]  }
 0x141   : > { %5148 = dma.hbm_to_vmem [thread:$0]  (%p5223_p3), %s6673_s6, 32, %s1092_s9, [#allocation17], %s7384_s18, %s7384_s18, %s7383_s11  }
 0x142   : > { %s1119_s17 = sshll.u32 %s6281_s1, 4  ;;  %s5963_s4 = sshra.s32 %s6687_s15, 4  ;;  %s1120_s17 = int_to_ptr.vmem [resolvable:$true] %s1119_s17  ;;  %s5964_s4 = int_to_ptr.hbm [resolvable:$true] %s5963_s4 }
 0x143   : > { %s5965_s16 = scalar_lea.hbm %s5964_s4, 3  ;;  %s5969_s3 = scalar_lea.hbm %s7390_s8, 3 }
 0x144   : > { %p5966_p1 = scmp.ne.s32.totalorder %s5964_s4, %s5965_s16  ;;  %p5970_p6 = scmp.lt.s32.totalorder %s5964_s4, %s7390_s8 }
 0x145   : > { %p5971_p7 = scmp.lt.s32.totalorder %s5969_s3, %s5965_s16 }
 0x146   : > { %s1146_s2 = sshll.u32 %s7391_s22, 4  ;;  %p5967_p4 = pnand %p5966_p1, %p5223_p3  ;;  %s6701_s2 = int_to_ptr.hbm [resolvable:$true] %s1146_s2 }
 0x147   : > { %p5972_p8 = por %p5971_p7, %p5970_p6 }
 0x148   : > { %p5968_p5 = pneg %p5967_p4 }
 0x14a   : > { %p5973_p9 = pnand %p5972_p8, %p5968_p5 }
 0x14c   : > { %5976 = shalt.err (!%p5973_p9)
}
 0x14d   : > { %s7392_s9 = sld [smem:[#allocation74_spill]]  ;;  %s6282_s1 = smov [#allocation24]  }
 0x14e   : > { %5152 = dma.hbm_to_vmem [thread:$0]  (%p5223_p3), %s6687_s15, 48, %s1120_s17, [#allocation20], %s7384_s18, %s7384_s18, %s7383_s11  }
 0x14f   : > { %s1148_s5 = sshll.u32 %s6282_s1, 4  ;;  %s5991_s4 = sshra.s32 %s6701_s2, 4  ;;  %s1149_s5 = int_to_ptr.vmem [resolvable:$true] %s1148_s5  ;;  %s5992_s4 = int_to_ptr.hbm [resolvable:$true] %s5991_s4 }
 0x150   : > { %s5993_s16 = scalar_lea.hbm %s5992_s4, 96  ;;  %s5997_s3 = scalar_lea.hbm %s7391_s22, 96 }
 0x151   : > { %p5994_p10 = scmp.ne.s32.totalorder %s5992_s4, %s5993_s16  ;;  %p5998_p13 = scmp.lt.s32.totalorder %s5992_s4, %s7391_s22 }
 0x152   : > { %p5999_p0 = scmp.lt.s32.totalorder %s5997_s3, %s5993_s16 }
 0x153   : > { %s1174_s6 = sshll.u32 %s7392_s9, 4  ;;  %p5995_p11 = pnand %p5994_p10, %p5223_p3  ;;  %s6715_s6 = int_to_ptr.hbm [resolvable:$true] %s1174_s6 }
 0x154   : > { %p6000_p1 = por %p5999_p0, %p5998_p13 }
 0x155   : > { %p5996_p12 = pneg %p5995_p11 }
 0x157   : > { %p6001_p4 = pnand %p6000_p1, %p5996_p12 }
 0x159   : > { %6004 = shalt.err (!%p6001_p4)
}
 0x15a   : > { %s7393_s15 = sld [smem:[#allocation76_spill]]  ;;  %s6283_s17 = smov [#allocation27]  }
 0x15b   : > { %5156 = dma.hbm_to_vmem [thread:$0]  (%p5223_p3), %s6701_s2, 1536, %s1149_s5, [#allocation23], %s7387_s28, %s7387_s28, %s7386_s23  }
 0x15c   : > { %s1176_s1 = sshll.u32 %s6283_s17, 4  ;;  %s6019_s4 = sshra.s32 %s6715_s6, 4  ;;  %s1177_s1 = int_to_ptr.vmem [resolvable:$true] %s1176_s1  ;;  %s6020_s4 = int_to_ptr.hbm [resolvable:$true] %s6019_s4 }
 0x15d   : > { %s6021_s16 = scalar_lea.hbm %s6020_s4, 32  ;;  %s6025_s3 = scalar_lea.hbm %s7392_s9, 32 }
 0x15e   : > { %p6022_p5 = scmp.ne.s32.totalorder %s6020_s4, %s6021_s16  ;;  %p6026_p8 = scmp.lt.s32.totalorder %s6020_s4, %s7392_s9 }
 0x15f   : > { %p6027_p9 = scmp.lt.s32.totalorder %s6025_s3, %s6021_s16 }
 0x160   : > { %s1200_s8 = sshll.u32 %s7393_s15, 4  ;;  %p6023_p6 = pnand %p6022_p5, %p5223_p3  ;;  %s6729_s8 = int_to_ptr.hbm [resolvable:$true] %s1200_s8 }
 0x161   : > { %p6028_p10 = por %p6027_p9, %p6026_p8 }
 0x162   : > { %p6024_p7 = pneg %p6023_p6 }
 0x164   : > { %p6029_p11 = pnand %p6028_p10, %p6024_p7 }
 0x166   : > { %6032 = shalt.err (!%p6029_p11)
}
 0x167   : > { %s7394_s2 = sld [smem:[#allocation79_spill]]  ;;  %s6284_s17 = smov [#allocation30]  }
 0x168   : > { %5160 = dma.hbm_to_vmem [thread:$0]  (%p5223_p3), %s6715_s6, 512, %s1177_s1, [#allocation26], %s7387_s28, %s7387_s28, %s7386_s23  }
 0x169   : > { %s1202_s12 = sshll.u32 %s6284_s17, 4  ;;  %s6047_s4 = sshra.s32 %s6729_s8, 4  ;;  %s1203_s12 = int_to_ptr.vmem [resolvable:$true] %s1202_s12  ;;  %s6048_s4 = int_to_ptr.hbm [resolvable:$true] %s6047_s4 }
 0x16a   : > { %s6049_s16 = scalar_lea.hbm %s6048_s4, 32  ;;  %s6053_s3 = scalar_lea.hbm %s7393_s15, 32 }
 0x16b   : > { %p6050_p12 = scmp.ne.s32.totalorder %s6048_s4, %s6049_s16  ;;  %p6054_p1 = scmp.lt.s32.totalorder %s6048_s4, %s7393_s15 }
 0x16c   : > { %p6055_p4 = scmp.lt.s32.totalorder %s6053_s3, %s6049_s16 }
 0x16d   : > { %s1230_s5 = sshll.u32 %s7394_s2, 4  ;;  %p6051_p13 = pnand %p6050_p12, %p5223_p3  ;;  %s6743_s5 = int_to_ptr.hbm [resolvable:$true] %s1230_s5 }
 0x16e   : > { %p6056_p5 = por %p6055_p4, %p6054_p1 }
 0x16f   : > { %p6052_p0 = pneg %p6051_p13 }
 0x171   : > { %p6057_p6 = pnand %p6056_p5, %p6052_p0 }
 0x173   : > { %6060 = shalt.err (!%p6057_p6)
}
 0x174   : > { %5164 = dma.hbm_to_vmem [thread:$0]  (%p5223_p3), %s6729_s8, 512, %s1203_s12, [#allocation29], %s7387_s28, %s7387_s28, %s7386_s23  }
 0x175   : > { %s6285_s6 = smov [#allocation33]   ;;  %s1255_s17 = sshll.u32 %s6472_s14, 4  ;;  %s6757_s17 = int_to_ptr.hbm [resolvable:$true] %s1255_s17 }
 0x176   : > { %s1232_s1 = sshll.u32 %s6285_s6, 4  ;;  %s6075_s4 = sshra.s32 %s6743_s5, 4  ;;  %s1233_s1 = int_to_ptr.vmem [resolvable:$true] %s1232_s1  ;;  %s6076_s4 = int_to_ptr.hbm [resolvable:$true] %s6075_s4 }
 0x177   : > { %s6077_s16 = scalar_lea.hbm %s6076_s4, 1  ;;  %s6081_s3 = scalar_lea.hbm %s7394_s2, 1 }
 0x178   : > { %p6078_p7 = scmp.ne.s32.totalorder %s6076_s4, %s6077_s16  ;;  %p6082_p10 = scmp.lt.s32.totalorder %s6076_s4, %s7394_s2 }
 0x179   : > { %p6083_p11 = scmp.lt.s32.totalorder %s6081_s3, %s6077_s16 }
 0x17a   : > { %p6079_p8 = pnand %p6078_p7, %p5223_p3 }
 0x17b   : > { %p6084_p12 = por %p6083_p11, %p6082_p10 }
 0x17c   : > { %p6080_p9 = pneg %p6079_p8 }
 0x17e   : > { %p6085_p13 = pnand %p6084_p12, %p6080_p9 }
 0x180   : > { %6088 = shalt.err (!%p6085_p13)
}
 0x181   : > { %5168 = dma.hbm_to_vmem [thread:$0]  (%p5223_p3), %s6743_s5, 16, %s1233_s1, [#allocation32]  }
 0x182   : > { %s1273_s12 = sshll.u32 %s6482_s24, 4  ;;  %s6286_s23 = smov [#allocation36]   ;;  %s6768_s12 = int_to_ptr.hbm [resolvable:$true] %s1273_s12 }
 0x183   : > { %s1257_s28 = sshll.u32 %s6286_s23, 4  ;;  %s6103_s8 = sshra.s32 %s6757_s17, 4  ;;  %s1258_s28 = int_to_ptr.vmem [resolvable:$true] %s1257_s28  ;;  %s6104_s8 = int_to_ptr.hbm [resolvable:$true] %s6103_s8 }
 0x184   : > { %s6105_s6 = scalar_lea.hbm %s6104_s8, 2  ;;  %s6109_s4 = scalar_lea.hbm %s6472_s14, 2 }
 0x185   : > { %p6106_p0 = scmp.ne.s32.totalorder %s6104_s8, %s6105_s6  ;;  %p6110_p5 = scmp.lt.s32.totalorder %s6104_s8, %s6472_s14 }
 0x186   : > { %p6111_p6 = scmp.lt.s32.totalorder %s6109_s4, %s6105_s6 }
 0x187   : > { %p6107_p1 = pnand %p6106_p0, %p5223_p3 }
 0x188   : > { %p6112_p7 = por %p6111_p6, %p6110_p5 }
 0x189   : > { %p6108_p4 = pneg %p6107_p1 }
 0x18b   : > { %p6113_p8 = pnand %p6112_p7, %p6108_p4 }
 0x18d   : > { %6116 = shalt.err (!%p6113_p8)
}
 0x18e   : > { %5172 = dma.hbm_to_vmem [thread:$0]  (%p5223_p3), %s6757_s17, 32, %s1258_s28, [#allocation35], %s7384_s18, %s7384_s18, %s7383_s11  }
 0x18f   : > { %s6287_s5 = smov [#allocation37]   ;;  %s6131_s16 = sshra.s32 %s6768_s12, 4  ;;  %s6132_s16 = int_to_ptr.hbm [resolvable:$true] %s6131_s16 }
 0x190   : > { %s1275_s1 = sshll.u32 %s6287_s5, 4  ;;  %s6133_s3 = scalar_lea.hbm %s6132_s16, 1  ;;  %s1276_s1 = int_to_ptr.vmem [resolvable:$true] %s1275_s1 }
 0x191   : > { %p6134_p9 = scmp.ne.s32.totalorder %s6132_s16, %s6133_s3  ;;  %s6137_s23 = scalar_lea.hbm %s6482_s24, 1 }
 0x192   : > { %p6138_p12 = scmp.lt.s32.totalorder %s6132_s16, %s6482_s24  ;;  %p6139_p13 = scmp.lt.s32.totalorder %s6137_s23, %s6133_s3 }
 0x193   : > { %p6135_p10 = pnand %p6134_p9, %p5223_p3 }
 0x194   : > { %p6140_p0 = por %p6139_p13, %p6138_p12 }
 0x195   : > { %p6136_p11 = pneg %p6135_p10 }
 0x197   : > { %p6141_p1 = pnand %p6140_p0, %p6136_p11 }
 0x199   : > { %6144 = shalt.err (!%p6141_p1)
}
 0x19a   : > { %5174 = dma.hbm_to_vmem [thread:$0]  (%p5223_p3), %s6768_s12, 16, %s1276_s1, [#allocation38]  }
 0x19b PF: > { %1295 = sbr.rel (%p6499_p2) target bundleno = 7256 (0x1c58), region = 168  ;;  %p5247_p4 = scmp.eq.s32.totalorder (!%p6499_p2), %s6495_s0, 0 }
 0x1a0   : > { %6164 = dma.done.wait (%p5247_p4), [#allocation3], 384  }
 0x1a1   : > { %6166 = vsyncadd (%p5247_p4), [#allocation3], 4294966912 }
 0x1a2   : > { %6168 = dma.done.wait (%p5247_p4), [#allocation5], 128  }
 0x1a3   : > { %6170 = vsyncadd (%p5247_p4), [#allocation5], 4294967168 }
 0x1a4   : > { %6172 = dma.done.wait (%p5247_p4), [#allocation8], 1120  }
 0x1a5   : > { %6174 = vsyncadd (%p5247_p4), [#allocation8], 4294966176 }
 0x1a6   : > { %6176 = dma.done.wait (%p5247_p4), [#allocation11], 1056  }
 0x1a7   : > { %6178 = vsyncadd (%p5247_p4), [#allocation11], 4294966240 }
 0x1a8   : > { %6180 = dma.done.wait (%p5247_p4), [#allocation14], 64  }
 0x1a9   : > { %6182 = vsyncadd (%p5247_p4), [#allocation14], 4294967232 }
 0x1aa   : > { %6184 = dma.done.wait (%p5247_p4), [#allocation17], 160  }
 0x1ab   : > { %6186 = vsyncadd (%p5247_p4), [#allocation17], 4294967136 }
 0x1ac   : > { %6188 = dma.done.wait (%p5247_p4), [#allocation20], 1584  }
 0x1ad   : > { %6190 = vsyncadd (%p5247_p4), [#allocation20], 4294965712 }
 0x1ae   : > { %6192 = dma.done.wait (%p5247_p4), [#allocation23], 1552  }
 0x1af   : > { %6194 = vsyncadd (%p5247_p4), [#allocation23], 4294965744 }
 0x1b0   : > { %6196 = dma.done.wait (%p5247_p4), [#allocation26], 560  }
 0x1b1   : > { %6198 = vsyncadd (%p5247_p4), [#allocation26], 4294966736 }
 0x1b2   : > { %6200 = dma.done.wait (%p5247_p4), [#allocation29], 528  }
 0x1b3   : > { %6202 = vsyncadd (%p5247_p4), [#allocation29], 4294966768 }
 0x1b4   : > { %6204 = dma.done.wait (%p5247_p4), [#allocation32], 32  }
 0x1b5   : > { %6206 = vsyncadd (%p5247_p4), [#allocation32], 4294967264 }
 0x1b6   : > { %6208 = dma.done.wait (%p5247_p4), [#allocation35], 128  }
 0x1b7   : > { %6210 = vsyncadd (%p5247_p4), [#allocation35], 4294967168 }
 0x1b8   : > { %6212 = dma.done.wait (%p5247_p4), [#allocation38], 16  }
 0x1b9   : > { %6214 = vsyncadd (%p5247_p4), [#allocation38], 4294967280  ;;  %s7395_s10 = sld [smem:[#allocation52_spill]]  ;;  %v1564_v0 = vlaneseq  ;;  %p1501_p2 = scmp.lt.s32.totalorder %s6495_s0, 1  ;;  %vm1603_vm0 = vcmask 1043456   ;;  %vm1510_vm2 = vcmask 31744  }
 0x1ba   : > { %v6288_v8 = vmov 0.0   ;;  %v6289_v11 = vmov 8.0   ;;  %s7396_s17 = sld [smem:[#allocation56_spill]]  ;;  %v1652_v37 = vld [vmem:[#allocation4 + $0x2] sm:$0x3]  ;;  %vm1653_vm5 = vcmask 64512  }
 0x1bb   : > { %v6845_v1 = vand.u32 127, %v1564_v0  ;;  %s7408_s0 = smov (!%p1501_p2, %s6495_s0), 1  ;;  %v6850_v2 = vshrl.u32 %v1564_v0, 7  ;;  %5395 = vrcp.f32 %v6289_v11  ;;  %s7397_s12 = sld [smem:[#allocation55_spill]]  ;;  %v1650_v49 = vld [vmem:[#allocation4] sm:$0x3] }
 0x1bc   : > { %s4971_s11 = sshll.u32 %s7408_s0, 3  ;;  %v1701_v51 = vld [vmem:[#allocation4 + $0x4] sm:$0x3]  ;;  %s7398_s28 = sld [smem:[#allocation57_spill]]  ;;  %vm1786_vm14 = vcmask 130048   ;;  %vm2203_vm15 = vcmask 261120  }
 0x1bd   : > { %v1568_v3 = vadd.s32 3, %v6845_v1  ;;  %v1584_v4 = vadd.s32 1, %v6845_v1  ;;  %s7399_s8 = sld [smem:[#allocation60_spill]]  ;;  %s6290_s1 = smov 120  }
 0x1be   : > { %s7400_s6 = sld [smem:[#allocation58_spill]]  ;;  %s6291_s16 = smov 104  }
 0x1bf   : > { %s1504_s18 = scalar_lea.vmem %s7395_s10, %s4971_s11  ;;  %v1573_v5 = vand.u32 3, %v1568_v3  ;;  %v1589_v6 = vand.u32 3, %v1584_v4  ;;  %s7401_s4 = sld [smem:[#allocation61_spill]] }
 0x1c0   : > { %v1509_v7 = vld [vmem:[%s1504_s18] sm:$0xff]  ;;  %s7402_s5 = sld [smem:[#allocation53_spill]]  ;;  %s6292_s23 = smov 112  }
 0x1c1   : > { %vm1581_vm1 = vcmp.eq.s32.totalorder %v6850_v2, %v1573_v5  ;;  %vm1597_vm3 = vcmp.eq.s32.totalorder %v6850_v2, %v1589_v6  ;;  %1672 = vmatpush.msra.mxu2 %v1509_v7  ;;  %v1511_v12 = vsel %vm1510_vm2, %v1509_v7, 0.0  ;;  %v5396_v14 = vpop.eup %5395  ;;  %v1727_v38 = vld [vmem:[%s7396_s17] sm:$0xf]  ;;  %v4988_v54 = vld [vmem:[%s7396_s17 + $0x4] sm:$0xf]  ;;  %s7403_s3 = sld [smem:[#allocation59_spill]] }
 0x1c2   : > { %v4973_v9 = vsel %vm1581_vm1, 1.0, %v6288_v8  ;;  %v4974_v10 = vsel %vm1597_vm3, 1.0, %v6288_v8  ;;  %v1512_v13 = vrot.slane %v1511_v12, 4  ;;  %v1519_v16 = vmul.f32 8.0, %v5396_v14  ;;  %4979 = vmatmul.msk.f32.vlgmr.msra.gmra.mxu2 %vm1653_vm5, %v1652_v37  ;;  %v1726_v53 = vld [vmem:[%s7397_s12] sm:$0xf] }
 0x1c3   : > { %4975 = vmatpush.msk.msra.mxu0 %vm1603_vm0, %v4973_v9  ;;  %4977 = vmatpush.msk.msra.mxu1 %vm1603_vm0, %v4974_v10  ;;  %vm1523_vm4 = vweird.f32 %v5396_v14  ;;  %v4987_v55 = vld [vmem:[%s7397_s12 + $0x4] sm:$0xf]  ;;  %v4994_v62 = vld [vmem:[%s7398_s28 + $0x18] sm:$0xff]  ;;  %v4993_v63 = vld [vmem:[%s7398_s28 + $0x10] sm:$0xff]  ;;  %v1951_v9 = vadd.s32 1, %v6850_v2  ;;  %s7404_s10 = sld [smem:[#allocation65_spill]] }
 0x1c4   : > { %4976 = vmatmul.msk.f32.vlgmr.msra.gmra.mxu0 %vm1510_vm2, %v1509_v7  ;;  %4978 = vmatmul.msk.f32.vlgmr.msra.gmra.mxu1 %vm1510_vm2, %v1509_v7  ;;  %v1513_v15 = vadd.f32 %v1512_v13, %v1511_v12  ;;  %v1520_v18 = vsub.f32 1.0, %v1519_v16  ;;  %v1784_v0 = vld [vmem:[%s7398_s28 + $0x8] sm:$0xff]  ;;  %v1783_v4 = vld [vmem:[%s7398_s28] sm:$0xff]  ;;  %s7405_s18 = sld [smem:[#allocation71_spill]] }
 0x1c5   : > { %4982 = vmatpush.msk.msrb.mxu1 %vm1603_vm0, %v1727_v38  ;;  %4984 = vmatpush.msk.msrb.mxu2 %vm1603_vm0, %v1726_v53  ;;  %v1956_v13 = vand.u32 7, %v1951_v9  ;;  %v2014_v37 = vld [vmem:[#allocation2] sm:$0xf]  ;;  %v2100_v38 = vld [vmem:[#allocation2 + $0xc] sm:$0xf]  ;;  %v5016_v53 = vld [vmem:[%s7401_s4 + $0x30] sm:$0xff] }
 0x1c6   : > { %v1514_v17 = vrot.slane %v1513_v15, 2  ;;  %v1521_v20 = vmul.f32 %v5396_v14, %v1520_v18 }
 0x1c7   : > { %4991 = vmatpush.msk.msra.mxu1 %vm1603_vm0, %v4987_v55  ;;  %1893 = vmatpush.msra.mxu2 %v4994_v62  ;;  %vm1964_vm13 = vcmp.eq.s32.totalorder %v6845_v1, %v1956_v13  ;;  %v2177_v55 = vld [vmem:[%s7401_s4 + $0x8] sm:$0xff] }
 0x1c8   : > { %v1515_v19 = vadd.f32 %v1514_v17, %v1513_v15  ;;  %v1522_v22 = vadd.f32 %v5396_v14, %v1521_v20 }
 0x1c9   : > { %1894 = vmatpush.msra.mxu2 %v4993_v63 }
 0x1ca   : > { %v1516_v21 = vrot.slane %v1515_v19, 1  ;;  %v1524_v24 = vsel %vm1523_vm4, %v5396_v14, %v1522_v22 }
 0x1cc   : > { %v1517_v23 = vadd.f32 %v1516_v21, %v1515_v19  ;;  %v4999_v21 = vsel %vm1964_vm13, 1.0, %v6288_v8 }
 0x1ce   : > { %v6867_v25 = vmul.f32 %v1524_v24, %v1517_v23 }
 0x1d0   : > { %v6870_v26 = vsub.f32 %v1509_v7, %v6867_v25  ;;  %v1935_v7 = vadd.s32 7, %v6850_v2 }
 0x1d2   : > { %v1527_v27 = vmul.f32 %v6870_v26, %v6870_v26  ;;  %v1940_v12 = vand.u32 7, %v1935_v7 }
 0x1d4   : > { %v1528_v28 = vsel %vm1510_vm2, %v1527_v27, 0.0  ;;  %vm1948_vm12 = vcmp.eq.s32.totalorder %v6845_v1, %v1940_v12  ;;  %v1868_v27 = vld [vmem:[#allocation6 + $0x1] sm:$0x1] }
 0x1d5   : > { %v1529_v29 = vrot.slane %v1528_v28, 4  ;;  %v4998_v20 = vsel %vm1948_vm12, 1.0, %v6288_v8 }
 0x1d7   : > { %v1530_v30 = vadd.f32 %v1529_v29, %v1528_v28 }
 0x1d9   : > { %v1531_v31 = vrot.slane %v1530_v30, 2 }
 0x1db   : > { %v1532_v32 = vadd.f32 %v1531_v31, %v1530_v30 }
 0x1dd   : > { %v1533_v33 = vrot.slane %v1532_v32, 1 }
 0x1df   : > { %v1534_v34 = vadd.f32 %v1533_v33, %v1532_v32 }
 0x1e1   : > { %v1535_v35 = vmul.f32 %v1534_v34, %v1524_v24  ;;  %v1909_v34 = vld [vmem:[%s7399_s8 + $0x8] sm:$0xff] }
 0x1e3   : > { %v1536_v36 = vadd.f32 1e-05, %v1535_v35  ;;  %v1908_v35 = vld [vmem:[%s7399_s8] sm:$0xff] }
 0x1e5   : > { %5397 = vrsqrt.f32 %v1536_v36  ;;  %vm1544_vm6 = vcmp.eq.f32.partialorder %v1536_v36, inf  ;;  %v1547_v45 = vand.u32 2147483648, %v1536_v36  ;;  %vm1546_vm7 = vcmp.eq.f32.partialorder %v1536_v36, 0.0 }
 0x1eb   : > { %v5398_v39 = vpop.eup %5397 }
 0x1ec   : > { %v1538_v40 = vmul.f32 %v5398_v39, %v1536_v36 }
 0x1ee   : > { %v1539_v41 = vmul.f32 %v5398_v39, %v1538_v40  ;;  %v2102_v40 = vld [vmem:[#allocation2 + $0x10] sm:$0xf] }
 0x1f0   : > { %v1540_v42 = vmul.f32 0.5, %v1539_v41 }
 0x1f2   : > { %v1541_v43 = vsub.f32 1.5, %v1540_v42  ;;  %v2070_v42 = vld [vmem:[#allocation2 + $0x8] sm:$0xf] }
 0x1f4   : > { %v1542_v44 = vmul.f32 %v5398_v39, %v1541_v43  ;;  %v4995_v43 = vld [vmem:[%s7400_s6 + $0x1] sm:$0x1] }
 0x1f6   : > { %v1543_v46 = vmul.f32 %v1542_v44, %v1536_v36 }
 0x1f8   : > { %v1545_v47 = vsel %vm1544_vm6, %v1536_v36, %v1543_v46  ;;  %v2016_v36 = vld [vmem:[#allocation2 + $0x4] sm:$0xf] }
 0x1f9   : > { %v6878_v48 = vsel %vm1546_vm7, %v1547_v45, %v1545_v47  ;;  %v2150_v47 = vld [vmem:[#allocation2 + $0x14] sm:$0xf]  ;;  %vm2727_vm7 = vcmask 523264  }
 0x1fa   : > { %4983 = vmatmul.msk.f32.vlgmr.msrb.gmra.mxu1 %vm1510_vm2, %v6878_v48  ;;  %5399 = vrcp.f32 %v6878_v48  ;;  %v1560_v6 = vand.u32 2147483648, %v6878_v48  ;;  %vm1554_vm8 = vweird.f32 %v6878_v48  ;;  %v1558_v11 = vand.u32 2147483647, %v6878_v48 }
 0x1fc   : > { %v1561_v15 = vor.u32 1.1754944e-38, %v1560_v6  ;;  %vm1559_vm11 = vcmp.eq.f32.partialorder %v1558_v11, 8.507059e+37  ;;  %v5355_v11 = vld [vmem:[#allocation7 + $0x1] ss:$0 sm:$0xff] }
 0x200   : > { %v5400_v3 = vpop.eup %5399 }
 0x201   : > { %v1550_v5 = vmul.f32 %v5400_v3, %v6878_v48  ;;  %vm1555_vm9 = vweird.f32 %v5400_v3 }
 0x202   : > { %vm1556_vm10 = vmor %vm1554_vm8, %vm1555_vm9 }
 0x203   : > { %v1551_v10 = vsub.f32 1.0, %v1550_v5  ;;  %v6943_v5 = vld [vmem:[%s7402_s5] sm:$0xff]  ;;  %s7406_s5 = sld [smem:[#allocation78_spill]] }
 0x205   : > { %v1552_v14 = vmul.f32 %v5400_v3, %v1551_v10  ;;  %v5354_v10 = vld [vmem:[#allocation7] ss:$0 sm:$0xff] }
 0x207   : > { %v1553_v16 = vadd.f32 %v5400_v3, %v1552_v14 }
 0x209   : > { %v1557_v17 = vsel %vm1556_vm10, %v5400_v3, %v1553_v16 }
 0x20a   : > { %v1562_v18 = vsel %vm1559_vm11, %v1561_v15, %v1557_v17  ;;  %v5356_v17 = vld [vmem:[#allocation7 + $0x2] ss:$0 sm:$0xff]  ;;  %vm3647_vm11 = vcmp.gt.s32.totalorder %v6845_v1, %v6850_v2 }
 0x20b   : > { %v1563_v19 = vmul.f32 %v1562_v18, %v6870_v26  ;;  %v1780_v26 = vld [vmem:[#allocation6] sm:$0x1] }
 0x20d   : > { %2008 = vmatpush.msrb.mxu1 %v1563_v19 }
 0x241   : > { %v1624_v50 = vpop.f32.mrf.mxu0  ;;  %v1647_v52 = vpop.f32.mrf.mxu1 }
 0x242   : > { %1695 = vmatpush.msra.mxu3 %v1624_v50  ;;  %1720 = vmatpush.msrb.mxu0 %v1647_v52  ;;  %v5017_v50 = vld [vmem:[%s7401_s4 + $0x38] sm:$0xff]  ;;  %v2178_v52 = vld [vmem:[%s7401_s4 + $0x10] sm:$0xff] }
 0x243   : > { %4980 = vmatmul.msk.f32.vlgmr.msra.gmra.mxu3 %vm1653_vm5, %v1650_v49  ;;  %4981 = vmatmul.msk.f32.vlgmr.msrb.gmra.mxu0 %vm1653_vm5, %v1701_v51  ;;  %v2179_v49 = vld [vmem:[%s7401_s4 + $0x18] sm:$0xff] }
 0x244   : > { %4989 = vmatpush.msk.msra.mxu0 %vm1603_vm0, %v4988_v54  ;;  %1804 = vmatpush.msrb.mxu3 %v1784_v0  ;;  %v5021_v51 = vld [vmem:[%s7401_s4 + $0x58] sm:$0xff]  ;;  %v5020_v54 = vld [vmem:[%s7401_s4 + $0x50] sm:$0xff] }
 0x245   : > { %v1674_v56 = vpop.f32.mrf.mxu2 }
 0x246   : > { %1805 = vmatpush.msrb.mxu3 %v1783_v4  ;;  %1985 = vmatpush.msrb.mxu0 %v1563_v19 }
 0x248   : > { %1927 = vmatpush.msra.mxu3 %v1909_v34 }
 0x24a   : > { %1928 = vmatpush.msra.mxu3 %v1908_v35 }
 0x24b   : > { %4990 = vmatmul.msk.f32.vlgmr.msra.gmra.mxu0 %vm1510_vm2, %v6867_v25 }
 0x24c   : > { %5006 = vmatpush.msk.msra.mxu0 %vm1603_vm0, %v2070_v42 }
 0x253   : > { %5000 = vmatmul.msk.f32.vlgmr.msrb.gmra.mxu0 %vm1653_vm5, %v4998_v20  ;;  %v1785_v20 = vld [vmem:[%s7400_s6] sm:$0x1] }
 0x254   : > { %2219 = vmatpush.msrb.mxu0 %v2179_v49 }
 0x256   : > { %2220 = vmatpush.msrb.mxu0 %v2178_v52 }
 0x258   : > { %2221 = vmatpush.msrb.mxu0 %v2177_v55 }
 0x277   : > { %v1751_v22 = vpop.f32.mrf.mxu1 }
 0x2c0   : > { %v1722_v58 = vpop.f32.mrf.mxu0 }
 0x2c6   : > { %v1697_v57 = vpop.f32.mrf.mxu3 }
 0x2c7   : > { %v1698_v59 = vadd.f32 %v1697_v57, %v1674_v56  ;;  %v5015_v56 = vld [vmem:[%s7401_s4 + $0x28] sm:$0xff] }
 0x2c8   : > { %v1838_v23 = vpop.f32.mrf.mxu0  ;;  %v5019_v57 = vld [vmem:[%s7401_s4 + $0x48] sm:$0xff] }
 0x2c9   : > { %v1725_v60 = vadd.f32 %v1722_v58, %v1698_v59  ;;  %v2176_v58 = vld [vmem:[%s7401_s4] sm:$0xff] }
 0x2ca   : > { %v5014_v59 = vld [vmem:[%s7401_s4 + $0x20] sm:$0xff]  ;;  %2222 = vmatpush.msrb.mxu0 %v2176_v58 }
 0x2cb   : > { %v1841_v61 = vrot.slane %v1725_v60, 1  ;;  %4985 = vmatmul.msk.f32.vlgmr.msrb.gmra.mxu2 %vm1510_vm2, %v1725_v60  ;;  %v5018_v60 = vld [vmem:[%s7401_s4 + $0x40] sm:$0xff] }
 0x2cc   : > { %5002 = vmatpush.msk.msrb.mxu2 %vm1603_vm0, %v2016_v36 }
 0x2cd   : > { %4992 = vmatmul.msk.f32.vlgmr.msra.gmra.mxu1 %vm1510_vm2, %v1841_v61 }
 0x2ce   : > { %5008 = vmatpush.msk.msra.mxu1 %vm1603_vm0, %v2102_v40 }
 0x2d0   : > { %v1987_v39 = vpop.f32.mrf.mxu0 }
 0x2d5   : > { %5001 = vmatmul.msk.f32.vlgmr.msrb.gmra.mxu1 %vm1653_vm5, %v4999_v21 }
 0x2d6   : > { %2242 = vmatpush.msrb.mxu1 %v5017_v50 }
 0x2d8   : > { %2243 = vmatpush.msrb.mxu1 %v5016_v53 }
 0x2da   : > { %2244 = vmatpush.msrb.mxu1 %v5015_v56 }
 0x2dc   : > { %2245 = vmatpush.msrb.mxu1 %v5014_v59 }
 0x2dd   : > { %5009 = vmatmul.msk.f32.vlgmr.msra.gmra.mxu1 %vm1510_vm2, %v1563_v19 }
 0x34a   : > { %v1864_v24 = vpop.f32.mrf.mxu1 }
 0x34b   : > { %v1865_v28 = vadd.f32 %v1864_v24, %v1838_v23  ;;  %v1900_v23 = vld [vmem:[%s7403_s3] sm:$0x1] }
 0x34d   : > { %v1869_v29 = vadd.f32 %v1868_v27, %v1865_v28 }
 0x34e   : > { %v1777_v30 = vpop.f32.mrf.mxu2 }
 0x34f   : > { %v1870_v31 = vmax.f32 %v1869_v29, 0.0  ;;  %v1778_v32 = vadd.f32 %v1777_v30, %v1751_v22 }
 0x351   : > { %v1781_v8 = vadd.f32 %v1780_v26, %v1778_v32  ;;  %4996 = vmatmul.msk.f32.vlgmr.msra.gmra.mxu2 %vm1786_vm14, %v1870_v31 }
 0x352   : > { %5010 = vmatpush.msk.msra.mxu2 %vm1603_vm0, %v2100_v38  ;;  %v2010_v41 = vpop.f32.mrf.mxu1 }
 0x353   : > { %v1782_v33 = vmax.f32 %v1781_v8, 0.0  ;;  %5007 = vmatmul.msk.f32.vlgmr.msra.gmra.mxu0 %vm1510_vm2, %v2010_v41 }
 0x355   : > { %4986 = vmatmul.msk.f32.vlgmr.msrb.gmra.mxu3 %vm1786_vm14, %v1782_v33 }
 0x356   : > { %5004 = vmatpush.msk.msrb.mxu3 %vm1603_vm0, %v2014_v37 }
 0x359   : > { %5003 = vmatmul.msk.f32.vlgmr.msrb.gmra.mxu2 %vm1510_vm2, %v1563_v19 }
 0x35a   : > { %2265 = vmatpush.msrb.mxu2 %v5021_v51  ;;  %v6954_v9 = vpop.f32.mrf.mxu1 }
 0x35c   : > { %2266 = vmatpush.msrb.mxu2 %v5020_v54 }
 0x35e   : > { %2267 = vmatpush.msrb.mxu2 %v5019_v57 }
 0x360   : > { %2268 = vmatpush.msrb.mxu2 %v5018_v60 }
 0x361   : > { %5011 = vmatmul.msk.f32.vlgmr.msra.gmra.mxu2 %vm1510_vm2, %v1987_v39 }
 0x3d0   : > { %v2094_v3 = vpop.f32.mrf.mxu0 }
 0x3d4   : > { %v1896_v44 = vpop.f32.mrf.mxu2 }
 0x3d5   : > { %v1897_v45 = vadd.f32 %v4995_v43, %v1896_v44 }
 0x3d7   : > { %v1899_v46 = vmax.f32 %v1897_v45, 0.0 }
 0x3d8   : > { %v1807_v61 = vpop.f32.mrf.mxu3 }
 0x3d9   : > { %4997 = vmatmul.msk.f32.vlgmr.msra.gmra.mxu3 %vm1786_vm14, %v1899_v46  ;;  %v1808_v21 = vadd.f32 %v1807_v61, %v1785_v20 }
 0x3da   : > { %5012 = vmatpush.msk.msra.mxu3 %vm1603_vm0, %v2150_v47  ;;  %vm1902_vm0 = vcmask 122880  }
 0x3db   : > { %v1810_v22 = vmax.f32 %v1808_v21, 0.0 }
 0x3dc   : > { %v2040_v63 = vpop.f32.mrf.mxu2 }
 0x3dd   : > { %v1901_v24 = vmul.f32 %v1900_v23, %v1810_v22 }
 0x3df   : > { %v1903_v27 = vsel %vm1902_vm0, %v1901_v24, 0.0 }
 0x3e1   : > { %5005 = vmatmul.msk.f32.vlgmr.msrb.gmra.mxu3 %vm1510_vm2, %v1987_v39 }
 0x3e4   : > { %v6956_v12 = vpop.f32.mrf.mxu2 }
 0x3e9   : > { %5013 = vmatmul.msk.f32.vlgmr.msra.gmra.mxu3 %vm1510_vm2, %v2010_v41 }
 0x45c   : > { %v1930_v62 = vpop.f32.mrf.mxu3 }
 0x45d   : > { %v1934_v36 = vmul.f32 0.35355338, %v1930_v62 }
 0x45f   : > { %v6981_v40 = vperm.slane %v1934_v36, 0  ;;  %v2195_v36 = vld [vmem:[#allocation9] sm:$0xff] }
 0x464   : > { %v2066_v0 = vpop.f32.mrf.mxu3 }
 0x465   : > { %v2067_v4 = vadd.f32 %v2066_v0, %v2040_v63 }
 0x467   : > { %v2097_v6 = vadd.f32 %v2094_v3, %v2067_v4 }
 0x469   : > { %v6946_v7 = vadd.f32 %v2097_v6, %v6943_v5 }
 0x46b   : > { %5022 = vmatmul.msk.f32.vlgmr.msrb.gmra.mxu0 %vm2203_vm15, %v6946_v7  ;;  %5023 = vmatmul.msk.f32.vlgmr.msrb.gmra.mxu1 %vm2203_vm15, %v6946_v7 }
 0x46c   : > { %5024 = vmatmul.msk.f32.vlgmr.msrb.gmra.mxu2 %vm2203_vm15, %v6946_v7  ;;  %v6977_v34 = vpop.f32.mrf.mxu3 }
 0x4e8   : > { %v2224_v13 = vpop.f32.mrf.mxu0  ;;  %v2247_v14 = vpop.f32.mrf.mxu1 }
 0x4e9   : > { %v2225_v15 = vadd.f32 %v5354_v10, %v2224_v13  ;;  %v2248_v16 = vadd.f32 %v5355_v11, %v2247_v14 }
 0x4eb   : > { %2281 = vrot.lane.b32.xlu1 %v2248_v16, %s6290_s1  ;;  %2285 = vrot.lane.b32.xlu0 %v2248_v16, %s6291_s16 }
 0x4ec   : > { %5025 = vmatpush.xpose.msk.msrb.mxu3 %vm1653_vm5, %v2248_v16  ;;  %2274 = vrot.lane.b32.xlu2 %v2225_v15, %s6290_s1 }
 0x4ef   : > { %v2270_v18 = vpop.f32.mrf.mxu2  ;;  %5026 = vmatmul.msk.f32.vlgmr.msrb.gmra.mxu3 %vm1653_vm5, %v2225_v15 }
 0x4f0   : > { %v6963_v19 = vadd.f32 %v5356_v17, %v2270_v18 }
 0x4f2   : > { %2465 = vmatpush.msra.mxu3 %v6963_v19 }
 0x4f3   : > { %2283 = vrot.lane.b32.xlu1 %v2248_v16, %s6292_s23  ;;  %2278 = vrot.lane.b32.xlu0 %v2225_v15, %s6291_s16 }
 0x4f4   : > { %2276 = vrot.lane.b32.xlu2 %v2225_v15, %s6292_s23  ;;  %2557 = vmatpush.msrb.mxu3 %v2195_v36 }
 0x51d   : > { %1904 = vadd.xlane.f32.xlu0 %v1903_v27 }
 0x546   : > { %v2275_v30 = vpop.permute.xlu2 %2274 }
 0x54e   : > { %v2277_v32 = vpop.permute.xlu2 %2276 }
 0x55d   : > { %v2282_v28 = vpop.permute.xlu1 %2281  ;;  %v2286_v29 = vpop.permute.xlu0 %2285 }
 0x55e   : > { %5027 = vmatpush.xpose.msk.msra.mxu0 %vm1653_vm5, %v2282_v28  ;;  %5031 = vmatpush.xpose.msk.msra.mxu2 %vm1653_vm5, %v2286_v29 }
 0x561   : > { %5028 = vmatmul.msk.f32.vlgmr.msra.gmra.mxu0 %vm1653_vm5, %v2275_v30 }
 0x565   : > { %v2284_v26 = vpop.permute.xlu1 %2283  ;;  %v2279_v31 = vpop.permute.xlu0 %2278 }
 0x566   : > { %5029 = vmatpush.xpose.msk.msra.mxu1 %vm1653_vm5, %v2284_v26  ;;  %5032 = vmatmul.msk.f32.vlgmr.msra.gmra.mxu2 %vm1653_vm5, %v2279_v31 }
 0x569   : > { %5030 = vmatmul.msk.f32.vlgmr.msra.gmra.mxu1 %vm1653_vm5, %v2277_v32 }
 0x572   : > { %v2318_v39 = vpop.f32.mrf.mxu3 }
 0x590   : > { %v1905_v8 = vpop.xlane.xlu0 %1904 }
 0x591   : > { %v1906_v33 = vmul.f32 1.442695, %v1905_v8 }
 0x593   : > { %5401 = vpow2.f32 %v1906_v33 }
 0x599   : > { %v5402_v35 = vpop.eup %5401 }
 0x59a   : > { %v1933_v37 = vmul.f32 0.35355338, %v5402_v35 }
 0x59c   : > { %v6979_v38 = vperm.slane %v1933_v37, 0 }
 0x59e   : > { %v2394_v41 = vmul.f32 %v6979_v38, %v2318_v39  ;;  %v2197_v39 = vld [vmem:[#allocation9 + $0x10] sm:$0xff] }
 0x5a0   : > { %v2399_v42 = vadd.f32 %v6981_v40, %v2394_v41  ;;  %v2198_v41 = vld [vmem:[#allocation9 + $0x18] sm:$0xff] }
 0x5a2   : > { %v2403_v43 = vsel %vm1653_vm5, %v2399_v42, -inf }
 0x5a3   : > { %2404 = vmax.xlane.f32.xlu1 %v2403_v43 }
 0x5de   : > { %v2342_v50 = vpop.f32.mrf.mxu0 }
 0x5df   : > { %v2395_v53 = vmul.f32 %v6979_v38, %v2342_v50 }
 0x5e1   : > { %v2400_v55 = vadd.f32 %v6981_v40, %v2395_v53 }
 0x5e3   : > { %v2406_v56 = vsel %vm1653_vm5, %v2400_v55, -inf }
 0x5e6   : > { %v2366_v44 = vpop.f32.mrf.mxu1 }
 0x5e7   : > { %v2396_v45 = vmul.f32 %v6979_v38, %v2366_v44 }
 0x5e9   : > { %v2390_v46 = vpop.f32.mrf.mxu2  ;;  %v2401_v47 = vadd.f32 %v6981_v40, %v2396_v45 }
 0x5ea   : > { %v2397_v49 = vmul.f32 %v6979_v38, %v2390_v46 }
 0x5eb   : > { %v2409_v51 = vsel %vm1653_vm5, %v2401_v47, -inf }
 0x5ec   : > { %2410 = vmax.xlane.f32.xlu0 %v2409_v51  ;;  %v2402_v52 = vadd.f32 %v6981_v40, %v2397_v49 }
 0x5ee   : > { %v2412_v54 = vsel %vm1653_vm5, %v2402_v52, -inf }
 0x5ef   : > { %2413 = vmax.xlane.f32.xlu2 %v2412_v54 }
 0x5f7   : > { %2407 = vmax.xlane.f32.xlu2 %v2406_v56  ;;  %v5357_v56 = vld [vmem:[#allocation10] ss:$0 sm:$0xff] }
 0x616   : > { %v2405_v57 = vpop.xlane.xlu1 %2404 }
 0x617   : > { %v2415_v58 = vsub.f32 %v2399_v42, %v2405_v57  ;;  %v2196_v42 = vld [vmem:[#allocation9 + $0x8] sm:$0xff] }
 0x619   : > { %v2419_v59 = vmul.f32 1.442695, %v2415_v58 }
 0x61b   : > { %5403 = vpow2.f32 %v2419_v59 }
 0x621   : > { %v5404_v60 = vpop.eup %5403 }
 0x622   : > { %v2427_v61 = vsel %vm1653_vm5, %v5404_v60, 0.0 }
 0x623   : > { %2428 = vadd.xlane.f32.xlu1 %v2427_v61 }
 0x63c   : > { %2294 = vrot.lane.b32.xlu1 %v6963_v19, %s6291_s16 }
 0x65f   : > { %v2411_v62 = vpop.xlane.xlu0 %2410 }
 0x660   : > { %v2417_v63 = vsub.f32 %v2401_v47, %v2411_v62  ;;  %v6293_v62 = vmov 32.0  }
 0x662   : > { %v2423_v0 = vmul.f32 1.442695, %v2417_v63  ;;  %v2414_v3 = vpop.xlane.xlu2 %2413 }
 0x663   : > { %v2418_v4 = vsub.f32 %v2402_v52, %v2414_v3 }
 0x664   : > { %5405 = vpow2.f32 %v2423_v0 }
 0x665   : > { %v2425_v6 = vmul.f32 1.442695, %v2418_v4 }
 0x667   : > { %5407 = vpow2.f32 %v2425_v6 }
 0x66a   : > { %v5406_v10 = vpop.eup %5405  ;;  %v2408_v11 = vpop.xlane.xlu2 %2407 }
 0x66b   : > { %v2416_v13 = vsub.f32 %v2400_v55, %v2408_v11  ;;  %v2433_v14 = vsel %vm1653_vm5, %v5406_v10, 0.0 }
 0x66c   : > { %2434 = vadd.xlane.f32.xlu2 %v2433_v14 }
 0x66d   : > { %v2421_v15 = vmul.f32 1.442695, %v2416_v13  ;;  %v5408_v16 = vpop.eup %5407 }
 0x66e   : > { %v2436_v17 = vsel %vm1653_vm5, %v5408_v16, 0.0 }
 0x66f   : > { %5409 = vpow2.f32 %v2421_v15 }
 0x674   : > { %2437 = vadd.xlane.f32.xlu2 %v2436_v17  ;;  %v2685_v17 = vld [vmem:[#allocation12 + $0x10] sm:$0xff] }
 0x675   : > { %v5410_v18 = vpop.eup %5409 }
 0x676   : > { %v2430_v20 = vsel %vm1653_vm5, %v5410_v18, 0.0 }
 0x677   : > { %2431 = vadd.xlane.f32.xlu0 %v2430_v20  ;;  %v2683_v20 = vld [vmem:[#allocation12] sm:$0xff] }
 0x68b   : > { %2288 = vrot.lane.b32.xlu0 %v6963_v19, %s6290_s1 }
 0x68c   : > { %2291 = vrot.lane.b32.xlu2 %v6963_v19, %s6292_s23 }
 0x696   : > { %v2429_v21 = vpop.xlane.xlu1 %2428 }
 0x697   : > { %5411 = vrcp.f32 %v2429_v21  ;;  %v2722_v21 = vld [vmem:[%s7404_s10 + $0x38] sm:$0xff] }
 0x69d   : > { %v5412_v22 = vpop.eup %5411 }
 0x69e   : > { %v2443_v23 = vmul.f32 %v5412_v22, %v5404_v60  ;;  %v2721_v22 = vld [vmem:[%s7404_s10 + $0x30] sm:$0xff] }
 0x6a0   : > { %5033 = vmatmul.msk.f32.vlgmr.msra.gmra.mxu3 %vm1653_vm5, %v2443_v23  ;;  %v2720_v23 = vld [vmem:[%s7404_s10 + $0x28] sm:$0xff] }
 0x6ae   : > { %v2295_v24 = vpop.permute.xlu1 %2294 }
 0x6af   : > { %2534 = vmatpush.msrb.mxu2 %v2295_v24 }
 0x6b1   : > { %2626 = vmatpush.msra.mxu2 %v2198_v41 }
 0x6df   : > { %v2435_v27 = vpop.xlane.xlu2 %2434 }
 0x6e0   : > { %5413 = vrcp.f32 %v2435_v27 }
 0x6e6   : > { %v5414_v29 = vpop.eup %5413 }
 0x6e7   : > { %v2438_v28 = vpop.xlane.xlu2 %2437  ;;  %v2445_v26 = vmul.f32 %v5414_v29, %v5406_v10 }
 0x6e8   : > { %5415 = vrcp.f32 %v2438_v28  ;;  %v2719_v28 = vld [vmem:[%s7404_s10 + $0x20] sm:$0xff] }
 0x6ea   : > { %v2432_v8 = vpop.xlane.xlu0 %2431 }
 0x6eb   : > { %5417 = vrcp.f32 %v2432_v8 }
 0x6ec   : > { %5419 = vrcp.f32 %v6293_v62  ;;  %v5050_v62 = vld [vmem:[%s7401_s4 + $0x98] sm:$0xff] }
 0x6ee   : > { %v5416_v30 = vpop.eup %5415 }
 0x6ef   : > { %v2446_v31 = vmul.f32 %v5416_v30, %v5408_v16  ;;  %v2292_v32 = vpop.permute.xlu2 %2291  ;;  %v2686_v16 = vld [vmem:[#allocation12 + $0x18] sm:$0xff]  ;;  %v2718_v30 = vld [vmem:[%s7404_s10 + $0x18] sm:$0xff] }
 0x6f0   : > { %2511 = vmatpush.msrb.mxu1 %v2292_v32  ;;  %2706 = vmatpush.msra.mxu3 %v2686_v16 }
 0x6f1   : > { %5035 = vmatmul.msk.f32.vlgmr.msrb.gmra.mxu1 %vm1653_vm5, %v2445_v26  ;;  %5036 = vmatmul.msk.f32.vlgmr.msrb.gmra.mxu2 %vm1653_vm5, %v2446_v31  ;;  %v5418_v19 = vpop.eup %5417 }
 0x6f2   : > { %v2444_v33 = vmul.f32 %v5418_v19, %v5410_v18  ;;  %2603 = vmatpush.msra.mxu1 %v2197_v39  ;;  %v5420_v63 = vpop.eup %5419  ;;  %2707 = vmatpush.msra.mxu3 %v2685_v17  ;;  %v2684_v18 = vld [vmem:[#allocation12 + $0x8] sm:$0xff]  ;;  %v5359_v39 = vld [vmem:[#allocation16 + $0x1] ss:$0 sm:$0xff] }
 0x6f3   : > { %v2650_v0 = vmul.f32 32.0, %v5420_v63  ;;  %vm2654_vm1 = vweird.f32 %v5420_v63  ;;  %2855 = vmatpush.msrb.mxu2 %v5050_v62 }
 0x6f4   : > { %2708 = vmatpush.msra.mxu3 %v2684_v18 }
 0x6f5   : > { %v2651_v3 = vsub.f32 1.0, %v2650_v0  ;;  %v5045_v0 = vld [vmem:[%s7401_s4 + $0x70] sm:$0xff] }
 0x6f6   : > { %2709 = vmatpush.msra.mxu3 %v2683_v20 }
 0x6f7   : > { %v2652_v4 = vmul.f32 %v5420_v63, %v2651_v3  ;;  %v5049_v3 = vld [vmem:[%s7401_s4 + $0x90] sm:$0xff] }
 0x6f8   : > { %2856 = vmatpush.msrb.mxu2 %v5049_v3 }
 0x6f9   : > { %v2653_v6 = vadd.f32 %v5420_v63, %v2652_v4  ;;  %v5053_v4 = vld [vmem:[%s7401_s4 + $0xb0] sm:$0xff] }
 0x6fb   : > { %v7019_v10 = vsel %vm2654_vm1, %v5420_v63, %v2653_v6  ;;  %v5054_v63 = vld [vmem:[%s7401_s4 + $0xb8] sm:$0xff]  ;;  %v5044_v6 = vld [vmem:[%s7401_s4 + $0x68] sm:$0xff] }
 0x6fd   : > { %v2289_v35 = vpop.permute.xlu0 %2288 }
 0x6fe   : > { %2488 = vmatpush.msrb.mxu0 %v2289_v35  ;;  %v5358_v35 = vld [vmem:[#allocation16] ss:$0 sm:$0xff] }
 0x6ff   : > { %5034 = vmatmul.msk.f32.vlgmr.msrb.gmra.mxu0 %vm1653_vm5, %v2444_v33 }
 0x700   : > { %2580 = vmatpush.msra.mxu0 %v2196_v42 }
 0x702   : > { %2739 = vmatpush.msrb.mxu0 %v2722_v21 }
 0x704   : > { %2740 = vmatpush.msrb.mxu0 %v2721_v22 }
 0x706   : > { %2741 = vmatpush.msrb.mxu0 %v2720_v23 }
 0x708   : > { %2742 = vmatpush.msrb.mxu0 %v2719_v28  ;;  %v5362_v28 = vld [vmem:[#allocation16 + $0x2] ss:$0 sm:$0xff] }
 0x70a   : > { %2743 = vmatpush.msrb.mxu0 %v2718_v30 }
 0x723   : > { %v2467_v37 = vpop.f32.mrf.mxu3 }
 0x724   : > { %5037 = vmatmul.msk.f32.vlgmr.msrb.gmra.mxu3 %vm1653_vm5, %v2467_v37 }
 0x725   : > { %2878 = vmatpush.msrb.mxu3 %v5054_v63 }
 0x727   : > { %2879 = vmatpush.msrb.mxu3 %v5053_v4 }
 0x76e   : > { %v2513_v43 = vpop.f32.mrf.mxu1 }
 0x76f   : > { %5039 = vmatmul.msk.f32.vlgmr.msra.gmra.mxu1 %vm1653_vm5, %v2513_v43  ;;  %v2717_v43 = vld [vmem:[%s7404_s10 + $0x10] sm:$0xff] }
 0x770   : > { %2744 = vmatpush.msrb.mxu0 %v2717_v43 }
 0x774   : > { %v2536_v44 = vpop.f32.mrf.mxu2 }
 0x775   : > { %5040 = vmatmul.msk.f32.vlgmr.msra.gmra.mxu2 %vm1653_vm5, %v2536_v44  ;;  %v2716_v44 = vld [vmem:[%s7404_s10 + $0x8] sm:$0xff] }
 0x776   : > { %2745 = vmatpush.msrb.mxu0 %v2716_v44 }
 0x77c   : > { %v2490_v45 = vpop.f32.mrf.mxu0 }
 0x77d   : > { %5038 = vmatmul.msk.f32.vlgmr.msra.gmra.mxu0 %vm1653_vm5, %v2490_v45  ;;  %v2715_v45 = vld [vmem:[%s7404_s10] sm:$0xff] }
 0x77e   : > { %2746 = vmatpush.msrb.mxu0 %v2715_v45 }
 0x7a7   : > { %v2559_v46 = vpop.f32.mrf.mxu3 }
 0x7a8   : > { %v2631_v50 = vsel %vm2203_vm15, %v2559_v46, 0.0  ;;  %v5360_v46 = vld [vmem:[#allocation13] ss:$0 sm:$0xff] }
 0x7ec   : > { %v2605_v47 = vpop.f32.mrf.mxu1 }
 0x7ed   : > { %v2634_v54 = vsel %vm2203_vm15, %v2605_v47, 0.0 }
 0x7f8   : > { %v2628_v52 = vpop.f32.mrf.mxu2 }
 0x7f9   : > { %v2636_v57 = vsel %vm2203_vm15, %v2628_v52, 0.0 }
 0x7fa   : > { %v2582_v49 = vpop.f32.mrf.mxu0 }
 0x7fb   : > { %v2632_v51 = vsel %vm2203_vm15, %v2582_v49, 0.0 }
 0x7fc   : > { %v2633_v53 = vadd.f32 %v2632_v51, %v2631_v50  ;;  %v5361_v51 = vld [vmem:[#allocation15] ss:$0 sm:$0xff] }
 0x7fe   : > { %v2635_v55 = vadd.f32 %v2634_v54, %v2633_v53 }
 0x800   : > { %v2637_v58 = vadd.f32 %v2636_v57, %v2635_v55 }
 0x802   : > { %v2641_v59 = vadd.f32 %v5357_v56, %v2637_v58 }
 0x804   : > { %v2642_v60 = vadd.f32 %v2641_v59, %v6946_v7 }
 0x806   : > { %v2646_v61 = vsel %vm2203_vm15, %v2642_v60, 0.0 }
 0x807   : > { %2647 = vadd.xlane.f32.xlu1 %v2646_v61  ;;  %v5046_v61 = vld [vmem:[%s7401_s4 + $0x78] sm:$0xff] }
 0x808   : > { %2832 = vmatpush.msrb.mxu1 %v5046_v61 }
 0x80a   : > { %2833 = vmatpush.msrb.mxu1 %v5045_v0 }
 0x80c   : > { %2834 = vmatpush.msrb.mxu1 %v5044_v6 }
 0x87a   : > { %v2648_v11 = vpop.xlane.xlu1 %2647 }
 0x87b   : > { %v2656_v13 = vmul.f32 %v7019_v10, %v2648_v11  ;;  %v5048_v11 = vld [vmem:[%s7401_s4 + $0x88] sm:$0xff] }
 0x87c   : > { %2857 = vmatpush.msrb.mxu2 %v5048_v11 }
 0x87d   : > { %v2657_v7 = vsub.f32 %v2642_v60, %v2656_v13  ;;  %v5052_v13 = vld [vmem:[%s7401_s4 + $0xa8] sm:$0xff] }
 0x87e   : > { %2880 = vmatpush.msrb.mxu3 %v5052_v13 }
 0x87f   : > { %v2658_v14 = vmul.f32 %v2657_v7, %v2657_v7 }
 0x881   : > { %v2659_v15 = vsel %vm2203_vm15, %v2658_v14, 0.0  ;;  %v5047_v14 = vld [vmem:[%s7401_s4 + $0x80] sm:$0xff] }
 0x882   : > { %2660 = vadd.xlane.f32.xlu0 %v2659_v15  ;;  %v5051_v15 = vld [vmem:[%s7401_s4 + $0xa0] sm:$0xff]  ;;  %2858 = vmatpush.msrb.mxu2 %v5047_v14 }
 0x883   : > { %2881 = vmatpush.msrb.mxu3 %v5051_v15 }
 0x8f5   : > { %v2661_v24 = vpop.xlane.xlu0 %2660 }
 0x8f6   : > { %v2662_v27 = vmul.f32 %v2661_v24, %v7019_v10 }
 0x8f8   : > { %v2663_v29 = vadd.f32 1e-05, %v2662_v27 }
 0x8fa   : > { %5421 = vrsqrt.f32 %v2663_v29  ;;  %vm2670_vm4 = vweird.f32 %v2663_v29 }
 0x900   : > { %v5422_v26 = vpop.eup %5421 }
 0x901   : > { %v2665_v31 = vmul.f32 %v5422_v26, %v2663_v29  ;;  %vm2671_vm3 = vweird.f32 %v5422_v26 }
 0x902   : > { %vm2672_vm6 = vmor %vm2670_vm4, %vm2671_vm3 }
 0x903   : > { %v2666_v32 = vmul.f32 %v5422_v26, %v2665_v31 }
 0x905   : > { %v2667_v8 = vmul.f32 0.5, %v2666_v32 }
 0x907   : > { %v2668_v19 = vsub.f32 1.5, %v2667_v8  ;;  %v5364_v8 = vld [vmem:[#allocation7 + $0x3] ss:$0 sm:$0xff] }
 0x909   : > { %v2669_v33 = vmul.f32 %v5422_v26, %v2668_v19 }
 0x90b   : > { %v2673_v36 = vsel %vm2672_vm6, %v5422_v26, %v2669_v33  ;;  %v5363_v26 = vld [vmem:[#allocation16 + $0x3] ss:$0 sm:$0xff] }
 0x90c   : > { %v2674_v37 = vmul.f32 %v2673_v36, %v2657_v7  ;;  %v5043_v7 = vld [vmem:[%s7401_s4 + $0x60] sm:$0xff] }
 0x90d   : > { %2835 = vmatpush.msrb.mxu1 %v5043_v7  ;;  %v5366_v36 = vld [vmem:[#allocation7 + $0x5] ss:$0 sm:$0xff] }
 0x90e   : > { %v2678_v41 = vmul.f32 %v5358_v35, %v2674_v37  ;;  %v5365_v35 = vld [vmem:[#allocation7 + $0x4] ss:$0 sm:$0xff] }
 0x910   : > { %v2682_v42 = vadd.f32 %v5359_v39, %v2678_v41 }
 0x912   : > { %5041 = vmatmul.msk.f32.vlgmr.msra.gmra.mxu3 %vm2203_vm15, %v2682_v42 }
 0x995   : > { %v2711_v47 = vpop.f32.mrf.mxu3 }
 0x996   : > { %v2712_v49 = vadd.f32 %v5360_v46, %v2711_v47 }
 0x998   : > { %v2714_v50 = vmax.f32 %v2712_v49, 0.0 }
 0x99a   : > { %5042 = vmatmul.msk.f32.vlgmr.msrb.gmra.mxu0 %vm2727_vm7, %v2714_v50 }
 0xa17   : > { %v2748_v52 = vpop.f32.mrf.mxu0 }
 0xa18   : > { %v2749_v53 = vadd.f32 %v5361_v51, %v2748_v52 }
 0xa1a   : > { %v2751_v54 = vadd.f32 %v2749_v53, %v2682_v42 }
 0xa1c   : > { %v2756_v55 = vsel %vm2203_vm15, %v2751_v54, 0.0 }
 0xa1d   : > { %2757 = vadd.xlane.f32.xlu2 %v2756_v55 }
 0xa90   : > { %v2758_v56 = vpop.xlane.xlu2 %2757 }
 0xa91   : > { %v2759_v57 = vmul.f32 %v2758_v56, %v7019_v10 }
 0xa93   : > { %v2760_v58 = vsub.f32 %v2751_v54, %v2759_v57 }
 0xa95   : > { %v2761_v59 = vmul.f32 %v2760_v58, %v2760_v58 }
 0xa97   : > { %v2762_v60 = vsel %vm2203_vm15, %v2761_v59, 0.0 }
 0xa98   : > { %2763 = vadd.xlane.f32.xlu1 %v2762_v60 }
 0xb0b   : > { %v2764_v16 = vpop.xlane.xlu1 %2763 }
 0xb0c   : > { %v2765_v17 = vmul.f32 %v2764_v16, %v7019_v10 }
 0xb0e   : > { %v2766_v18 = vadd.f32 1e-05, %v2765_v17 }
 0xb10   : > { %5423 = vrsqrt.f32 %v2766_v18  ;;  %vm2773_vm9 = vweird.f32 %v2766_v18 }
 0xb16   : > { %v5424_v20 = vpop.eup %5423 }
 0xb17   : > { %v2768_v21 = vmul.f32 %v5424_v20, %v2766_v18  ;;  %vm2774_vm8 = vweird.f32 %v5424_v20 }
 0xb18   : > { %vm2775_vm10 = vmor %vm2773_vm9, %vm2774_vm8 }
 0xb19   : > { %v2769_v22 = vmul.f32 %v5424_v20, %v2768_v21 }
 0xb1b   : > { %v2770_v23 = vmul.f32 0.5, %v2769_v22 }
 0xb1d   : > { %v2771_v24 = vsub.f32 1.5, %v2770_v23 }
 0xb1f   : > { %v2772_v27 = vmul.f32 %v5424_v20, %v2771_v24 }
 0xb21   : > { %v2776_v29 = vsel %vm2775_vm10, %v5424_v20, %v2772_v27 }
 0xb22   : > { %v2777_v30 = vmul.f32 %v2776_v29, %v2760_v58 }
 0xb24   : > { %v2781_v31 = vmul.f32 %v5362_v28, %v2777_v30 }
 0xb26   : > { %v7050_v32 = vadd.f32 %v5363_v26, %v2781_v31 }
 0xb28   : > { %5055 = vmatmul.msk.f32.vlgmr.msrb.gmra.mxu1 %vm2203_vm15, %v7050_v32  ;;  %5056 = vmatmul.msk.f32.vlgmr.msrb.gmra.mxu2 %vm2203_vm15, %v7050_v32 }
 0xb29   : > { %5057 = vmatmul.msk.f32.vlgmr.msrb.gmra.mxu3 %vm2203_vm15, %v7050_v32 }
 0xba5   : > { %v2837_v19 = vpop.f32.mrf.mxu1 }
 0xba6   : > { %v2838_v33 = vadd.f32 %v5364_v8, %v2837_v19 }
 0xba8   : > { %2887 = vrot.lane.b32.xlu2 %v2838_v33, %s6290_s1 }
 0xbab   : > { %v2860_v37 = vpop.f32.mrf.mxu2 }
 0xbac   : > { %v2861_v39 = vadd.f32 %v5365_v35, %v2860_v37  ;;  %v2883_v41 = vpop.f32.mrf.mxu3  ;;  %v2808_v35 = vld [vmem:[#allocation9 + $0x20] sm:$0xff] }
 0xbad   : > { %v7059_v42 = vadd.f32 %v5366_v36, %v2883_v41 }
 0xbae   : > { %2896 = vrot.lane.b32.xlu1 %v2861_v39, %s6292_s23  ;;  %2894 = vrot.lane.b32.xlu0 %v2861_v39, %s6290_s1 }
 0xbaf   : > { %5058 = vmatpush.xpose.msk.msra.mxu1 %vm1653_vm5, %v2861_v39 }
 0xbb2   : > { %5059 = vmatmul.msk.f32.vlgmr.msra.gmra.mxu1 %vm1653_vm5, %v2838_v33 }
 0xbb3   : > { %3076 = vmatpush.msrb.mxu1 %v7059_v42 }
 0xbb5   : > { %3168 = vmatpush.msra.mxu1 %v2808_v35  ;;  %v5076_v35 = vld [vmem:[%s7404_s10 + $0x48] sm:$0xff] }
 0xbb6   : > { %2891 = vrot.lane.b32.xlu1 %v2838_v33, %s6291_s16  ;;  %2889 = vrot.lane.b32.xlu0 %v2838_v33, %s6292_s23 }
 0xbbe   : > { %2898 = vrot.lane.b32.xlu0 %v2861_v39, %s6291_s16 }
 0xc02   : > { %v2888_v45 = vpop.permute.xlu2 %2887 }
 0xc20   : > { %v2897_v43 = vpop.permute.xlu1 %2896  ;;  %v2895_v44 = vpop.permute.xlu0 %2894 }
 0xc21   : > { %5060 = vmatpush.xpose.msk.msra.mxu2 %vm1653_vm5, %v2895_v44  ;;  %5062 = vmatpush.xpose.msk.msra.mxu3 %vm1653_vm5, %v2897_v43 }
 0xc24   : > { %5061 = vmatmul.msk.f32.vlgmr.msra.gmra.mxu2 %vm1653_vm5, %v2888_v45 }
 0xc28   : > { %v2890_v46 = vpop.permute.xlu0 %2889  ;;  %v2892_v52 = vpop.permute.xlu1 %2891 }
 0xc29   : > { %5063 = vmatmul.msk.f32.vlgmr.msra.gmra.mxu3 %vm1653_vm5, %v2890_v46 }
 0xc2f   : > { %v2931_v47 = vpop.f32.mrf.mxu1 }
 0xc30   : > { %v3006_v49 = vmul.f32 %v2931_v47, %v6979_v38  ;;  %v2899_v50 = vpop.permute.xlu0 %2898 }
 0xc31   : > { %5064 = vmatpush.xpose.msk.msra.mxu0 %vm1653_vm5, %v2899_v50 }
 0xc32   : > { %v3010_v51 = vadd.f32 %v3006_v49, %v6981_v40 }
 0xc34   : > { %5065 = vmatmul.msk.f32.vlgmr.msra.gmra.mxu0 %vm1653_vm5, %v2892_v52  ;;  %v3014_v53 = vsel %vm1653_vm5, %v3010_v51, -inf  ;;  %v2810_v52 = vld [vmem:[#allocation9 + $0x30] sm:$0xff] }
 0xc35   : > { %3015 = vmax.xlane.f32.xlu1 %v3014_v53  ;;  %v3430_v53 = vld [vmem:[#allocation19 + $0x18] sm:$0xff] }
 0xca7   : > { %v2955_v54 = vpop.f32.mrf.mxu2 }
 0xca8   : > { %v3007_v55 = vmul.f32 %v2955_v54, %v6979_v38  ;;  %v3016_v56 = vpop.xlane.xlu1 %3015  ;;  %v3429_v54 = vld [vmem:[#allocation19 + $0x10] sm:$0xff] }
 0xca9   : > { %v3026_v57 = vsub.f32 %v3010_v51, %v3016_v56  ;;  %v2809_v51 = vld [vmem:[#allocation9 + $0x28] sm:$0xff]  ;;  %v3427_v56 = vld [vmem:[#allocation19] sm:$0xff] }
 0xcaa   : > { %v3011_v58 = vadd.f32 %v3007_v55, %v6981_v40  ;;  %v3428_v55 = vld [vmem:[#allocation19 + $0x8] sm:$0xff] }
 0xcab   : > { %v3030_v59 = vmul.f32 1.442695, %v3026_v57  ;;  %v2811_v57 = vld [vmem:[#allocation9 + $0x38] sm:$0xff] }
 0xcac   : > { %v2979_v60 = vpop.f32.mrf.mxu3  ;;  %v3017_v61 = vsel %vm1653_vm5, %v3011_v58, -inf }
 0xcad   : > { %5425 = vpow2.f32 %v3030_v59  ;;  %v3008_v62 = vmul.f32 %v2979_v60, %v6979_v38  ;;  %3018 = vmax.xlane.f32.xlu2 %v3017_v61  ;;  %v3435_v59 = vld [vmem:[#allocation19 + $0x30] sm:$0xff]  ;;  %v3434_v60 = vld [vmem:[#allocation19 + $0x28] sm:$0xff] }
 0xcaf   : > { %v3012_v63 = vadd.f32 %v3008_v62, %v6981_v40  ;;  %v3433_v62 = vld [vmem:[#allocation19 + $0x20] sm:$0xff] }
 0xcb1   : > { %v3003_v0 = vpop.f32.mrf.mxu0  ;;  %v3020_v3 = vsel %vm1653_vm5, %v3012_v63, -inf }
 0xcb2   : > { %v3009_v4 = vmul.f32 %v3003_v0, %v6979_v38  ;;  %3021 = vmax.xlane.f32.xlu0 %v3020_v3  ;;  %v2147_v0 = vadd.f32 %v6956_v12, %v6954_v9 }
 0xcb3   : > { %v5426_v6 = vpop.eup %5425 }
 0xcb4   : > { %v3038_v11 = vsel %vm1653_vm5, %v5426_v6, 0.0  ;;  %v3013_v13 = vadd.f32 %v3009_v4, %v6981_v40  ;;  %v2174_v3 = vadd.f32 %v6977_v34, %v2147_v0 }
 0xcb5   : > { %3039 = vadd.xlane.f32.xlu1 %v3038_v11 }
 0xcb6   : > { %v3023_v7 = vsel %vm1653_vm5, %v3013_v13, -inf  ;;  %v7108_v4 = vadd.f32 %v2174_v3, %v6943_v5 }
 0xcb7   : > { %3024 = vmax.xlane.f32.xlu2 %v3023_v7 }
 0xccf   : > { %2901 = vrot.lane.b32.xlu2 %v7059_v42, %s6290_s1 }
 0xd20   : > { %v3019_v14 = vpop.xlane.xlu2 %3018 }
 0xd21   : > { %v3027_v15 = vsub.f32 %v3011_v58, %v3019_v14  ;;  %v3436_v58 = vld [vmem:[#allocation19 + $0x38] sm:$0xff] }
 0xd23   : > { %v3032_v16 = vmul.f32 1.442695, %v3027_v15 }
 0xd25   : > { %5427 = vpow2.f32 %v3032_v16  ;;  %v3022_v18 = vpop.xlane.xlu0 %3021  ;;  %v5367_v16 = vld [vmem:[#allocation10 + $0x1] ss:$0 sm:$0xff] }
 0xd26   : > { %v3028_v24 = vsub.f32 %v3012_v63, %v3022_v18 }
 0xd28   : > { %v3040_v17 = vpop.xlane.xlu1 %3039  ;;  %v3034_v30 = vmul.f32 1.442695, %v3028_v24  ;;  %v5080_v24 = vld [vmem:[%s7404_s10 + $0x68] sm:$0xff] }
 0xd29   : > { %5429 = vrcp.f32 %v3040_v17 }
 0xd2a   : > { %v3025_v20 = vpop.xlane.xlu2 %3024 }
 0xd2b   : > { %v5428_v21 = vpop.eup %5427  ;;  %v3029_v22 = vsub.f32 %v3013_v13, %v3025_v20  ;;  %v5082_v20 = vld [vmem:[%s7404_s10 + $0x78] sm:$0xff] }
 0xd2c   : > { %v3041_v23 = vsel %vm1653_vm5, %v5428_v21, 0.0 }
 0xd2d   : > { %v3036_v27 = vmul.f32 1.442695, %v3029_v22  ;;  %3042 = vadd.xlane.f32.xlu0 %v3041_v23  ;;  %v5369_v23 = vld [vmem:[#allocation21 + $0x1] ss:$0 sm:$0xff] }
 0xd2f   : > { %v5430_v28 = vpop.eup %5429  ;;  %5431 = vpow2.f32 %v3036_v27 }
 0xd30   : > { %v3054_v29 = vmul.f32 %v5430_v28, %v5426_v6  ;;  %5433 = vpow2.f32 %v3034_v30  ;;  %v5079_v28 = vld [vmem:[%s7404_s10 + $0x60] sm:$0xff] }
 0xd32   : > { %5066 = vmatmul.msk.f32.vlgmr.msrb.gmra.mxu1 %vm1653_vm5, %v3054_v29  ;;  %v2902_v26 = vpop.permute.xlu2 %2901  ;;  %v5368_v29 = vld [vmem:[#allocation21] ss:$0 sm:$0xff] }
 0xd33   : > { %3099 = vmatpush.msrb.mxu2 %v2902_v26 }
 0xd35   : > { %v5432_v31 = vpop.eup %5431  ;;  %3191 = vmatpush.msra.mxu2 %v2809_v51 }
 0xd36   : > { %v3047_v8 = vsel %vm1653_vm5, %v5432_v31, 0.0  ;;  %v5434_v19 = vpop.eup %5433 }
 0xd37   : > { %3048 = vadd.xlane.f32.xlu1 %v3047_v8  ;;  %v3044_v33 = vsel %vm1653_vm5, %v5434_v19, 0.0 }
 0xd3f   : > { %3045 = vadd.xlane.f32.xlu1 %v3044_v33  ;;  %v5077_v33 = vld [vmem:[%s7404_s10 + $0x50] sm:$0xff] }
 0xd41   : > { %2904 = vrot.lane.b32.xlu0 %v7059_v42, %s6292_s23 }
 0xd58   : > { %2907 = vrot.lane.b32.xlu1 %v7059_v42, %s6291_s16 }
 0xda0   : > { %v3043_v36 = vpop.xlane.xlu0 %3042 }
 0xda1   : > { %5435 = vrcp.f32 %v3043_v36  ;;  %v5075_v36 = vld [vmem:[%s7404_s10 + $0x40] sm:$0xff] }
 0xda7   : > { %v5436_v37 = vpop.eup %5435 }
 0xda8   : > { %v3055_v39 = vmul.f32 %v5436_v37, %v5428_v21  ;;  %v5081_v21 = vld [vmem:[%s7404_s10 + $0x70] sm:$0xff] }
 0xdaa   : > { %5067 = vmatmul.msk.f32.vlgmr.msrb.gmra.mxu2 %vm1653_vm5, %v3055_v39  ;;  %v3049_v41 = vpop.xlane.xlu1 %3048 }
 0xdab   : > { %3347 = vmatpush.msrb.mxu2 %v5082_v20 }
 0xdad   : > { %3348 = vmatpush.msrb.mxu2 %v5081_v21 }
 0xdaf   : > { %v3078_v43 = vpop.f32.mrf.mxu1  ;;  %3349 = vmatpush.msrb.mxu2 %v5080_v24 }
 0xdb0   : > { %5070 = vmatmul.msk.f32.vlgmr.msra.gmra.mxu1 %vm1653_vm5, %v3078_v43 }
 0xdb1   : > { %3350 = vmatpush.msrb.mxu2 %v5079_v28 }
 0xdb2   : > { %v3046_v44 = vpop.xlane.xlu1 %3045 }
 0xdb3   : > { %5437 = vrcp.f32 %v3046_v44  ;;  %v2905_v45 = vpop.permute.xlu0 %2904 }
 0xdb4   : > { %3122 = vmatpush.msrb.mxu3 %v2905_v45  ;;  %5439 = vrcp.f32 %v3049_v41 }
 0xdb6   : > { %3214 = vmatpush.msra.mxu3 %v2810_v52  ;;  %v3292_v52 = vld [vmem:[#allocation12 + $0x38] sm:$0xff] }
 0xdb7   : > { %3313 = vmatpush.msrb.mxu1 %v3292_v52 }
 0xdb9   : > { %v5438_v46 = vpop.eup %5437 }
 0xdba   : > { %v3056_v47 = vmul.f32 %v5438_v46, %v5434_v19  ;;  %v5440_v42 = vpop.eup %5439  ;;  %v5078_v19 = vld [vmem:[%s7404_s10 + $0x58] sm:$0xff] }
 0xdbb   : > { %v3057_v49 = vmul.f32 %v5440_v42, %v5432_v31  ;;  %3351 = vmatpush.msrb.mxu2 %v5078_v19 }
 0xdbc   : > { %5068 = vmatmul.msk.f32.vlgmr.msrb.gmra.mxu3 %vm1653_vm5, %v3056_v47 }
 0xdbd   : > { %3469 = vmatpush.msrb.mxu3 %v3430_v53  ;;  %3352 = vmatpush.msrb.mxu2 %v5077_v33  ;;  %v3291_v53 = vld [vmem:[#allocation12 + $0x30] sm:$0xff] }
 0xdbe   : > { %3314 = vmatpush.msrb.mxu1 %v3291_v53 }
 0xdbf   : > { %3470 = vmatpush.msrb.mxu3 %v3429_v54  ;;  %3353 = vmatpush.msrb.mxu2 %v5076_v35  ;;  %v3290_v54 = vld [vmem:[#allocation12 + $0x28] sm:$0xff] }
 0xdc0   : > { %3315 = vmatpush.msrb.mxu1 %v3290_v54 }
 0xdc1   : > { %3471 = vmatpush.msrb.mxu3 %v3428_v55  ;;  %3354 = vmatpush.msrb.mxu2 %v5075_v36  ;;  %v3289_v55 = vld [vmem:[#allocation12 + $0x20] sm:$0xff] }
 0xdc2   : > { %3316 = vmatpush.msrb.mxu1 %v3289_v55 }
 0xdc3   : > { %3472 = vmatpush.msrb.mxu3 %v3427_v56  ;;  %v3443_v56 = vld [vmem:[#allocation19 + $0x58] sm:$0xff] }
 0xdc4   : > { %3515 = vmatpush.msra.mxu1 %v3443_v56 }
 0xdca   : > { %v2908_v50 = vpop.permute.xlu1 %2907 }
 0xdcb   : > { %3145 = vmatpush.msrb.mxu0 %v2908_v50 }
 0xdcc   : > { %5069 = vmatmul.msk.f32.vlgmr.msrb.gmra.mxu0 %vm1653_vm5, %v3057_v49 }
 0xdcd   : > { %3237 = vmatpush.msra.mxu0 %v2811_v57  ;;  %v3442_v57 = vld [vmem:[#allocation19 + $0x50] sm:$0xff] }
 0xdce   : > { %3516 = vmatpush.msra.mxu1 %v3442_v57  ;;  %v5374_v57 = vld [vmem:[#allocation15 + $0x1] ss:$0 sm:$0xff] }
 0xdcf   : > { %3492 = vmatpush.msrb.mxu0 %v3436_v58  ;;  %v3441_v58 = vld [vmem:[#allocation19 + $0x48] sm:$0xff] }
 0xdd0   : > { %3517 = vmatpush.msra.mxu1 %v3441_v58 }
 0xdd1   : > { %3493 = vmatpush.msrb.mxu0 %v3435_v59  ;;  %v3440_v59 = vld [vmem:[#allocation19 + $0x40] sm:$0xff] }
 0xdd2   : > { %3518 = vmatpush.msra.mxu1 %v3440_v59 }
 0xdd3   : > { %3494 = vmatpush.msrb.mxu0 %v3434_v60 }
 0xdd5   : > { %3495 = vmatpush.msrb.mxu0 %v3433_v62 }
 0xe2d   : > { %v3101_v61 = vpop.f32.mrf.mxu2  ;;  %v3170_v9 = vpop.f32.mrf.mxu1 }
 0xe2e   : > { %5071 = vmatmul.msk.f32.vlgmr.msra.gmra.mxu2 %vm1653_vm5, %v3101_v61  ;;  %v3242_v5 = vsel %vm2203_vm15, %v3170_v9, 0.0 }
 0xe3f   : > { %v3124_v63 = vpop.f32.mrf.mxu3 }
 0xe40   : > { %5072 = vmatmul.msk.f32.vlgmr.msra.gmra.mxu3 %vm1653_vm5, %v3124_v63 }
 0xe48   : > { %5084 = vmatmul.msk.f32.vlgmr.msrb.gmra.mxu3 %vm2203_vm15, %v7108_v4 }
 0xe49   : > { %v3147_v6 = vpop.f32.mrf.mxu0 }
 0xe4a   : > { %5073 = vmatmul.msk.f32.vlgmr.msra.gmra.mxu0 %vm1653_vm5, %v3147_v6 }
 0xe52   : > { %5085 = vmatmul.msk.f32.vlgmr.msrb.gmra.mxu0 %vm2203_vm15, %v7108_v4 }
 0xeb1   : > { %v3193_v11 = vpop.f32.mrf.mxu2 }
 0xeb2   : > { %v3243_v12 = vsel %vm2203_vm15, %v3193_v11, 0.0 }
 0xeb3   : > { %v3244_v7 = vadd.f32 %v3243_v12, %v3242_v5 }
 0xec3   : > { %v3216_v34 = vpop.f32.mrf.mxu3 }
 0xec4   : > { %v3245_v13 = vsel %vm2203_vm15, %v3216_v34, 0.0  ;;  %v5370_v34 = vld [vmem:[#allocation16 + $0x4] ss:$0 sm:$0xff] }
 0xec5   : > { %v3246_v14 = vadd.f32 %v3245_v13, %v3244_v7  ;;  %v5371_v7 = vld [vmem:[#allocation16 + $0x5] ss:$0 sm:$0xff] }
 0xec7   : > { %v3239_v15 = vpop.f32.mrf.mxu0 }
 0xec8   : > { %v3247_v17 = vsel %vm2203_vm15, %v3239_v15, 0.0 }
 0xec9   : > { %v3248_v18 = vadd.f32 %v3247_v17, %v3246_v14 }
 0xecb   : > { %v3252_v22 = vadd.f32 %v5367_v16, %v3248_v18  ;;  %v3474_v31 = vpop.f32.mrf.mxu3 }
 0xecd   : > { %v3253_v27 = vadd.f32 %v3252_v22, %v7050_v32  ;;  %v3475_v32 = vadd.f32 %v5368_v29, %v3474_v31  ;;  %v5373_v29 = vld [vmem:[#allocation21 + $0x2] ss:$0 sm:$0xff] }
 0xecf   : > { %v3497_v30 = vpop.f32.mrf.mxu0  ;;  %v3258_v26 = vsel %vm2203_vm15, %v3253_v27, 0.0 }
 0xed0   : > { %v3498_v8 = vadd.f32 %v5369_v23, %v3497_v30  ;;  %3259 = vadd.xlane.f32.xlu0 %v3258_v26  ;;  %v5372_v23 = vld [vmem:[#allocation13 + $0x1] ss:$0 sm:$0xff] }
 0xed2   : > { %3535 = vrot.lane.b32.xlu1 %v3498_v8, %s6291_s16  ;;  %5087 = vmatpush.xpose.msk.msra.mxu3 %vm1653_vm5, %v3498_v8 }
 0xed5   : > { %5088 = vmatmul.msk.f32.vlgmr.msra.gmra.mxu3 %vm1653_vm5, %v3475_v32 }
 0xeda   : > { %3528 = vrot.lane.b32.xlu1 %v3475_v32, %s6291_s16 }
 0xee2   : > { %3531 = vrot.lane.b32.xlu1 %v3498_v8, %s6290_s1 }
 0xee4   : > { %3533 = vrot.lane.b32.xlu0 %v3498_v8, %s6292_s23 }
 0xeea   : > { %3526 = vrot.lane.b32.xlu1 %v3475_v32, %s6292_s23 }
 0xf43   : > { %v3260_v37 = vpop.xlane.xlu0 %3259 }
 0xf44   : > { %v3261_v39 = vmul.f32 %v3260_v37, %v7019_v10  ;;  %v3536_v41 = vpop.permute.xlu1 %3535 }
 0xf45   : > { %5093 = vmatpush.xpose.msk.msra.mxu2 %vm1653_vm5, %v3536_v41 }
 0xf46   : > { %v3262_v43 = vsub.f32 %v3253_v27, %v3261_v39 }
 0xf48   : > { %v3263_v44 = vmul.f32 %v3262_v43, %v3262_v43 }
 0xf4a   : > { %v3264_v45 = vsel %vm2203_vm15, %v3263_v44, 0.0 }
 0xf4b   : > { %3265 = vadd.xlane.f32.xlu2 %v3264_v45 }
 0xf4c   : > { %v7139_v46 = vpop.permute.xlu1 %3528 }
 0xf54   : > { %v3532_v47 = vpop.permute.xlu1 %3531 }
 0xf55   : > { %5089 = vmatpush.xpose.msk.msra.mxu0 %vm1653_vm5, %v3532_v47 }
 0xf56   : > { %v3534_v16 = vpop.permute.xlu0 %3533 }
 0xf58   : > { %v3568_v42 = vpop.f32.mrf.mxu3 }
 0xf59   : > { %v3643_v49 = vmul.f32 %v3568_v42, %v6979_v38 }
 0xf5b   : > { %v7148_v50 = vsel %vm3647_vm11, -1e+30, %v3643_v49 }
 0xf5c   : > { %v3654_v51 = vsel %vm1653_vm5, %v7148_v50, -inf  ;;  %v3527_v17 = vpop.permute.xlu1 %3526 }
 0xf5d   : > { %3655 = vmax.xlane.f32.xlu1 %v3654_v51 }
 0xf63   : > { %3524 = vrot.lane.b32.xlu2 %v3475_v32, %s6290_s1 }
 0xfbe   : > { %v3266_v60 = vpop.xlane.xlu2 %3265 }
 0xfbf   : > { %v3267_v61 = vmul.f32 %v3266_v60, %v7019_v10 }
 0xfc1   : > { %v3268_v62 = vadd.f32 1e-05, %v3267_v61 }
 0xfc3   : > { %5441 = vrsqrt.f32 %v3268_v62  ;;  %vm3275_vm13 = vweird.f32 %v3268_v62 }
 0xfc6   : > { %v3525_v63 = vpop.permute.xlu2 %3524 }
 0xfc7   : > { %5090 = vmatmul.msk.f32.vlgmr.msra.gmra.mxu0 %vm1653_vm5, %v3525_v63 }
 0xfc9   : > { %v5442_v0 = vpop.eup %5441 }
 0xfca   : > { %v3270_v3 = vmul.f32 %v5442_v0, %v3268_v62  ;;  %vm3276_vm12 = vweird.f32 %v5442_v0 }
 0xfcb   : > { %vm3277_vm14 = vmor %vm3275_vm13, %vm3276_vm12 }
 0xfcc   : > { %v3271_v6 = vmul.f32 %v5442_v0, %v3270_v3 }
 0xfce   : > { %v3272_v11 = vmul.f32 0.5, %v3271_v6 }
 0xfd0   : > { %v3273_v9 = vsub.f32 1.5, %v3272_v11  ;;  %v3656_v41 = vpop.xlane.xlu1 %3655 }
 0xfd2   : > { %v3274_v12 = vmul.f32 %v5442_v0, %v3273_v9 }
 0xfd4   : > { %v3278_v5 = vsel %vm3277_vm14, %v5442_v0, %v3274_v12 }
 0xfd5   : > { %v3279_v13 = vmul.f32 %v3278_v5, %v3262_v43 }
 0xfd7   : > { %v3283_v14 = vmul.f32 %v5370_v34, %v3279_v13  ;;  %v3447_v13 = vld [vmem:[%s7405_s18 + $0x8] sm:$0xff] }
 0xfd9   : > { %v3287_v15 = vadd.f32 %v5371_v7, %v3283_v14 }
 0xfdb   : > { %5074 = vmatmul.msk.f32.vlgmr.msrb.gmra.mxu1 %vm2203_vm15, %v3287_v15 }
 0xfdc   : > { %5091 = vmatpush.xpose.msk.msrb.mxu1 %vm1653_vm5, %v3534_v16 }
 0xfe3   : > { %5086 = vmatmul.msk.f32.vlgmr.msra.gmra.mxu1 %vm2203_vm15, %v7108_v4 }
 0xfeb   : > { %5092 = vmatmul.msk.f32.vlgmr.msrb.gmra.mxu1 %vm1653_vm5, %v3527_v17 }
0x1044   : > { %v3592_v18 = vpop.f32.mrf.mxu0 }
0x1045   : > { %v3644_v20 = vmul.f32 %v3592_v18, %v6979_v38 }
0x1047   : > { %v3651_v21 = vsel %vm3647_vm11, -1e+30, %v3644_v20  ;;  %v3446_v20 = vld [vmem:[%s7405_s18] sm:$0xff] }
0x1048   : > { %v3657_v22 = vsel %vm1653_vm5, %v3651_v21, -inf }
0x1049   : > { %3658 = vmax.xlane.f32.xlu2 %v3657_v22 }
0x1058   : > { %v3318_v24 = vpop.f32.mrf.mxu1 }
0x1059   : > { %v3319_v27 = vadd.f32 %v5372_v23, %v3318_v24 }
0x105b   : > { %v3321_v28 = vmax.f32 %v3319_v27, 0.0 }
0x105d   : > { %5083 = vmatmul.msk.f32.vlgmr.msrb.gmra.mxu2 %vm2727_vm7, %v3321_v28 }
0x1060   : > { %v3520_v30 = vpop.f32.mrf.mxu1 }
0x1061   : > { %v3521_v26 = vadd.f32 %v5373_v29, %v3520_v30 }
0x1063   : > { %3716 = vmatpush.msrb.mxu3 %v3521_v26 }
0x1065   : > { %5094 = vmatmul.msk.f32.vlgmr.msra.gmra.mxu2 %vm1653_vm5, %v7139_v46  ;;  %v3666_v46 = vsub.f32 %v7148_v50, %v3656_v41  ;;  %3808 = vmatpush.msra.mxu3 %v3446_v20 }
0x1067   : > { %v3670_v42 = vmul.f32 1.442695, %v3666_v46 }
0x1068   : > { %v3616_v31 = vpop.f32.mrf.mxu1 }
0x1069   : > { %v3645_v8 = vmul.f32 %v3616_v31, %v6979_v38 }
0x106b   : > { %v3652_v19 = vsel %vm3647_vm11, -1e+30, %v3645_v8 }
0x106c   : > { %v3660_v33 = vsel %vm1653_vm5, %v3652_v19, -inf }
0x106d   : > { %3661 = vmax.xlane.f32.xlu1 %v3660_v33 }
0x10bc   : > { %v3659_v32 = vpop.xlane.xlu2 %3658 }
0x10bd   : > { %v3667_v35 = vsub.f32 %v3651_v21, %v3659_v32 }
0x10bf   : > { %v3672_v36 = vmul.f32 1.442695, %v3667_v35 }
0x10c1   : > { %5443 = vpow2.f32 %v3672_v36 }
0x10c7   : > { %v5444_v37 = vpop.eup %5443 }
0x10c8   : > { %v3681_v39 = vsel %vm1653_vm5, %v5444_v37, 0.0 }
0x10c9   : > { %3682 = vadd.xlane.f32.xlu2 %v3681_v39  ;;  %v5375_v39 = vld [vmem:[#allocation16 + $0x6] ss:$0 sm:$0xff] }
0x10e0   : > { %v3356_v43 = vpop.f32.mrf.mxu2  ;;  %v3662_v44 = vpop.xlane.xlu1 %3661 }
0x10e1   : > { %v3668_v45 = vsub.f32 %v3652_v19, %v3662_v44  ;;  %3538 = vrot.lane.b32.xlu2 %v3521_v26, %s6290_s1  ;;  %v3357_v58 = vadd.f32 %v5374_v57, %v3356_v43  ;;  %v5376_v44 = vld [vmem:[#allocation16 + $0x7] ss:$0 sm:$0xff] }
0x10e3   : > { %v3674_v47 = vmul.f32 1.442695, %v3668_v45  ;;  %v3359_v59 = vadd.f32 %v3357_v58, %v3287_v15 }
0x10e5   : > { %5445 = vpow2.f32 %v3674_v47  ;;  %v3364_v60 = vsel %vm2203_vm15, %v3359_v59, 0.0 }
0x10e6   : > { %5447 = vpow2.f32 %v3670_v42  ;;  %v3449_v42 = vld [vmem:[%s7405_s18 + $0x18] sm:$0xff] }
0x10e8   : > { %v3640_v49 = vpop.f32.mrf.mxu2 }
0x10e9   : > { %v3646_v51 = vmul.f32 %v3640_v49, %v6979_v38  ;;  %v3448_v49 = vld [vmem:[%s7405_s18 + $0x10] sm:$0xff] }
0x10eb   : > { %v5446_v52 = vpop.eup %5445  ;;  %v3653_v53 = vsel %vm3647_vm11, -1e+30, %v3646_v51 }
0x10ec   : > { %v3663_v54 = vsel %vm1653_vm5, %v3653_v53, -inf  ;;  %v3684_v55 = vsel %vm1653_vm5, %v5446_v52, 0.0  ;;  %v5448_v56 = vpop.eup %5447 }
0x10ed   : > { %3664 = vmax.xlane.f32.xlu0 %v3663_v54  ;;  %3685 = vadd.xlane.f32.xlu1 %v3684_v55  ;;  %v3678_v50 = vsel %vm1653_vm5, %v5448_v56, 0.0 }
0x10f5   : > { %3679 = vadd.xlane.f32.xlu0 %v3678_v50 }
0x1109   : > { %3544 = vrot.lane.b32.xlu0 %v3521_v26, %s6291_s16 }
0x1133   : > { %3365 = vadd.xlane.f32.xlu0 %v3364_v60 }
0x113c   : > { %v3683_v1 = vpop.xlane.xlu2 %3682 }
0x113d   : > { %5449 = vrcp.f32 %v3683_v1 }
0x1143   : > { %v5450_v2 = vpop.eup %5449 }
0x1144   : > { %v3695_v61 = vmul.f32 %v5450_v2, %v5444_v37  ;;  %v3539_v62 = vpop.permute.xlu2 %3538 }
0x1145   : > { %3739 = vmatpush.msrb.mxu0 %v3539_v62 }
0x1146   : > { %5096 = vmatmul.msk.f32.vlgmr.msrb.gmra.mxu0 %vm1653_vm5, %v3695_v61 }
0x1147   : > { %3831 = vmatpush.msra.mxu0 %v3447_v13  ;;  %v3935_v13 = vld [vmem:[#allocation24 + $0x30] sm:$0xff] }
0x1160   : > { %v3665_v63 = vpop.xlane.xlu0 %3664  ;;  %v3686_v21 = vpop.xlane.xlu1 %3685 }
0x1161   : > { %v3669_v0 = vsub.f32 %v3653_v53, %v3665_v63 }
0x1163   : > { %v3676_v3 = vmul.f32 1.442695, %v3669_v0  ;;  %v5377_v0 = vld [vmem:[#allocation22] ss:$0 sm:$0xff] }
0x1165   : > { %5451 = vpow2.f32 %v3676_v3 }
0x1168   : > { %v3680_v6 = vpop.xlane.xlu0 %3679 }
0x1169   : > { %5453 = vrcp.f32 %v3680_v6 }
0x116b   : > { %v5452_v11 = vpop.eup %5451 }
0x116c   : > { %v3687_v9 = vsel %vm1653_vm5, %v5452_v11, 0.0 }
0x116d   : > { %3688 = vadd.xlane.f32.xlu1 %v3687_v9 }
0x116f   : > { %v5454_v12 = vpop.eup %5453 }
0x1170   : > { %v3694_v34 = vmul.f32 %v5454_v12, %v5448_v56 }
0x1172   : > { %5095 = vmatmul.msk.f32.vlgmr.msrb.gmra.mxu3 %vm1653_vm5, %v3694_v34  ;;  %v3936_v34 = vld [vmem:[#allocation24 + $0x38] sm:$0xff] }
0x1173   : > { %3995 = vmatpush.msrb.mxu0 %v3936_v34 }
0x1175   : > { %3996 = vmatpush.msrb.mxu0 %v3935_v13 }
0x117b   : > { %v3545_v5 = vpop.permute.xlu0 %3544 }
0x117c   : > { %3785 = vmatpush.msrb.mxu2 %v3545_v5  ;;  %v3943_v5 = vld [vmem:[#allocation24 + $0x58] sm:$0xff] }
0x117e   : > { %3877 = vmatpush.msra.mxu2 %v3449_v42  ;;  %v3929_v42 = vld [vmem:[#allocation24 + $0x10] sm:$0xff] }
0x1186   : > { %3541 = vrot.lane.b32.xlu1 %v3521_v26, %s6292_s23 }
0x11a6   : > { %v3366_v7 = vpop.xlane.xlu0 %3365 }
0x11a7   : > { %v3367_v14 = vmul.f32 %v3366_v7, %v7019_v10  ;;  %v3942_v7 = vld [vmem:[#allocation24 + $0x50] sm:$0xff] }
0x11a9   : > { %v3368_v15 = vsub.f32 %v3359_v59, %v3367_v14  ;;  %v3934_v14 = vld [vmem:[#allocation24 + $0x28] sm:$0xff] }
0x11aa   : > { %3997 = vmatpush.msrb.mxu0 %v3934_v14 }
0x11ab   : > { %v3369_v16 = vmul.f32 %v3368_v15, %v3368_v15 }
0x11ad   : > { %v3370_v17 = vsel %vm2203_vm15, %v3369_v16, 0.0  ;;  %v3933_v16 = vld [vmem:[#allocation24 + $0x20] sm:$0xff] }
0x11ae   : > { %3371 = vadd.xlane.f32.xlu2 %v3370_v17  ;;  %v3940_v17 = vld [vmem:[#allocation24 + $0x40] sm:$0xff]  ;;  %3998 = vmatpush.msrb.mxu0 %v3933_v16 }
0x11c3   : > { %v3741_v18 = vpop.f32.mrf.mxu0 }
0x11c4   : > { %5100 = vmatmul.msk.f32.vlgmr.msra.gmra.mxu0 %vm1653_vm5, %v3741_v18 }
0x11e0   : > { %v3689_v22 = vpop.xlane.xlu1 %3688 }
0x11e1   : > { %5455 = vrcp.f32 %v3689_v22 }
0x11e2   : > { %5457 = vrcp.f32 %v3686_v21 }
0x11e7   : > { %v5456_v23 = vpop.eup %5455 }
0x11e8   : > { %v3697_v24 = vmul.f32 %v5456_v23, %v5452_v11  ;;  %v5458_v27 = vpop.eup %5457 }
0x11e9   : > { %v3696_v29 = vmul.f32 %v5458_v27, %v5446_v52 }
0x11ea   : > { %5098 = vmatmul.msk.f32.vlgmr.msrb.gmra.mxu2 %vm1653_vm5, %v3697_v24 }
0x11f5   : > { %v3718_v28 = vpop.f32.mrf.mxu3 }
0x11f6   : > { %5099 = vmatmul.msk.f32.vlgmr.msra.gmra.mxu3 %vm1653_vm5, %v3718_v28 }
0x11f8   : > { %v3542_v30 = vpop.permute.xlu1 %3541 }
0x11f9   : > { %3762 = vmatpush.msra.mxu1 %v3542_v30 }
0x11fa   : > { %5097 = vmatmul.msk.f32.vlgmr.msra.gmra.mxu1 %vm1653_vm5, %v3696_v29  ;;  %v5378_v29 = vld [vmem:[#allocation18] ss:$0 sm:$0xff] }
0x11fb   : > { %3854 = vmatpush.msrb.mxu1 %v3448_v49  ;;  %v3928_v49 = vld [vmem:[#allocation24 + $0x8] sm:$0xff] }
0x11fd   : > { %4018 = vmatpush.msra.mxu1 %v3943_v5 }
0x11ff   : > { %4019 = vmatpush.msra.mxu1 %v3942_v7 }
0x1221   : > { %v3372_v26 = vpop.xlane.xlu2 %3371 }
0x1222   : > { %v3373_v31 = vmul.f32 %v3372_v26, %v7019_v10 }
0x1224   : > { %v3374_v8 = vadd.f32 1e-05, %v3373_v31  ;;  %v5379_v31 = vld [vmem:[#allocation18 + $0x1] ss:$0 sm:$0xff] }
0x1226   : > { %5459 = vrsqrt.f32 %v3374_v8  ;;  %vm3381_vm1 = vweird.f32 %v3374_v8 }
0x122c   : > { %v5460_v19 = vpop.eup %5459 }
0x122d   : > { %v3376_v33 = vmul.f32 %v5460_v19, %v3374_v8  ;;  %vm3382_vm0 = vweird.f32 %v5460_v19 }
0x122e   : > { %vm3383_vm3 = vmor %vm3381_vm1, %vm3382_vm0 }
0x122f   : > { %v3377_v32 = vmul.f32 %v5460_v19, %v3376_v33 }
0x1231   : > { %v3378_v35 = vmul.f32 0.5, %v3377_v32 }
0x1233   : > { %v3379_v36 = vsub.f32 1.5, %v3378_v35 }
0x1235   : > { %v3380_v37 = vmul.f32 %v5460_v19, %v3379_v36 }
0x1237   : > { %v3384_v41 = vsel %vm3383_vm3, %v5460_v19, %v3380_v37 }
0x1238   : > { %v3385_v43 = vmul.f32 %v3384_v41, %v3368_v15  ;;  %v3941_v15 = vld [vmem:[#allocation24 + $0x48] sm:$0xff]  ;;  %v5381_v41 = vld [vmem:[#allocation25 + $0x2] ss:$0 sm:$0xff] }
0x1239   : > { %4020 = vmatpush.msra.mxu1 %v3941_v15 }
0x123a   : > { %v3389_v45 = vmul.f32 %v5375_v39, %v3385_v43  ;;  %v5380_v39 = vld [vmem:[#allocation25 + $0x1] ss:$0 sm:$0xff] }
0x123b   : > { %4021 = vmatpush.msra.mxu1 %v3940_v17 }
0x123c   : > { %v3393_v46 = vadd.f32 %v5376_v44, %v3389_v45 }
0x123e   : > { %v3397_v47 = vsel %vm2203_vm15, %v3393_v46, 0.0 }
0x123f   : > { %3398 = vadd.xlane.f32.xlu0 %v3397_v47  ;;  %v3930_v47 = vld [vmem:[#allocation24 + $0x18] sm:$0xff] }
0x1240   : > { %3969 = vmatpush.msrb.mxu3 %v3930_v47 }
0x1241   : > { %v3833_v58 = vpop.f32.mrf.mxu0 }
0x1242   : > { %v3883_v60 = vsel %vm2203_vm15, %v3833_v58, 0.0  ;;  %3970 = vmatpush.msrb.mxu3 %v3929_v42 }
0x1244   : > { %3971 = vmatpush.msrb.mxu3 %v3928_v49 }
0x126d   : > { %v3787_v51 = vpop.f32.mrf.mxu2 }
0x126e   : > { %5102 = vmatmul.msk.f32.vlgmr.msra.gmra.mxu2 %vm1653_vm5, %v3787_v51  ;;  %v3927_v51 = vld [vmem:[#allocation24] sm:$0xff] }
0x126f   : > { %3972 = vmatpush.msrb.mxu3 %v3927_v51 }
0x1277   : > { %v3764_v52 = vpop.f32.mrf.mxu1 }
0x1278   : > { %5101 = vmatmul.msk.f32.vlgmr.msrb.gmra.mxu1 %vm1653_vm5, %v3764_v52 }
0x1279   : > { %v3810_v57 = vpop.f32.mrf.mxu3 }
0x127a   : > { %v3882_v59 = vsel %vm2203_vm15, %v3810_v57, 0.0 }
0x127b   : > { %v3884_v1 = vadd.f32 %v3883_v60, %v3882_v59  ;;  %v5382_v60 = vld [vmem:[#allocation34] ss:$0 sm:$0xff] }
0x12b2   : > { %v3399_v53 = vpop.xlane.xlu0 %3398 }
0x12b3   : > { %v3400_v54 = vmul.f32 %v3399_v53, %v7019_v10 }
0x12b5   : > { %v3401_v55 = vsub.f32 %v3393_v46, %v3400_v54 }
0x12b7   : > { %v3402_v56 = vmul.f32 %v3401_v55, %v3401_v55 }
0x12b9   : > { %v3403_v50 = vsel %vm2203_vm15, %v3402_v56, 0.0 }
0x12ba   : > { %3404 = vadd.xlane.f32.xlu0 %v3403_v50 }
0x12f1   : > { %v3879_v2 = vpop.f32.mrf.mxu2 }
0x12f2   : > { %v3887_v3 = vsel %vm2203_vm15, %v3879_v2, 0.0 }
0x12f5   : > { %v3856_v61 = vpop.f32.mrf.mxu1 }
0x12f6   : > { %v3885_v62 = vsel %vm2203_vm15, %v3856_v61, 0.0  ;;  %v5383_v61 = vld [vmem:[#allocation34 + $0x1] ss:$0 sm:$0xff] }
0x12f7   : > { %v3886_v63 = vadd.f32 %v3885_v62, %v3884_v1 }
0x12f9   : > { %v3888_v6 = vadd.f32 %v3887_v3, %v3886_v63 }
0x12fb   : > { %v3892_v11 = vadd.f32 %v5377_v0, %v3888_v6 }
0x12fd   : > { %v3893_v9 = vadd.f32 %v3892_v11, %v7108_v4  ;;  %v5384_v11 = vld [vmem:[#allocation25] ss:$0 sm:$0xff] }
0x12ff   : > { %v3897_v12 = vsel %vm2203_vm15, %v3893_v9, 0.0 }
0x1300   : > { %3898 = vadd.xlane.f32.xlu1 %v3897_v12 }
0x132d   : > { %v3405_v4 = vpop.xlane.xlu0 %3404 }
0x132e   : > { %v3406_v18 = vmul.f32 %v3405_v4, %v7019_v10 }
0x1330   : > { %v3407_v20 = vadd.f32 1e-05, %v3406_v18 }
0x1332   : > { %5461 = vrsqrt.f32 %v3407_v20  ;;  %vm3414_vm6 = vweird.f32 %v3407_v20 }
0x1338   : > { %v5462_v21 = vpop.eup %5461 }
0x1339   : > { %v3409_v22 = vmul.f32 %v5462_v21, %v3407_v20  ;;  %vm3415_vm4 = vweird.f32 %v5462_v21 }
0x133a   : > { %vm3416_vm8 = vmor %vm3414_vm6, %vm3415_vm4 }
0x133b   : > { %v3410_v23 = vmul.f32 %v5462_v21, %v3409_v22 }
0x133d   : > { %v3411_v24 = vmul.f32 0.5, %v3410_v23 }
0x133f   : > { %v3412_v27 = vsub.f32 1.5, %v3411_v24 }
0x1341   : > { %v3413_v28 = vmul.f32 %v5462_v21, %v3412_v27 }
0x1343   : > { %v3417_v30 = vsel %vm3416_vm8, %v5462_v21, %v3413_v28 }
0x1344   : > { %v3418_v26 = vmul.f32 %v3417_v30, %v3401_v55 }
0x1346   : > { %v3422_v8 = vmul.f32 %v5378_v29, %v3418_v26 }
0x1348   : > { %v3426_v19 = vadd.f32 %v5379_v31, %v3422_v8 }
0x134a   : > { %5104 = vmatmul.msk.f32.vlgmr.msrb.gmra.mxu0 %vm2203_vm15, %v3426_v19  ;;  %5105 = vmatmul.msk.f32.vlgmr.msra.gmra.mxu1 %vm2203_vm15, %v3426_v19 }
0x1373   : > { %v3899_v33 = vpop.xlane.xlu1 %3898 }
0x1374   : > { %v3900_v32 = vmul.f32 %v3899_v33, %v7019_v10 }
0x1376   : > { %v3901_v35 = vsub.f32 %v3893_v9, %v3900_v32 }
0x1378   : > { %v3902_v36 = vmul.f32 %v3901_v35, %v3901_v35 }
0x137a   : > { %v3903_v37 = vsel %vm2203_vm15, %v3902_v36, 0.0 }
0x137b   : > { %3904 = vadd.xlane.f32.xlu2 %v3903_v37 }
0x13c7   : > { %v4000_v43 = vpop.f32.mrf.mxu0  ;;  %v4023_v44 = vpop.f32.mrf.mxu1 }
0x13c8   : > { %v4001_v45 = vadd.f32 %v5380_v39, %v4000_v43  ;;  %v7216_v46 = vadd.f32 %v5381_v41, %v4023_v44 }
0x13ca   : > { %4036 = vrot.lane.b32.xlu0 %v4001_v45, %s6292_s23  ;;  %4034 = vrot.lane.b32.xlu1 %v4001_v45, %s6290_s1 }
0x13cb   : > { %5106 = vmatpush.xpose.msk.msrb.mxu2 %vm1653_vm5, %v4001_v45 }
0x13cf   : > { %4216 = vmatpush.msra.mxu2 %v7216_v46 }
0x13d2   : > { %4038 = vrot.lane.b32.xlu0 %v4001_v45, %s6291_s16 }
0x13ee   : > { %v3905_v52 = vpop.xlane.xlu2 %3904 }
0x13ef   : > { %v3906_v53 = vmul.f32 %v3905_v52, %v7019_v10 }
0x13f1   : > { %v3907_v54 = vadd.f32 1e-05, %v3906_v53 }
0x13f3   : > { %5463 = vrsqrt.f32 %v3907_v54  ;;  %vm3914_vm10 = vweird.f32 %v3907_v54 }
0x13f9   : > { %v5464_v55 = vpop.eup %5463 }
0x13fa   : > { %v3909_v56 = vmul.f32 %v5464_v55, %v3907_v54  ;;  %vm3915_vm9 = vweird.f32 %v5464_v55 }
0x13fb   : > { %vm3916_vm11 = vmor %vm3914_vm10, %vm3915_vm9 }
0x13fc   : > { %v3910_v50 = vmul.f32 %v5464_v55, %v3909_v56 }
0x13fe   : > { %v3911_v57 = vmul.f32 0.5, %v3910_v50 }
0x1400   : > { %v3912_v58 = vsub.f32 1.5, %v3911_v57 }
0x1402   : > { %v3913_v59 = vmul.f32 %v5464_v55, %v3912_v58 }
0x1404   : > { %v3917_v1 = vsel %vm3916_vm11, %v5464_v55, %v3913_v59 }
0x1405   : > { %v3918_v2 = vmul.f32 %v3917_v1, %v3901_v35 }
0x1407   : > { %v3922_v62 = vmul.f32 %v5382_v60, %v3918_v2  ;;  %v3946_v60 = vld [vmem:[#allocation27] sm:$0xff] }
0x1409   : > { %v7224_v63 = vadd.f32 %v5383_v61, %v3922_v62 }
0x140b   : > { %5103 = vmatmul.msk.f32.vlgmr.msrb.gmra.mxu3 %vm2203_vm15, %v7224_v63 }
0x143c   : > { %v4037_v0 = vpop.permute.xlu0 %4036  ;;  %v4035_v3 = vpop.permute.xlu1 %4034 }
0x143d   : > { %5108 = vmatpush.xpose.msk.msra.mxu3 %vm1653_vm5, %v4035_v3  ;;  %5110 = vmatpush.xpose.msk.msra.mxu0 %vm1653_vm5, %v4037_v0 }
0x1444   : > { %v4039_v6 = vpop.permute.xlu0 %4038 }
0x1445   : > { %5112 = vmatpush.xpose.msk.msrb.mxu1 %vm1653_vm5, %v4039_v6  ;;  %v3948_v6 = vld [vmem:[#allocation27 + $0x10] sm:$0xff] }
0x148e   : > { %v3974_v9 = vpop.f32.mrf.mxu3 }
0x148f   : > { %v3975_v12 = vadd.f32 %v5384_v11, %v3974_v9  ;;  %v3947_v11 = vld [vmem:[#allocation27 + $0x8] sm:$0xff] }
0x1491   : > { %4031 = vrot.lane.b32.xlu1 %v3975_v12, %s6291_s16  ;;  %4027 = vrot.lane.b32.xlu2 %v3975_v12, %s6290_s1 }
0x1492   : > { %5107 = vmatmul.msk.f32.vlgmr.msrb.gmra.mxu2 %vm1653_vm5, %v3975_v12 }
0x1493   : > { %4308 = vmatpush.msrb.mxu2 %v3946_v60  ;;  %v5388_v60 = vld [vmem:[#allocation31] ss:$0 sm:$0xff] }
0x1499   : > { %4029 = vrot.lane.b32.xlu2 %v3975_v12, %s6292_s23  ;;  %v3949_v12 = vld [vmem:[#allocation27 + $0x18] sm:$0xff] }
0x14eb   : > { %v4028_v34 = vpop.permute.xlu2 %4027 }
0x14ec   : > { %5109 = vmatmul.msk.f32.vlgmr.msra.gmra.mxu3 %vm1653_vm5, %v4028_v34 }
0x14f3   : > { %v4030_v5 = vpop.permute.xlu2 %4029 }
0x14f4   : > { %5111 = vmatmul.msk.f32.vlgmr.msra.gmra.mxu0 %vm1653_vm5, %v4030_v5 }
0x1503   : > { %v4032_v13 = vpop.permute.xlu1 %4031 }
0x1504   : > { %5113 = vmatmul.msk.f32.vlgmr.msrb.gmra.mxu1 %vm1653_vm5, %v4032_v13 }
0x1515   : > { %v4071_v7 = vpop.f32.mrf.mxu2 }
0x1516   : > { %v4146_v14 = vmul.f32 %v4071_v7, %v6979_v38 }
0x1518   : > { %v4150_v15 = vadd.f32 %v4146_v14, %v6981_v40 }
0x151a   : > { %v4154_v16 = vsel %vm1653_vm5, %v4150_v15, -inf }
0x151b   : > { %4155 = vmax.xlane.f32.xlu0 %v4154_v16 }
0x156f   : > { %v4095_v17 = vpop.f32.mrf.mxu3 }
0x1570   : > { %v4147_v4 = vmul.f32 %v4095_v17, %v6979_v38 }
0x1571   : > { %v4119_v18 = vpop.f32.mrf.mxu0 }
0x1572   : > { %v4148_v20 = vmul.f32 %v4119_v18, %v6979_v38  ;;  %v4151_v21 = vadd.f32 %v4147_v4, %v6981_v40 }
0x1574   : > { %v4157_v22 = vsel %vm1653_vm5, %v4151_v21, -inf  ;;  %v4152_v23 = vadd.f32 %v4148_v20, %v6981_v40 }
0x1575   : > { %4158 = vmax.xlane.f32.xlu2 %v4157_v22 }
0x1576   : > { %v4160_v24 = vsel %vm1653_vm5, %v4152_v23, -inf }
0x1577   : > { %4161 = vmax.xlane.f32.xlu1 %v4160_v24 }
0x1581   : > { %v4143_v27 = vpop.f32.mrf.mxu1 }
0x1582   : > { %v4149_v28 = vmul.f32 %v4143_v27, %v6979_v38 }
0x1584   : > { %v4153_v29 = vadd.f32 %v4149_v28, %v6981_v40 }
0x1586   : > { %v4163_v30 = vsel %vm1653_vm5, %v4153_v29, -inf }
0x1587   : > { %4164 = vmax.xlane.f32.xlu0 %v4163_v30 }
0x158e   : > { %v4156_v26 = vpop.xlane.xlu0 %4155 }
0x158f   : > { %v4166_v31 = vsub.f32 %v4150_v15, %v4156_v26 }
0x1591   : > { %v4170_v8 = vmul.f32 1.442695, %v4166_v31 }
0x1593   : > { %5465 = vpow2.f32 %v4170_v8 }
0x1599   : > { %v5466_v19 = vpop.eup %5465 }
0x159a   : > { %v4178_v33 = vsel %vm1653_vm5, %v5466_v19, 0.0 }
0x159b   : > { %4179 = vadd.xlane.f32.xlu2 %v4178_v33  ;;  %4041 = vrot.lane.b32.xlu0 %v7216_v46, %s6290_s1  ;;  %v4430_v33 = vld [vmem:[#allocation30 + $0x10] sm:$0xff]  ;;  %s1508_s1 = scalar_lea.vmem %s6487_s20, %s4971_s11 }
0x15e8   : > { %v4159_v37 = vpop.xlane.xlu2 %4158 }
0x15e9   : > { %v4167_v43 = vsub.f32 %v4151_v21, %v4159_v37  ;;  %v5385_v21 = vld [vmem:[#allocation28] ss:$0 sm:$0xff] }
0x15ea   : > { %v4162_v32 = vpop.xlane.xlu1 %4161 }
0x15eb   : > { %v4168_v35 = vsub.f32 %v4152_v23, %v4162_v32  ;;  %v4172_v45 = vmul.f32 1.442695, %v4167_v43  ;;  %v4428_v32 = vld [vmem:[#allocation30] sm:$0xff]  ;;  %v4463_v43 = vld [vmem:[%s7406_s5 + $0x18] sm:$0xff] }
0x15ed   : > { %v4174_v36 = vmul.f32 1.442695, %v4168_v35  ;;  %v4467_v35 = vld [vmem:[%s7406_s5 + $0x38] sm:$0xff] }
0x15ef   : > { %5467 = vpow2.f32 %v4174_v36  ;;  %v4466_v36 = vld [vmem:[%s7406_s5 + $0x30] sm:$0xff] }
0x15f5   : > { %v5468_v38 = vpop.eup %5467 }
0x15f6   : > { %v4184_v40 = vsel %vm1653_vm5, %v5468_v38, 0.0 }
0x15f7   : > { %4185 = vadd.xlane.f32.xlu2 %v4184_v40 }
0x15fa   : > { %v4165_v39 = vpop.xlane.xlu0 %4164 }
0x15fb   : > { %v4169_v41 = vsub.f32 %v4153_v29, %v4165_v39  ;;  %v4464_v39 = vld [vmem:[%s7406_s5 + $0x20] sm:$0xff] }
0x15fd   : > { %v4176_v44 = vmul.f32 1.442695, %v4169_v41 }
0x15ff   : > { %5469 = vpow2.f32 %v4176_v44 }
0x1600   : > { %5471 = vpow2.f32 %v4172_v45 }
0x1605   : > { %v5470_v47 = vpop.eup %5469 }
0x1606   : > { %v4187_v42 = vsel %vm1653_vm5, %v5470_v47, 0.0  ;;  %v5472_v49 = vpop.eup %5471 }
0x1607   : > { %4188 = vadd.xlane.f32.xlu1 %v4187_v42  ;;  %v4181_v53 = vsel %vm1653_vm5, %v5472_v49, 0.0 }
0x160d   : > { %v4042_v51 = vpop.permute.xlu0 %4041 }
0x160e   : > { %v4180_v52 = vpop.xlane.xlu2 %4179  ;;  %4239 = vmatpush.msrb.mxu3 %v4042_v51 }
0x160f   : > { %5473 = vrcp.f32 %v4180_v52  ;;  %4044 = vrot.lane.b32.xlu2 %v7216_v46, %s6292_s23  ;;  %4182 = vadd.xlane.f32.xlu1 %v4181_v53  ;;  %v5386_v52 = vld [vmem:[#allocation34 + $0x2] ss:$0 sm:$0xff] }
0x1610   : > { %4331 = vmatpush.msra.mxu3 %v3947_v11 }
0x1615   : > { %v5474_v54 = vpop.eup %5473 }
0x1616   : > { %v4194_v55 = vmul.f32 %v5474_v54, %v5466_v19  ;;  %v4431_v19 = vld [vmem:[#allocation30 + $0x18] sm:$0xff] }
0x1618   : > { %5114 = vmatmul.msk.f32.vlgmr.msra.gmra.mxu2 %vm1653_vm5, %v4194_v55  ;;  %v5387_v55 = vld [vmem:[#allocation34 + $0x3] ss:$0 sm:$0xff] }
0x1619   : > { %4451 = vmatpush.msra.mxu2 %v4431_v19 }
0x161b   : > { %4452 = vmatpush.msra.mxu2 %v4430_v33  ;;  %v4566_v33 = vld [vmem:[%s6477_s19 + $0x18] sm:$0xff] }
0x1628   : > { %4047 = vrot.lane.b32.xlu1 %v7216_v46, %s6291_s16 }
0x166a   : > { %v4186_v56 = vpop.xlane.xlu2 %4185 }
0x166b   : > { %5475 = vrcp.f32 %v4186_v56 }
0x1671   : > { %v5476_v50 = vpop.eup %5475 }
0x1672   : > { %v4196_v57 = vmul.f32 %v5476_v50, %v5468_v38  ;;  %v4045_v58 = vpop.permute.xlu2 %4044  ;;  %v4465_v38 = vld [vmem:[%s7406_s5 + $0x28] sm:$0xff] }
0x1673   : > { %4262 = vmatpush.msrb.mxu0 %v4045_v58  ;;  %v4461_v58 = vld [vmem:[%s7406_s5 + $0x8] sm:$0xff] }
0x1674   : > { %5116 = vmatmul.msk.f32.vlgmr.msrb.gmra.mxu0 %vm1653_vm5, %v4196_v57  ;;  %v4462_v57 = vld [vmem:[%s7406_s5 + $0x10] sm:$0xff] }
0x1675   : > { %4354 = vmatpush.msra.mxu0 %v3948_v6 }
0x1677   : > { %4586 = vmatpush.msrb.mxu0 %v4566_v33 }
0x167a   : > { %v4189_v59 = vpop.xlane.xlu1 %4188 }
0x1682   : > { %v4183_v1 = vpop.xlane.xlu1 %4182 }
0x1683   : > { %5477 = vrcp.f32 %v4183_v1 }
0x1684   : > { %5479 = vrcp.f32 %v4189_v59  ;;  %v4460_v59 = vld [vmem:[%s7406_s5] sm:$0xff] }
0x1689   : > { %v5478_v2 = vpop.eup %5477 }
0x168a   : > { %v4195_v61 = vmul.f32 %v5478_v2, %v5472_v49  ;;  %v5480_v62 = vpop.eup %5479 }
0x168b   : > { %v4197_v46 = vmul.f32 %v5480_v62, %v5470_v47  ;;  %v5389_v62 = vld [vmem:[#allocation33] ss:$0 sm:$0xff] }
0x168c   : > { %5115 = vmatmul.msk.f32.vlgmr.msrb.gmra.mxu3 %vm1653_vm5, %v4195_v61 }
0x168d   : > { %4483 = vmatpush.msrb.mxu3 %v4467_v35  ;;  %v4563_v35 = vld [vmem:[%s6477_s19] sm:$0xff] }
0x168f   : > { %4484 = vmatpush.msrb.mxu3 %v4466_v36 }
0x1691   : > { %4485 = vmatpush.msrb.mxu3 %v4465_v38 }
0x1693   : > { %4486 = vmatpush.msrb.mxu3 %v4464_v39 }
0x1695   : > { %4487 = vmatpush.msrb.mxu3 %v4463_v43 }
0x1697   : > { %4488 = vmatpush.msrb.mxu3 %v4462_v57 }
0x1699   : > { %4489 = vmatpush.msrb.mxu3 %v4461_v58 }
0x169a   : > { %v4048_v0 = vpop.permute.xlu1 %4047 }
0x169b   : > { %v4218_v3 = vpop.f32.mrf.mxu2  ;;  %4285 = vmatpush.msra.mxu1 %v4048_v0  ;;  %4490 = vmatpush.msrb.mxu3 %v4460_v59 }
0x169c   : > { %5118 = vmatmul.msk.f32.vlgmr.msrb.gmra.mxu2 %vm1653_vm5, %v4218_v3  ;;  %5117 = vmatmul.msk.f32.vlgmr.msra.gmra.mxu1 %vm1653_vm5, %v4197_v46 }
0x169d   : > { %4377 = vmatpush.msrb.mxu1 %v3949_v12 }
0x16f1   : > { %v4264_v9 = vpop.f32.mrf.mxu0 }
0x16f2   : > { %5120 = vmatmul.msk.f32.vlgmr.msra.gmra.mxu0 %vm1653_vm5, %v4264_v9 }
0x170f   : > { %v4241_v34 = vpop.f32.mrf.mxu3 }
0x1710   : > { %5119 = vmatmul.msk.f32.vlgmr.msra.gmra.mxu3 %vm1653_vm5, %v4241_v34 }
0x1719   : > { %v4287_v5 = vpop.f32.mrf.mxu1 }
0x171a   : > { %5121 = vmatmul.msk.f32.vlgmr.msrb.gmra.mxu1 %vm1653_vm5, %v4287_v5 }
0x171f   : > { %v4310_v13 = vpop.f32.mrf.mxu2 }
0x1720   : > { %v4382_v15 = vsel %vm2203_vm15, %v4310_v13, 0.0 }
0x176f   : > { %v4356_v7 = vpop.f32.mrf.mxu0 }
0x1770   : > { %v4385_v4 = vsel %vm2203_vm15, %v4356_v7, 0.0 }
0x1793   : > { %v4333_v14 = vpop.f32.mrf.mxu3 }
0x1794   : > { %v4383_v16 = vsel %vm2203_vm15, %v4333_v14, 0.0 }
0x1795   : > { %v4384_v17 = vadd.f32 %v4383_v16, %v4382_v15 }
0x1797   : > { %v4379_v18 = vpop.f32.mrf.mxu1  ;;  %v4386_v20 = vadd.f32 %v4385_v4, %v4384_v17 }
0x1798   : > { %v4387_v22 = vsel %vm2203_vm15, %v4379_v18, 0.0 }
0x1799   : > { %v4388_v23 = vadd.f32 %v4387_v22, %v4386_v20 }
0x179b   : > { %v4392_v24 = vadd.f32 %v5385_v21, %v4388_v23  ;;  %v5390_v21 = vld [vmem:[#allocation34 + $0x4] ss:$0 sm:$0xff] }
0x179d   : > { %v4393_v27 = vadd.f32 %v4392_v24, %v7224_v63  ;;  %v4429_v63 = vld [vmem:[#allocation30 + $0x8] sm:$0xff] }
0x179e   : > { %4453 = vmatpush.msra.mxu2 %v4429_v63  ;;  %v5391_v24 = vld [vmem:[#allocation34 + $0x5] ss:$0 sm:$0xff]  ;;  %v4565_v63 = vld [vmem:[%s6477_s19 + $0x10] sm:$0xff] }
0x179f   : > { %v4398_v28 = vsel %vm2203_vm15, %v4393_v27, 0.0  ;;  %4587 = vmatpush.msrb.mxu0 %v4565_v63 }
0x17a0   : > { %4399 = vadd.xlane.f32.xlu0 %v4398_v28  ;;  %4454 = vmatpush.msra.mxu2 %v4428_v32  ;;  %v4564_v32 = vld [vmem:[%s6477_s19 + $0x8] sm:$0xff] }
0x17a1   : > { %4588 = vmatpush.msrb.mxu0 %v4564_v32 }
0x17a3   : > { %4589 = vmatpush.msrb.mxu0 %v4563_v35 }
0x1813   : > { %v4400_v29 = vpop.xlane.xlu0 %4399 }
0x1814   : > { %v4401_v30 = vmul.f32 %v4400_v29, %v7019_v10 }
0x1816   : > { %v4402_v26 = vsub.f32 %v4393_v27, %v4401_v30 }
0x1818   : > { %v4403_v31 = vmul.f32 %v4402_v26, %v4402_v26 }
0x181a   : > { %v4404_v8 = vsel %vm2203_vm15, %v4403_v31, 0.0 }
0x181b   : > { %4405 = vadd.xlane.f32.xlu2 %v4404_v8 }
0x188e   : > { %v4406_v40 = vpop.xlane.xlu2 %4405 }
0x188f   : > { %v4407_v37 = vmul.f32 %v4406_v40, %v7019_v10 }
0x1891   : > { %v4408_v41 = vadd.f32 1e-05, %v4407_v37 }
0x1893   : > { %5481 = vrsqrt.f32 %v4408_v41  ;;  %vm4415_vm12 = vweird.f32 %v4408_v41 }
0x1899   : > { %v5482_v44 = vpop.eup %5481 }
0x189a   : > { %v4410_v45 = vmul.f32 %v5482_v44, %v4408_v41  ;;  %vm4416_vm5 = vweird.f32 %v5482_v44 }
0x189b   : > { %vm4417_vm13 = vmor %vm4415_vm12, %vm4416_vm5 }
0x189c   : > { %v4411_v47 = vmul.f32 %v5482_v44, %v4410_v45 }
0x189e   : > { %v4412_v42 = vmul.f32 0.5, %v4411_v47  ;;  %v5392_v47 = vld [vmem:[#allocation36] ss:$0 sm:$0xff] }
0x18a0   : > { %v4413_v49 = vsub.f32 1.5, %v4412_v42 }
0x18a2   : > { %v4414_v51 = vmul.f32 %v5482_v44, %v4413_v49 }
0x18a4   : > { %v4418_v53 = vsel %vm4417_vm13, %v5482_v44, %v4414_v51  ;;  %v5393_v51 = vld [vmem:[#allocation36 + $0x1] ss:$0 sm:$0xff] }
0x18a5   : > { %v4419_v54 = vmul.f32 %v4418_v53, %v4402_v26 }
0x18a7   : > { %v4423_v56 = vmul.f32 %v5386_v52, %v4419_v54 }
0x18a9   : > { %v4427_v50 = vadd.f32 %v5387_v55, %v4423_v56 }
0x18ab   : > { %5122 = vmatmul.msk.f32.vlgmr.msra.gmra.mxu2 %vm2203_vm15, %v4427_v50 }
0x192e   : > { %v4456_v1 = vpop.f32.mrf.mxu2 }
0x192f   : > { %v4457_v2 = vadd.f32 %v5388_v60, %v4456_v1 }
0x1931   : > { %v4459_v61 = vmax.f32 %v4457_v2, 0.0 }
0x1933   : > { %5123 = vmatmul.msk.f32.vlgmr.msrb.gmra.mxu3 %vm2727_vm7, %v4459_v61 }
0x19b6   : > { %v4492_v46 = vpop.f32.mrf.mxu3 }
0x19b7   : > { %v4493_v0 = vadd.f32 %v5389_v62, %v4492_v46 }
0x19b9   : > { %v4495_v3 = vadd.f32 %v4493_v0, %v4427_v50 }
0x19bb   : > { %v4500_v6 = vsel %vm2203_vm15, %v4495_v3, 0.0 }
0x19bc   : > { %4501 = vadd.xlane.f32.xlu1 %v4500_v6 }
0x1a2f   : > { %v4502_v11 = vpop.xlane.xlu1 %4501 }
0x1a30   : > { %v4503_v9 = vmul.f32 %v4502_v11, %v7019_v10 }
0x1a32   : > { %v4504_v12 = vsub.f32 %v4495_v3, %v4503_v9 }
0x1a34   : > { %v4505_v34 = vmul.f32 %v4504_v12, %v4504_v12 }
0x1a36   : > { %v4506_v5 = vsel %vm2203_vm15, %v4505_v34, 0.0 }
0x1a37   : > { %4507 = vadd.xlane.f32.xlu0 %v4506_v5 }
0x1aaa   : > { %v4508_v13 = vpop.xlane.xlu0 %4507 }
0x1aab   : > { %v4509_v7 = vmul.f32 %v4508_v13, %v7019_v10 }
0x1aad   : > { %v4510_v14 = vadd.f32 1e-05, %v4509_v7 }
0x1aaf   : > { %5483 = vrsqrt.f32 %v4510_v14  ;;  %vm4517_vm14 = vweird.f32 %v4510_v14 }
0x1ab5   : > { %v5484_v15 = vpop.eup %5483 }
0x1ab6   : > { %v4512_v16 = vmul.f32 %v5484_v15, %v4510_v14  ;;  %vm4518_vm7 = vweird.f32 %v5484_v15 }
0x1ab7   : > { %vm4519_vm0 = vmor %vm4517_vm14, %vm4518_vm7 }
0x1ab8   : > { %v4513_v17 = vmul.f32 %v5484_v15, %v4512_v16 }
0x1aba   : > { %v4514_v4 = vmul.f32 0.5, %v4513_v17 }
0x1abc   : > { %v4515_v18 = vsub.f32 1.5, %v4514_v4 }
0x1abe   : > { %v4516_v20 = vmul.f32 %v5484_v15, %v4515_v18 }
0x1ac0   : > { %v4520_v22 = vsel %vm4519_vm0, %v5484_v15, %v4516_v20 }
0x1ac1   : > { %v4521_v23 = vmul.f32 %v4520_v22, %v4504_v12 }
0x1ac3   : > { %v4525_v27 = vmul.f32 %v5390_v21, %v4521_v23 }
0x1ac5   : > { %v4529_v28 = vadd.f32 %v5391_v24, %v4525_v27 }
0x1ac7   : > { %v4533_v29 = vsel %vm2203_vm15, %v4529_v28, 0.0 }
0x1ac8   : > { %4534 = vadd.xlane.f32.xlu0 %v4533_v29 }
0x1b3b   : > { %v4535_v30 = vpop.xlane.xlu0 %4534 }
0x1b3c   : > { %v4536_v26 = vmul.f32 %v4535_v30, %v7019_v10 }
0x1b3e   : > { %v4537_v31 = vsub.f32 %v4529_v28, %v4536_v26 }
0x1b40   : > { %v4538_v8 = vmul.f32 %v4537_v31, %v4537_v31 }
0x1b42   : > { %v4539_v19 = vsel %vm2203_vm15, %v4538_v8, 0.0 }
0x1b43   : > { %4540 = vadd.xlane.f32.xlu2 %v4539_v19 }
0x1bb6   : > { %v4541_v36 = vpop.xlane.xlu2 %4540 }
0x1bb7   : > { %v4542_v38 = vmul.f32 %v4541_v36, %v7019_v10  ;;  %v5394_v10 = vld [vmem:[#allocation37] ss:$0 sm:$0xff] }
0x1bb9   : > { %v4543_v40 = vadd.f32 1e-05, %v4542_v38 }
0x1bbb   : > { %5485 = vrsqrt.f32 %v4543_v40  ;;  %vm4550_vm3 = vweird.f32 %v4543_v40 }
0x1bc1   : > { %v5486_v37 = vpop.eup %5485 }
0x1bc2   : > { %v4545_v39 = vmul.f32 %v5486_v37, %v4543_v40  ;;  %vm4551_vm1 = vweird.f32 %v5486_v37 }
0x1bc3   : > { %vm4552_vm4 = vmor %vm4550_vm3, %vm4551_vm1 }
0x1bc4   : > { %v4546_v41 = vmul.f32 %v5486_v37, %v4545_v39 }
0x1bc6   : > { %v4547_v43 = vmul.f32 0.5, %v4546_v41 }
0x1bc8   : > { %v4548_v44 = vsub.f32 1.5, %v4547_v43 }
0x1bca   : > { %v4549_v45 = vmul.f32 %v5486_v37, %v4548_v44 }
0x1bcc   : > { %v4553_v42 = vsel %vm4552_vm4, %v5486_v37, %v4549_v45 }
0x1bcd   : > { %v4554_v49 = vmul.f32 %v4553_v42, %v4537_v31 }
0x1bcf   : > { %v4558_v52 = vmul.f32 %v5392_v47, %v4554_v49 }
0x1bd1   : > { %v4562_v53 = vadd.f32 %v5393_v51, %v4558_v52 }
0x1bd3   : > { %5124 = vmatmul.msk.f32.vlgmr.msrb.gmra.mxu0 %vm2203_vm15, %v4562_v53 }
0x1c50   : > { %v4591_v54 = vpop.f32.mrf.mxu0 }
0x1c51   : > { %v4592_v55 = vadd.f32 %v5394_v10, %v4591_v54 }
0x1c53   : > { %v4594_v56 = vmul.f32 %v4592_v55, %v6878_v48 }
0x1c55   : > { %v4595_v50 = vadd.f32 %v4594_v56, %v6867_v25 }
0x1c57   : > { %4596 = vst.msk [vmem:[%s1508_s1] sm:$0xff] %vm1510_vm2, %v4595_v50 }
0x1c58 PF: > { %s98_s7 = sadd.s32 1, %s6217_s7  }
0x1c59   : > { %p95_p3 = scmp.ge.s32.totalorder %s98_s7, 4  }
0x1c5b   :  { %97 = sbr.rel (!%p95_p3) target bundleno = 80 (0x50), region = 382 }
0x1c60   :  { %4616 = vsyncpa [#allocation3], 1 }
0x1c61   :  { %4618 = vsyncpa [#allocation3 + $0x1], 1 }
0x1c62   :  { %4619 = vsyncpa [#allocation5], 1 }
0x1c63   :  { %4620 = vsyncpa [#allocation8], 1 }
0x1c64   :  { %4621 = vsyncpa [#allocation11], 1 }
0x1c65   :  { %4622 = vsyncpa [#allocation14], 1 }
0x1c66   :  { %4623 = vsyncpa [#allocation17], 1 }
0x1c67   :  { %4624 = vsyncpa [#allocation20], 1 }
0x1c68   :  { %4625 = vsyncpa [#allocation23], 1 }
0x1c69   :  { %4626 = vsyncpa [#allocation26], 1 }
0x1c6a   :  { %4627 = vsyncpa [#allocation29], 1 }
0x1c6b   :  { %4628 = vsyncpa [#allocation32], 1 }
0x1c6c   :  { %4629 = vsyncpa [#allocation35], 1 }
0x1c6d   :  { %4630 = vsyncpa [#allocation38], 1 }

</bundles_post_ra>
